<compile_context>
chip_gen: v7x
topology: tpu7x:2x2x1
jax: 0.10.0
libtpu: 0.0.40
codegen_flags: <defaults>
</compile_context>

<pallas_src>
import functools

import jax
import jax.numpy as jnp
from jax.experimental import pallas as pl
from jax.experimental.pallas import tpu as pltpu

_MiB = 1024 * 1024


# ----------------------------- sizing helpers -----------------------------
def _round_up(n, m):
    return ((n + m - 1) // m) * m


def _sublane_multiple(dtype):
    # Native sublane packing: f32 -> 8, bf16 -> 16, int8/fp8 -> 32.
    return max(8, 32 // jnp.dtype(dtype).itemsize)


def _tpu_generation_params():
    """(per-stage VMEM budget bytes, vmem_limit_bytes) tuned per TPU generation."""
    try:
        kind = jax.devices()[0].device_kind.lower()
    except Exception:
        kind = ""
    if "v7" in kind:
        # v7x: 64 MiB physical VMEM / TC, ~3.2 TB/s HBM -> amortize 0.35us/step overhead.
        return 10 * _MiB, 56 * _MiB
    # v5e / v6e: 128 MiB physical VMEM.
    return 16 * _MiB, 100 * _MiB


def _pick_block_rows(n_rows, per_row_bytes, budget_bytes, row_multiple, min_steps=4):
    """Largest row-block size that (a) is a multiple of `row_multiple` (sublane tiling
    rule) and divides n_rows exactly, (b) fits the per-stage VMEM budget, preferring
    block sizes that yield >= min_steps and an even number of grid steps (v7x megacore
    sharding / pipeline overlap). Falls back to the whole axis (always layout-legal)."""
    cap = max(1, budget_bytes // max(per_row_bytes, 1))
    best_d, best_score = None, None
    d = row_multiple
    limit = min(n_rows, cap)
    while d <= limit:
        if n_rows % d == 0:
            steps = n_rows // d
            score = (steps >= min_steps, steps % 2 == 0, d)
            if best_score is None or score > best_score:
                best_d, best_score = d, score
        d += row_multiple
    if best_d is not None:
        return best_d
    return n_rows


# ----------------------------------- kernels -----------------------------------
def _squeeze_kernel(x_ref, o_ref, *, factor, h, w):
    # x_ref: (bcb, h*w)        lane-dense block of flattened (batch*channel) images
    # o_ref: (bcb, f*f*hf*wf)  lane-dense block of squeezed images, same flat length
    f = factor
    bcb = x_ref.shape[0]
    hf, wf = h // f, w // f
    x = x_ref[...]
    x3 = x.reshape(bcb, hf, f * w)                   # [bc, i, fh*w + (j*f + fw)]
    pieces = []
    for fh in range(f):
        rows = x3[:, :, fh * w:(fh + 1) * w]          # (bcb, hf, w): rows i*f + fh
        rows = rows.reshape(bcb, hf, wf, f)           # split w -> (j, fw)
        for fw in range(f):
            pieces.append(rows[:, :, :, fw].reshape(bcb, hf * wf))
    # Pieces are ordered k = fh*f + fw; one wide, unmasked store for the whole block.
    o_ref[...] = jnp.concatenate(pieces, axis=-1)


def _unsqueeze_kernel(x_ref, o_ref, *, factor, h, w):
    # x_ref: (bcb, f*f*h*w); o_ref: (bcb, (h*f)*(w*f))
    f = factor
    bcb = x_ref.shape[0]
    hw = h * w
    x = x_ref[...]
    row_slabs = []
    for fh in range(f):
        cols = [x[:, (fh * f + fw) * hw:(fh * f + fw + 1) * hw].reshape(bcb, h, w)
                for fw in range(f)]                                   # each (bcb, h, w)
        slab = jnp.stack(cols, axis=-1).reshape(bcb, h, w * f)        # width interleave
        row_slabs.append(slab)
    y = jnp.stack(row_slabs, axis=2)                                  # (bcb, h, f, w*f)
    o_ref[...] = y.reshape(bcb, h * f * w * f)                        # single dense store


# ----------------------------------- wrapper -----------------------------------
def _run_permute(x2, kernel, n_rows, row_len, dtype, bcb, vmem_limit):
    compiler_params = pltpu.CompilerParams(
        dimension_semantics=("parallel",),
        vmem_limit_bytes=vmem_limit,
    )
    return pl.pallas_call(
        kernel,
        out_shape=jax.ShapeDtypeStruct((n_rows, row_len), dtype),
        grid=(n_rows // bcb,),
        in_specs=[pl.BlockSpec((bcb, row_len), lambda i: (i, 0))],
        out_specs=pl.BlockSpec((bcb, row_len), lambda i: (i, 0)),
        compiler_params=compiler_params,
    )(x2)


def squeeze_forward(x, factor=2, reverse=False):
    """Pallas implementation of Squeeze.forward(x, reverse) for NCHW inputs."""
    assert factor > 1 and isinstance(factor, int)
    if x.ndim != 4:
        raise NotImplementedError
    bs, c, h, w = x.shape
    f = factor
    budget, vmem_limit = _tpu_generation_params()
    itemsize = jnp.dtype(x.dtype).itemsize
    row_mult = _sublane_multiple(x.dtype)

    if not reverse:
        assert h % f == 0 and w % f == 0
        hf, wf = h // f, w // f
        bc = bs * c
        row_len = h * w                                  # == f*f*hf*wf (in == out length)
        x2 = x.reshape(bc, row_len)                      # free view
        kernel = functools.partial(_squeeze_kernel, factor=f, h=h, w=w)
        out_reshape = (bs, c * f * f, hf, wf)
    else:
        assert c >= f * f and c % (f * f) == 0
        c_out = c // (f * f)
        bc = bs * c_out
        row_len = f * f * h * w                          # == (h*f)*(w*f)
        x2 = x.reshape(bc, row_len)                      # free view
        kernel = functools.partial(_unsqueeze_kernel, factor=f, h=h, w=w)
        out_reshape = (bs, c_out, h * f, w * f)

    # Lane-dense rows: in + out bytes per (batch, channel) row, incl. 128-lane padding.
    per_row = 2 * _round_up(row_len, 128) * itemsize
    bcb = _pick_block_rows(bc, per_row, budget, row_mult)
    pad = 0
    if bcb == bc and bc > row_mult and bc * per_row > 2 * budget:
        # bc has no tiling-friendly divisor that fits VMEM: pad rows up to a multiple of
        # the sublane count so fat, layout-legal blocks exist (dummy rows sliced below).
        pad = _round_up(bc, row_mult) - bc
        x2 = jnp.pad(x2, ((0, pad), (0, 0)))
        bcb = _pick_block_rows(bc + pad, per_row, budget, row_mult)
    n_rows = bc + pad

    out = _run_permute(x2, kernel, n_rows, row_len, x.dtype, bcb, vmem_limit)
    if pad:
        out = out[:bc]
    return out.reshape(out_reshape)                      # free view


# ---------------- pure-JAX reference (mirrors the PyTorch module) ----------------
def _squeeze_ref(x, f):
    bs, c, h, w = x.shape
    x = x.reshape(bs, c, h // f, f, w // f, f)
    x = jnp.transpose(x, (0, 1, 3, 5, 2, 4))
    return x.reshape(bs, c * f * f, h // f, w // f)


def _unsqueeze_ref(x, f):
    bs, c, h, w = x.shape
    x = x.reshape(bs, c // (f * f), f, f, h, w)
    x = jnp.transpose(x, (0, 1, 4, 2, 5, 3))
    return x.reshape(bs, c // (f * f), h * f, w * f)


if __name__ == "__main__":
    key = jax.random.PRNGKey(0)
    B, C, H, W = 2, 4, 16, 16
    factor = 2
    x = jax.random.normal(key, (B, C, H, W), dtype=jnp.float32)

    # forward (squeeze)
    y = squeeze_forward(x, factor=factor, reverse=False)
    jax.block_until_ready(y)
    y_ref = _squeeze_ref(x, factor)
    assert y.shape == (B, C * factor * factor, H // factor, W // factor)
    assert jnp.allclose(y, y_ref, atol=0, rtol=0)

    # forward (reverse=True, unsqueeze) — round trip back to x
    z = squeeze_forward(y, factor=factor, reverse=True)
    jax.block_until_ready(z)
    z_ref = _unsqueeze_ref(y_ref, factor)
    assert z.shape == x.shape
    assert jnp.allclose(z, z_ref, atol=0, rtol=0)
    assert jnp.allclose(z, x, atol=0, rtol=0)

    print("KERNEL_OK")
</pallas_src>

<mosaic_0001>
module attributes {stable_mosaic.version = 11 : i64} {
  func.func @_squeeze_kernel(%arg0: i32, %arg1: memref<8x256xf32, #tpu.memory_space<vmem>>, %arg2: memref<8x256xf32, #tpu.memory_space<vmem>>) attributes {dimension_semantics = [#tpu.dimension_semantics<parallel>], iteration_bounds = array<i64: 1>, scalar_prefetch = 0 : i64, scratch_operands = 0 : i64, tpu.core_type = #tpu.core_type<tc>, window_params = [{transform_indices = @transform_0, window_bounds = array<i64: 8, 256>}, {transform_indices = @transform_1, window_bounds = array<i64: 8, 256>}]} {
    %c0 = arith.constant 0 : index
    %c0_0 = arith.constant 0 : index
    %0 = vector.load %arg1[%c0, %c0_0] : memref<8x256xf32, #tpu.memory_space<vmem>>, vector<8x256xf32>
    %1 = vector.shape_cast %0 : vector<8x256xf32> to vector<8x8x32xf32>
    %2 = vector.extract_strided_slice %1 {offsets = [0, 0, 0], sizes = [8, 8, 16], strides = [1, 1, 1]} : vector<8x8x32xf32> to vector<8x8x16xf32>
    %3 = vector.shape_cast %2 : vector<8x8x16xf32> to vector<8x8x8x2xf32>
    %4 = vector.extract_strided_slice %3 {offsets = [0, 0, 0, 0], sizes = [8, 8, 8, 1], strides = [1, 1, 1, 1]} : vector<8x8x8x2xf32> to vector<8x8x8x1xf32>
    %5 = vector.shape_cast %4 : vector<8x8x8x1xf32> to vector<8x8x8xf32>
    %6 = vector.shape_cast %5 : vector<8x8x8xf32> to vector<8x64xf32>
    %7 = vector.extract_strided_slice %3 {offsets = [0, 0, 0, 1], sizes = [8, 8, 8, 1], strides = [1, 1, 1, 1]} : vector<8x8x8x2xf32> to vector<8x8x8x1xf32>
    %8 = vector.shape_cast %7 : vector<8x8x8x1xf32> to vector<8x8x8xf32>
    %9 = vector.shape_cast %8 : vector<8x8x8xf32> to vector<8x64xf32>
    %10 = vector.extract_strided_slice %1 {offsets = [0, 0, 16], sizes = [8, 8, 16], strides = [1, 1, 1]} : vector<8x8x32xf32> to vector<8x8x16xf32>
    %11 = vector.shape_cast %10 : vector<8x8x16xf32> to vector<8x8x8x2xf32>
    %12 = vector.extract_strided_slice %11 {offsets = [0, 0, 0, 0], sizes = [8, 8, 8, 1], strides = [1, 1, 1, 1]} : vector<8x8x8x2xf32> to vector<8x8x8x1xf32>
    %13 = vector.shape_cast %12 : vector<8x8x8x1xf32> to vector<8x8x8xf32>
    %14 = vector.shape_cast %13 : vector<8x8x8xf32> to vector<8x64xf32>
    %15 = vector.extract_strided_slice %11 {offsets = [0, 0, 0, 1], sizes = [8, 8, 8, 1], strides = [1, 1, 1, 1]} : vector<8x8x8x2xf32> to vector<8x8x8x1xf32>
    %16 = vector.shape_cast %15 : vector<8x8x8x1xf32> to vector<8x8x8xf32>
    %17 = vector.shape_cast %16 : vector<8x8x8xf32> to vector<8x64xf32>
    %18 = tpu.concatenate %6, %9, %14, %17 in 1 : vector<8x64xf32>, vector<8x64xf32>, vector<8x64xf32>, vector<8x64xf32> -> vector<8x256xf32>
    %c0_1 = arith.constant 0 : index
    %c0_2 = arith.constant 0 : index
    %19 = vector.load %arg2[%c0_1, %c0_2] : memref<8x256xf32, #tpu.memory_space<vmem>>, vector<8x256xf32>
    tpu.vector_store %arg2[%c0_1, %c0_2], %18 {strides = array<i32>} : memref<8x256xf32, #tpu.memory_space<vmem>>, vector<8x256xf32>,
    return
  }
  func.func @transform_0(%arg0: i32) -> (i32, i32) {
    %c0_i32 = arith.constant 0 : i32
    %c0_i32_0 = arith.constant 0 : i32
    return %arg0, %c0_i32 : i32, i32
  }
  func.func @transform_1(%arg0: i32) -> (i32, i32) {
    %c0_i32 = arith.constant 0 : i32
    %c0_i32_0 = arith.constant 0 : i32
    return %arg0, %c0_i32 : i32, i32
  }
}

</mosaic_0001>

<bundles_post_ra>
// kernel: tpu_custom_call.1
= control target key start
LH: loop header
LB: loop body
LE: loop exit
PB: predicated region body
PF: predicated region fallthrough
CT: control target
= control target key end

     0   :  { %6 = vsyncpa [#allocation3], 0  ;;  %s8426_s0 = inlined_call_operand.hbm [shape: f32[8,256], index: 0, kind: input, shape index: {}]   ;;  %s8427_s1 = inlined_call_operand.hbm [shape: f32[8,256], index: 1, kind: output, shape index: {}]  }
   0x1   :  { %7 = vsyncpa [#allocation4], 0  ;;  %s5036_s6 = smov [#allocation2]   ;;  %s4988_s10 = scalar_lea.hbm %s8426_s0, 256 }
   0x2   :  { %s14_s7 = sshll.u32 %s5036_s6, 4  ;;  %p4989_p0 = scmp.ne.s32.totalorder %s8426_s0, %s4988_s10  ;;  %s15_s7 = int_to_ptr.vmem [resolvable:$true] %s14_s7 }
   0x3   :  { %p4992_p1 = scmp.lt.u32.totalorder %s4988_s10, %s8426_s0 }
   0x5   :  { %p4994_p2 = pnand %p4992_p1, %p4989_p0 }
   0x7   :  { %4997 = shalt.err (!%p4994_p2)
}
   0x8   :  { %s4998_s15 = scalar_lea.vmem %s15_s7, 256  ;;  %p5003_p4 = scmp.lt.s32.totalorder %s15_s7, %s15_s7 }
   0x9   :  { %p4999_p3 = scmp.ne.s32.totalorder %s15_s7, %s4998_s15  ;;  %p5004_p5 = scmp.lt.s32.totalorder %s4998_s15, %s4998_s15 }
   0xb   :  { %p5005_p6 = por %p5004_p5, %p5003_p4 }
   0xd   :  { %p5006_p7 = pnand %p5005_p6, %p4999_p3 }
   0xf   :  { %5009 = shalt.err (!%p5006_p7)
}
  0x10   :  { %17 = dma.hbm_to_vmem [thread:$0]  %s8426_s0, 256, %s15_s7, [#allocation3]  }
  0x11   :  { %5032 = dma.done.wait [#allocation3], 256  }
  0x12   :  { %5033 = vsyncadd [#allocation3], 4294967040  ;;  %v21_v0 = vld [vmem:[#allocation2] sm:$0xff]  ;;  %s5037_s18 = smov 32   ;;  %s5038_s19 = smov 96   ;;  %v22_v1 = vld [vmem:[#allocation2 + $0x8] sm:$0xff]  ;;  %v8428_v4 = vlaneseq }
  0x13   :  { %30 = vrot.lane.b32.xlu1 %v21_v0, %s5037_s18  ;;  %24 = vrot.lane.b32.xlu0 %v21_v0, %s5038_s19  ;;  %s5039_s20 = smov 64   ;;  %v5040_v2 = vmov 1983009808   ;;  %v5041_v9 = vmov 1934713408   ;;  %s5042_s0 = smov 126  }
  0x14   :  { %v46_v3 = vunpack.c.l.s4 %v5040_v2  ;;  %v5076_v8 = vshrl.u32 %v8428_v4, 7  ;;  %v110_v10 = vunpack.c.l.s4 %v5041_v9  ;;  %s5043_s21 = smov 124   ;;  %s5044_s22 = smov 122   ;;  %vm2990_vm0 = vcmask 130112  }
  0x15   :  { %s5045_s23 = smov 120   ;;  %s5046_s24 = smov 118   ;;  %vm2997_vm1 = vcmask 195712   ;;  %vm8680_vm2 = vcmask 261312   ;;  %vm8679_vm3 = vcmask 326912   ;;  %vm8678_vm4 = vcmask 392512  }
  0x16   :  { %v47_v7 = vunpack.c.0.s8 %v46_v3  ;;  %8697 = vst [vmem:[#allocation8_spill] sm:$0xff] %v5076_v8  ;;  %v111_v16 = vunpack.c.0.s8 %v110_v10  ;;  %s5047_s25 = smov 116   ;;  %s5048_s26 = smov 114   ;;  %vm8677_vm5 = vcmask 458112   ;;  %vm8681_vm6 = vcmask 523712  }
  0x17   :  { %34 = vrot.lane.b32.xlu1 %v22_v1, %s5038_s19  ;;  %27 = vrot.lane.b32.xlu0 %v21_v0, %s5039_s20  ;;  %s5049_s27 = smov 112   ;;  %vm3307_vm7 = vcmask 1041409   ;;  %vm3309_vm8 = vcmask 1042434   ;;  %vm3311_vm9 = vcmask 1043459   ;;  %vm3313_vm10 = vcmask 1044484   ;;  %s5052_s28 = smov [#allocation5]  }
  0x18   :  { %v5079_v13 = vsub.s32 %v47_v7, %v5076_v8  ;;  %v5084_v25 = vsub.s32 %v111_v16, %v5076_v8  ;;  %vm3315_vm11 = vcmask 1045509   ;;  %vm3317_vm12 = vcmask 1046534   ;;  %s4948_s29 = sshll.u32 %s5052_s28, 4  ;;  %s4949_s29 = int_to_ptr.vmem [resolvable:$true] %s4948_s29 }
  0x19   :  { %vm8690_vm13 = vcmask 1047559   ;;  %vm3524_vm14 = vcmask 654912   ;;  %vm3531_vm15 = vcmask 720512   ;;  %s5010_s30 = scalar_lea.vmem %s4949_s29, 256  ;;  %p5015_p9 = scmp.lt.s32.totalorder %s4949_s29, %s4949_s29 }
  0x1a   :  { %p5011_p8 = scmp.ne.s32.totalorder %s4949_s29, %s5010_s30  ;;  %p5016_p10 = scmp.lt.s32.totalorder %s5010_s30, %s5010_s30 }
  0x1b   :  { %40 = vrot.lane.b32.xlu1 %v22_v1, %s5037_s18  ;;  %37 = vrot.lane.b32.xlu0 %v22_v1, %s5039_s20 }
  0x1c   :  { %p5017_p11 = por %p5016_p10, %p5015_p9 }
  0x1e   :  { %p5018_p12 = pnand %p5017_p11, %p5011_p8 }
  0x85   :  { %v31_v5 = vpop.permute.xlu1 %30  ;;  %v25_v6 = vpop.permute.xlu0 %24 }
  0x86   :  { %v59_v14 = vcombine.low %v25_v6, %v31_v5  ;;  %v60_v30 = vcombine.high %v25_v6, %v31_v5 }
  0x88   :  { %v67_v20 = vrot.slane %v59_v14, %v5079_v13  ;;  %v74_v39 = vrot.slane %v60_v30, %v5079_v13 }
  0x89   :  { %v35_v11 = vpop.permute.xlu1 %34  ;;  %v28_v12 = vpop.permute.xlu0 %27 }
  0x8a   :  { %v43_v15 = vcombine.low %v21_v0, %v28_v12  ;;  %v44_v26 = vcombine.high %v21_v0, %v28_v12 }
  0x8c   :  { %v51_v17 = vrot.slane %v43_v15, %v5079_v13  ;;  %v58_v35 = vrot.slane %v44_v26, %v5079_v13 }
  0x8d   :  { %v41_v18 = vpop.permute.xlu1 %40  ;;  %v38_v19 = vpop.permute.xlu0 %37 }
  0x8e   :  { %v91_v21 = vcombine.low %v35_v11, %v41_v18  ;;  %v92_v22 = vcombine.high %v35_v11, %v41_v18  ;;  %v75_v23 = vcombine.low %v22_v1, %v38_v19  ;;  %v76_v24 = vcombine.high %v22_v1, %v38_v19 }
  0x8f   :  { %v107_v27 = vcombine.low %v51_v17, %v67_v20  ;;  %v108_v36 = vcombine.high %v51_v17, %v67_v20  ;;  %v123_v45 = vcombine.low %v58_v35, %v74_v39  ;;  %v124_v50 = vcombine.high %v58_v35, %v74_v39 }
  0x90   :  { %v99_v28 = vrot.slane %v91_v21, %v5079_v13  ;;  %v83_v29 = vrot.slane %v75_v23, %v5079_v13  ;;  %v106_v31 = vrot.slane %v92_v22, %v5079_v13  ;;  %v90_v32 = vrot.slane %v76_v24, %v5079_v13 }
  0x91   :  { %v5092_v37 = vrot.slane %v107_v27, %v5084_v25  ;;  %v5110_v44 = vrot.slane %v108_v36, %v5084_v25  ;;  %v5126_v51 = vrot.slane %v123_v45, %v5084_v25  ;;  %v5142_v55 = vrot.slane %v124_v50, %v5084_v25 }
  0x92   :  { %v139_v33 = vcombine.low %v83_v29, %v99_v28  ;;  %v140_v34 = vcombine.high %v83_v29, %v99_v28  ;;  %v155_v41 = vcombine.low %v90_v32, %v106_v31  ;;  %v156_v46 = vcombine.high %v90_v32, %v106_v31 }
  0x93   :  { %v8429_v19 = vmov 0  }
  0x94   :  { %v5095_v38 = vrot.slane %v139_v33, %v5084_v25  ;;  %v5099_v40 = vrot.slane %v140_v34, %v5084_v25  ;;  %v5115_v47 = vrot.slane %v155_v41, %v5084_v25  ;;  %v5131_v52 = vrot.slane %v156_v46, %v5084_v25  ;;  %4982 = vset.pattern.permute.xlu0 %v8429_v19 }
  0x95   :  { %4983 = vset.pattern.permute.xlu1 %v8429_v19 }
  0x96   :  { %v5103_v42 = vcombine.low %v5092_v37, %v5095_v38  ;;  %v5107_v43 = vcombine.high %v5092_v37, %v5095_v38  ;;  %v5119_v48 = vcombine.low %v5110_v44, %v5099_v40  ;;  %v5123_v49 = vcombine.high %v5110_v44, %v5099_v40 }
  0x97   :  { %v5135_v53 = vcombine.low %v5126_v51, %v5115_v47  ;;  %v5139_v54 = vcombine.high %v5126_v51, %v5115_v47  ;;  %v5148_v56 = vcombine.low %v5142_v55, %v5131_v52  ;;  %v5152_v57 = vcombine.high %v5142_v55, %v5131_v52 }
  0x98   :  { %189 = vrot.lane.b32.xlu1 %v5107_v43, %s5042_s0  ;;  %187 = vrot.lane.b32.xlu0 %v5103_v42, %s5042_s0 }
  0x99   :  { %8698 = vst [vmem:[#allocation9_spill] sm:$0xff] %v5148_v56 }
  0x9c   :  { %193 = vrot.lane.b32.xlu1 %v5123_v49, %s5042_s0  ;;  %191 = vrot.lane.b32.xlu0 %v5119_v48, %s5042_s0 }
  0xa0   :  { %197 = vrot.lane.b32.xlu1 %v5139_v54, %s5042_s0  ;;  %195 = vrot.lane.b32.xlu0 %v5135_v53, %s5042_s0 }
  0xa4   :  { %201 = vrot.lane.b32.xlu1 %v5152_v57, %s5042_s0  ;;  %199 = vrot.lane.b32.xlu0 %v5148_v56, %s5042_s0 }
  0xa8   :  { %213 = vrot.lane.b32.xlu1 %v5107_v43, %s5043_s21  ;;  %211 = vrot.lane.b32.xlu0 %v5103_v42, %s5043_s21 }
  0xac   :  { %217 = vrot.lane.b32.xlu1 %v5123_v49, %s5043_s21  ;;  %215 = vrot.lane.b32.xlu0 %v5119_v48, %s5043_s21 }
  0xb0   :  { %221 = vrot.lane.b32.xlu1 %v5139_v54, %s5043_s21  ;;  %219 = vrot.lane.b32.xlu0 %v5135_v53, %s5043_s21 }
  0xb4   :  { %225 = vrot.lane.b32.xlu1 %v5152_v57, %s5043_s21  ;;  %223 = vrot.lane.b32.xlu0 %v5148_v56, %s5043_s21 }
  0xb8   :  { %237 = vrot.lane.b32.xlu1 %v5107_v43, %s5044_s22  ;;  %235 = vrot.lane.b32.xlu0 %v5103_v42, %s5044_s22 }
  0xbc   :  { %241 = vrot.lane.b32.xlu1 %v5123_v49, %s5044_s22  ;;  %239 = vrot.lane.b32.xlu0 %v5119_v48, %s5044_s22 }
  0xc0   :  { %245 = vrot.lane.b32.xlu1 %v5139_v54, %s5044_s22  ;;  %243 = vrot.lane.b32.xlu0 %v5135_v53, %s5044_s22 }
  0xc4   :  { %249 = vrot.lane.b32.xlu1 %v5152_v57, %s5044_s22  ;;  %247 = vrot.lane.b32.xlu0 %v5148_v56, %s5044_s22 }
  0xc8   :  { %261 = vrot.lane.b32.xlu1 %v5107_v43, %s5045_s23  ;;  %259 = vrot.lane.b32.xlu0 %v5103_v42, %s5045_s23 }
  0xcc   :  { %265 = vrot.lane.b32.xlu1 %v5123_v49, %s5045_s23  ;;  %263 = vrot.lane.b32.xlu0 %v5119_v48, %s5045_s23 }
  0xd0   :  { %269 = vrot.lane.b32.xlu1 %v5139_v54, %s5045_s23  ;;  %267 = vrot.lane.b32.xlu0 %v5135_v53, %s5045_s23 }
  0xd4   :  { %273 = vrot.lane.b32.xlu1 %v5152_v57, %s5045_s23  ;;  %271 = vrot.lane.b32.xlu0 %v5148_v56, %s5045_s23 }
  0xd8   :  { %285 = vrot.lane.b32.xlu1 %v5107_v43, %s5046_s24  ;;  %283 = vrot.lane.b32.xlu0 %v5103_v42, %s5046_s24 }
  0xdc   :  { %289 = vrot.lane.b32.xlu1 %v5123_v49, %s5046_s24  ;;  %287 = vrot.lane.b32.xlu0 %v5119_v48, %s5046_s24 }
  0xe0   :  { %293 = vrot.lane.b32.xlu1 %v5139_v54, %s5046_s24  ;;  %291 = vrot.lane.b32.xlu0 %v5135_v53, %s5046_s24 }
  0xe4   :  { %297 = vrot.lane.b32.xlu1 %v5152_v57, %s5046_s24  ;;  %295 = vrot.lane.b32.xlu0 %v5148_v56, %s5046_s24 }
  0xe8   :  { %309 = vrot.lane.b32.xlu1 %v5107_v43, %s5047_s25  ;;  %307 = vrot.lane.b32.xlu0 %v5103_v42, %s5047_s25 }
  0xec   :  { %313 = vrot.lane.b32.xlu1 %v5123_v49, %s5047_s25  ;;  %311 = vrot.lane.b32.xlu0 %v5119_v48, %s5047_s25 }
  0xf0   :  { %317 = vrot.lane.b32.xlu1 %v5139_v54, %s5047_s25  ;;  %315 = vrot.lane.b32.xlu0 %v5135_v53, %s5047_s25 }
  0xf4   :  { %321 = vrot.lane.b32.xlu1 %v5152_v57, %s5047_s25  ;;  %319 = vrot.lane.b32.xlu0 %v5148_v56, %s5047_s25 }
  0xf8   :  { %333 = vrot.lane.b32.xlu1 %v5107_v43, %s5048_s26  ;;  %331 = vrot.lane.b32.xlu0 %v5103_v42, %s5048_s26 }
  0xfc   :  { %337 = vrot.lane.b32.xlu1 %v5123_v49, %s5048_s26  ;;  %335 = vrot.lane.b32.xlu0 %v5119_v48, %s5048_s26 }
 0x100   :  { %341 = vrot.lane.b32.xlu1 %v5139_v54, %s5048_s26  ;;  %339 = vrot.lane.b32.xlu0 %v5135_v53, %s5048_s26 }
 0x104   :  { %345 = vrot.lane.b32.xlu1 %v5152_v57, %s5048_s26  ;;  %343 = vrot.lane.b32.xlu0 %v5148_v56, %s5048_s26 }
 0x108   :  { %1443 = vrot.lane.b32.xlu0 %v5103_v42, %s5049_s27 }
 0x10a   :  { %v5206_v58 = vpop.permute.xlu1 %189  ;;  %v5208_v59 = vpop.permute.xlu0 %187 }
 0x10b   :  { %1445 = vrot.lane.b32.xlu1 %v5208_v59, %s5049_s27 }
 0x10c   :  { %1459 = vrot.lane.b32.xlu0 %v5107_v43, %s5049_s27 }
 0x10e   :  { %v5214_v60 = vpop.permute.xlu1 %193  ;;  %v5216_v61 = vpop.permute.xlu0 %191 }
 0x110   :  { %1475 = vrot.lane.b32.xlu0 %v5119_v48, %s5049_s27 }
 0x112   :  { %v5220_v62 = vpop.permute.xlu1 %197  ;;  %v5222_v63 = vpop.permute.xlu0 %195 }
 0x113   :  { %8699 = vst [vmem:[#allocation10_spill] sm:$0xff] %v5222_v63 }
 0x114   :  { %1491 = vrot.lane.b32.xlu0 %v5123_v49, %s5049_s27 }
 0x116   :  { %v5226_v0 = vpop.permute.xlu1 %201  ;;  %v5228_v1 = vpop.permute.xlu0 %199 }
 0x117   :  { %8700 = vst [vmem:[#allocation11_spill] sm:$0xff] %v5226_v0 }
 0x118   :  { %1507 = vrot.lane.b32.xlu0 %v5135_v53, %s5049_s27 }
 0x11a   :  { %v5232_v2 = vpop.permute.xlu1 %213  ;;  %v5234_v3 = vpop.permute.xlu0 %211 }
 0x11c   :  { %1523 = vrot.lane.b32.xlu0 %v5139_v54, %s5049_s27 }
 0x11e   :  { %v5238_v5 = vpop.permute.xlu1 %217  ;;  %v5240_v6 = vpop.permute.xlu0 %215 }
 0x120   :  { %1539 = vrot.lane.b32.xlu0 %v5148_v56, %s5049_s27 }
 0x122   :  { %v5244_v7 = vpop.permute.xlu1 %221  ;;  %v5246_v9 = vpop.permute.xlu0 %219 }
 0x124   :  { %1555 = vrot.lane.b32.xlu0 %v5152_v57, %s5049_s27 }
 0x126   :  { %v5250_v10 = vpop.permute.xlu1 %225  ;;  %v5252_v11 = vpop.permute.xlu0 %223 }
 0x128   :  { %1447 = vrot.lane.b32.xlu0 %v5234_v3, %s5049_s27 }
 0x12a   :  { %v5256_v12 = vpop.permute.xlu1 %237  ;;  %v5258_v14 = vpop.permute.xlu0 %235 }
 0x12b   :  { %1449 = vrot.lane.b32.xlu1 %v5258_v14, %s5049_s27 }
 0x12e   :  { %v5262_v15 = vpop.permute.xlu1 %241  ;;  %v5264_v16 = vpop.permute.xlu0 %239 }
 0x132   :  { %v5266_v17 = vpop.permute.xlu1 %245  ;;  %v5268_v18 = vpop.permute.xlu0 %243 }
 0x133   :  { %8701 = vst [vmem:[#allocation12_spill] sm:$0xff] %v5268_v18 }
 0x136   :  { %v5272_v20 = vpop.permute.xlu1 %249  ;;  %v5274_v21 = vpop.permute.xlu0 %247 }
 0x137   :  { %8702 = vst [vmem:[#allocation13_spill] sm:$0xff] %v5272_v20  ;;  %8703 = vst [vmem:[#allocation14_spill] sm:$0xff] %v5274_v21 }
 0x13a   :  { %v5276_v22 = vpop.permute.xlu1 %261  ;;  %v5278_v23 = vpop.permute.xlu0 %259 }
 0x13b   :  { %1451 = vrot.lane.b32.xlu0 %v5278_v23, %s5049_s27 }
 0x13e   :  { %v5282_v24 = vpop.permute.xlu1 %265  ;;  %v5284_v26 = vpop.permute.xlu0 %263 }
 0x13f   :  { %8704 = vst [vmem:[#allocation15_spill] sm:$0xff] %v5282_v24 }
 0x142   :  { %v5286_v27 = vpop.permute.xlu1 %269  ;;  %v5288_v28 = vpop.permute.xlu0 %267 }
 0x143   :  { %8705 = vst [vmem:[#allocation16_spill] sm:$0xff] %v5286_v27  ;;  %8706 = vst [vmem:[#allocation17_spill] sm:$0xff] %v5288_v28 }
 0x146   :  { %v5290_v29 = vpop.permute.xlu1 %273  ;;  %v5292_v30 = vpop.permute.xlu0 %271 }
 0x147   :  { %8707 = vst [vmem:[#allocation18_spill] sm:$0xff] %v5290_v29  ;;  %8708 = vst [vmem:[#allocation19_spill] sm:$0xff] %v5292_v30 }
 0x14a   :  { %v5294_v31 = vpop.permute.xlu0 %283  ;;  %v5296_v32 = vpop.permute.xlu1 %285 }
 0x14b   :  { %1453 = vrot.lane.b32.xlu1 %v5294_v31, %s5049_s27 }
 0x14e   :  { %v5300_v33 = vpop.permute.xlu0 %287  ;;  %v5302_v34 = vpop.permute.xlu1 %289 }
 0x14f   :  { %8709 = vst [vmem:[#allocation20_spill] sm:$0xff] %v5302_v34 }
 0x152   :  { %v5304_v35 = vpop.permute.xlu0 %291  ;;  %v5308_v39 = vpop.permute.xlu1 %293 }
 0x156   :  { %v5306_v36 = vpop.permute.xlu0 %295  ;;  %v5314_v45 = vpop.permute.xlu1 %297 }
 0x157   :  { %8710 = vst [vmem:[#allocation21_spill] sm:$0xff] %v5306_v36  ;;  %8711 = vst [vmem:[#allocation22_spill] sm:$0xff] %v5314_v45 }
 0x15a   :  { %v5310_v41 = vpop.permute.xlu0 %307  ;;  %v5322_v4 = vpop.permute.xlu1 %309 }
 0x15b   :  { %1455 = vrot.lane.b32.xlu0 %v5310_v41, %s5049_s27 }
 0x15e   :  { %v5316_v46 = vpop.permute.xlu0 %311  ;;  %v5330_v8 = vpop.permute.xlu1 %313 }
 0x15f   :  { %1463 = vrot.lane.b32.xlu0 %v5232_v2, %s5049_s27  ;;  %8714 = vst [vmem:[#allocation25_spill] sm:$0xff] %v5330_v8 }
 0x162   :  { %v5320_v50 = vpop.permute.xlu0 %315  ;;  %v5335_v0 = vpop.permute.xlu1 %317 }
 0x163   :  { %8712 = vst [vmem:[#allocation23_spill] sm:$0xff] %v5320_v50  ;;  %1467 = vrot.lane.b32.xlu0 %v5276_v22, %s5049_s27  ;;  %8715 = vst [vmem:[#allocation26_spill] sm:$0xff] %v5335_v0 }
 0x166   :  { %v5326_v19 = vpop.permute.xlu0 %319  ;;  %v5345_v20 = vpop.permute.xlu1 %321 }
 0x167   :  { %8713 = vst [vmem:[#allocation24_spill] sm:$0xff] %v5326_v19  ;;  %1471 = vrot.lane.b32.xlu0 %v5322_v4, %s5049_s27  ;;  %8716 = vst [vmem:[#allocation27_spill] sm:$0xff] %v5345_v20 }
 0x16a   :  { %v332_v45 = vpop.permute.xlu0 %331  ;;  %v5351_v36 = vpop.permute.xlu1 %333 }
 0x16b   :  { %1479 = vrot.lane.b32.xlu0 %v5240_v6, %s5049_s27  ;;  %1457 = vrot.lane.b32.xlu1 %v332_v45, %s5049_s27 }
 0x16e   :  { %v5361_v56 = vpop.permute.xlu0 %335 }
 0x16f   :  { %1483 = vrot.lane.b32.xlu0 %v5284_v26, %s5049_s27  ;;  %1461 = vrot.lane.b32.xlu1 %v5206_v58, %s5049_s27 }
 0x173   :  { %1487 = vrot.lane.b32.xlu0 %v5316_v46, %s5049_s27  ;;  %1465 = vrot.lane.b32.xlu1 %v5256_v12, %s5049_s27 }
 0x177   :  { %1495 = vrot.lane.b32.xlu0 %v5238_v5, %s5049_s27  ;;  %1469 = vrot.lane.b32.xlu1 %v5296_v32, %s5049_s27 }
 0x17b   :  { %1499 = vrot.lane.b32.xlu0 %v5282_v24, %s5049_s27  ;;  %1473 = vrot.lane.b32.xlu1 %v5351_v36, %s5049_s27  ;;  %v5371_v24 = vpop.permute.xlu0 %339 }
 0x17f   :  { %1503 = vrot.lane.b32.xlu0 %v5330_v8, %s5049_s27  ;;  %1477 = vrot.lane.b32.xlu1 %v5216_v61, %s5049_s27  ;;  %v5377_v8 = vpop.permute.xlu0 %343 }
 0x180   :  { %8717 = vst [vmem:[#allocation28_spill] sm:$0xff] %v5377_v8 }
 0x183   :  { %1511 = vrot.lane.b32.xlu0 %v5246_v9, %s5049_s27  ;;  %1481 = vrot.lane.b32.xlu1 %v5264_v16, %s5049_s27 }
 0x187   :  { %1515 = vrot.lane.b32.xlu0 %v5288_v28, %s5049_s27  ;;  %1485 = vrot.lane.b32.xlu1 %v5300_v33, %s5049_s27  ;;  %v5387_v28 = vpop.permute.xlu0 %1443 }
 0x188   :  { %8718 = vst [vmem:[#allocation29_spill] sm:$0xff] %v5387_v28  ;;  %v403_v28 = vcombine.low %v5294_v31, %v332_v45 }
 0x18b   :  { %1519 = vrot.lane.b32.xlu0 %v5320_v50, %s5049_s27  ;;  %1489 = vrot.lane.b32.xlu1 %v5361_v56, %s5049_s27  ;;  %v5393_v50 = vpop.permute.xlu1 %337  ;;  %v5395_v8 = vpop.permute.xlu0 %1459 }
 0x18c   :  { %8719 = vst [vmem:[#allocation30_spill] sm:$0xff] %v5393_v50  ;;  %8720 = vst [vmem:[#allocation31_spill] sm:$0xff] %v5395_v8  ;;  %v387_v8 = vcombine.low %v5278_v23, %v5310_v41 }
 0x18f   :  { %1527 = vrot.lane.b32.xlu0 %v5244_v7, %s5049_s27  ;;  %1493 = vrot.lane.b32.xlu1 %v5214_v60, %s5049_s27 }
 0x193   :  { %1531 = vrot.lane.b32.xlu0 %v5286_v27, %s5049_s27  ;;  %1497 = vrot.lane.b32.xlu1 %v5262_v15, %s5049_s27  ;;  %v5406_v27 = vpop.permute.xlu0 %1475 }
 0x194   :  { %8721 = vst [vmem:[#allocation32_spill] sm:$0xff] %v5406_v27  ;;  %v395_v27 = vrot.slane %v387_v8, %v5079_v13  ;;  %v388_v8 = vcombine.high %v5278_v23, %v5310_v41 }
 0x196   :  { %v402_v41 = vrot.slane %v388_v8, %v5079_v13 }
 0x197   :  { %1535 = vrot.lane.b32.xlu0 %v5335_v0, %s5049_s27  ;;  %1501 = vrot.lane.b32.xlu1 %v5302_v34, %s5049_s27  ;;  %v371_v0 = vcombine.low %v5208_v59, %v5258_v14  ;;  %v411_v34 = vrot.slane %v403_v28, %v5079_v13 }
 0x199   :  { %v451_v21 = vcombine.low %v395_v27, %v411_v34 }
 0x19b   :  { %1543 = vrot.lane.b32.xlu0 %v5252_v11, %s5049_s27  ;;  %1505 = vrot.lane.b32.xlu1 %v5393_v50, %s5049_s27  ;;  %v379_v50 = vrot.slane %v371_v0, %v5079_v13  ;;  %v356_v0 = vcombine.high %v5103_v42, %v5234_v3 }
 0x19f   :  { %1547 = vrot.lane.b32.xlu0 %v5292_v30, %s5049_s27  ;;  %1509 = vrot.lane.b32.xlu1 %v5222_v63, %s5049_s27  ;;  %v4957_v30 = vcombine.low %v5092_v37, %v5234_v3  ;;  %v5421_v63 = vpop.permute.xlu0 %1491  ;;  %v372_v37 = vcombine.high %v5208_v59, %v5258_v14  ;;  %v5443_v59 = vrot.slane %v451_v21, %v5084_v25 }
 0x1a0   :  { %8722 = vst [vmem:[#allocation33_spill] sm:$0xff] %v5421_v63  ;;  %v370_v3 = vrot.slane %v356_v0, %v5079_v13  ;;  %v491_v0 = vcombine.low %v5107_v43, %v5232_v2 }
 0x1a1   :  { %v386_v14 = vrot.slane %v372_v37, %v5079_v13  ;;  %v523_v37 = vcombine.low %v5276_v22, %v5322_v4 }
 0x1a3   :  { %1551 = vrot.lane.b32.xlu0 %v5326_v19, %s5049_s27  ;;  %1513 = vrot.lane.b32.xlu1 %v5268_v18, %s5049_s27  ;;  %v363_v19 = vrot.slane %v4957_v30, %v5079_v13  ;;  %v404_v18 = vcombine.high %v5294_v31, %v332_v45  ;;  %v452_v31 = vcombine.high %v395_v27, %v411_v34  ;;  %v5440_v45 = vpop.permute.xlu0 %1507 }
 0x1a4   :  { %8723 = vst [vmem:[#allocation34_spill] sm:$0xff] %v5440_v45  ;;  %v507_v34 = vcombine.low %v5206_v58, %v5256_v12 }
 0x1a5   :  { %v419_v28 = vcombine.low %v363_v19, %v379_v50  ;;  %v418_v30 = vrot.slane %v404_v18, %v5079_v13  ;;  %v420_v23 = vcombine.high %v363_v19, %v379_v50  ;;  %v539_v18 = vcombine.low %v5296_v32, %v5351_v36 }
 0x1a6   :  { %v5462_v27 = vrot.slane %v452_v31, %v5084_v25  ;;  %v435_v50 = vcombine.low %v370_v3, %v386_v14 }
 0x1a7   :  { %1559 = vrot.lane.b32.xlu0 %v5250_v10, %s5049_s27  ;;  %1517 = vrot.lane.b32.xlu1 %v5304_v35, %s5049_s27  ;;  %v5450_v42 = vrot.slane %v419_v28, %v5084_v25  ;;  %v467_v21 = vcombine.low %v402_v41, %v418_v30  ;;  %v5468_v28 = vpop.permute.xlu0 %1523  ;;  %v5472_v8 = vrot.slane %v420_v23, %v5084_v25 }
 0x1a8   :  { %8725 = vst [vmem:[#allocation36_spill] sm:$0xff] %v5468_v28  ;;  %v547_v31 = vrot.slane %v539_v18, %v5079_v13  ;;  %v468_v45 = vcombine.high %v402_v41, %v418_v30  ;;  %v436_v23 = vcombine.high %v370_v3, %v386_v14  ;;  %v5490_v43 = vrot.slane %v435_v50, %v5084_v25 }
 0x1a9   :  { %v5459_v19 = vcombine.low %v5450_v42, %v5443_v59  ;;  %v5484_v28 = vrot.slane %v467_v21, %v5084_v25  ;;  %v499_v18 = vrot.slane %v491_v0, %v5079_v13  ;;  %v540_v30 = vcombine.high %v5296_v32, %v5351_v36  ;;  %v5512_v36 = vpop.permute.xlu1 %341 }
 0x1aa   :  { %v5504_v3 = vrot.slane %v468_v45, %v5084_v25  ;;  %v508_v50 = vcombine.high %v5206_v58, %v5256_v12  ;;  %v524_v32 = vcombine.high %v5276_v22, %v5322_v4  ;;  %v5516_v0 = vrot.slane %v436_v23, %v5084_v25 }
 0x1ab   :  { %1563 = vrot.lane.b32.xlu0 %v5290_v29, %s5049_s27  ;;  %1521 = vrot.lane.b32.xlu1 %v5371_v24, %s5049_s27  ;;  %8724 = vst [vmem:[#allocation35_spill] sm:$0xff] %v5459_v19  ;;  %v5481_v29 = vcombine.high %v5472_v8, %v5462_v27  ;;  %v5497_v21 = vpop.permute.xlu0 %1539  ;;  %v5501_v14 = vcombine.high %v5490_v43, %v5484_v28 }
 0x1ac   :  { %8727 = vst [vmem:[#allocation38_spill] sm:$0xff] %v5497_v21  ;;  %v763_v45 = vcombine.low %v5123_v49, %v5238_v5  ;;  %v4959_v58 = vcombine.low %v5110_v44, %v5240_v6  ;;  %v554_v4 = vrot.slane %v540_v30, %v5079_v13  ;;  %v5531_v22 = vcombine.high %v5516_v0, %v5504_v3  ;;  %v8752_v21 = vld [vmem:[#allocation13_spill] sm:$0xff] }
 0x1ad   :  { %8726 = vst [vmem:[#allocation37_spill] sm:$0xff] %v5481_v29  ;;  %8728 = vst [vmem:[#allocation39_spill] sm:$0xff] %v5501_v14  ;;  %v1035_v44 = vcombine.low %v5139_v54, %v5244_v7 }
 0x1ae   :  { %8729 = vst [vmem:[#allocation40_spill] sm:$0xff] %v5531_v22  ;;  %v5554_v54 = vrot.slane %v763_v45, %v5079_v13 }
 0x1af   :  { %1567 = vrot.lane.b32.xlu0 %v5345_v20, %s5049_s27  ;;  %1525 = vrot.lane.b32.xlu1 %v5220_v62, %s5049_s27  ;;  %v531_v20 = vrot.slane %v523_v37, %v5079_v13  ;;  %v5547_v23 = vpop.permute.xlu0 %1555 }
 0x1b0   :  { %8730 = vst [vmem:[#allocation41_spill] sm:$0xff] %v5547_v23 }
 0x1b1   :  { %v587_v41 = vcombine.low %v531_v20, %v547_v31  ;;  %v588_v12 = vcombine.high %v531_v20, %v547_v31  ;;  %v538_v31 = vrot.slane %v524_v32, %v5079_v13  ;;  %v900_v32 = vcombine.high %v5135_v53, %v5246_v9 }
 0x1b2   :  { %v4964_v53 = vcombine.high %v5131_v52, %v5250_v10 }
 0x1b3   :  { %2788 = vperm.xlu0 %4982, %v5459_v19   ;;  %1529 = vrot.lane.b32.xlu1 %v5266_v17, %s5049_s27  ;;  %v515_v19 = vrot.slane %v507_v34, %v5079_v13  ;;  %v4958_v34 = vcombine.high %v5095_v38, %v5232_v2  ;;  %v4960_v38 = vcombine.high %v5099_v40, %v5238_v5 }
 0x1b4   :  { %v628_v2 = vcombine.high %v5119_v48, %v5240_v6  ;;  %v5534_v49 = vrot.slane %v587_v41, %v5084_v25  ;;  %v4962_v48 = vcombine.high %v5115_v47, %v5244_v7  ;;  %v4961_v5 = vcombine.low %v5126_v51, %v5246_v9 }
 0x1b5   :  { %v555_v37 = vcombine.low %v499_v18, %v515_v19  ;;  %v5537_v40 = vrot.slane %v4958_v34, %v5079_v13  ;;  %v522_v6 = vrot.slane %v508_v50, %v5079_v13  ;;  %v556_v20 = vcombine.high %v499_v18, %v515_v19 }
 0x1b6   :  { %v5557_v47 = vrot.slane %v4960_v38, %v5079_v13  ;;  %v5560_v51 = vrot.slane %v4959_v58, %v5079_v13  ;;  %v5563_v7 = vrot.slane %v628_v2, %v5079_v13  ;;  %v603_v19 = vcombine.low %v538_v31, %v554_v4 }
 0x1b7   :  { %2797 = vperm.xlu0 %4982, %v5481_v29   ;;  %1533 = vrot.lane.b32.xlu1 %v5308_v39, %s5049_s27  ;;  %v5551_v30 = vrot.slane %v555_v37, %v5084_v25  ;;  %v675_v18 = vcombine.low %v5300_v33, %v5361_v56  ;;  %v5574_v34 = vrot.slane %v588_v12, %v5084_v25 }
 0x1b8   :  { %v5577_v50 = vrot.slane %v1035_v44, %v5079_v13  ;;  %v5580_v37 = vrot.slane %v4962_v48, %v5079_v13  ;;  %v5585_v45 = vrot.slane %v4961_v5, %v5079_v13  ;;  %v571_v38 = vcombine.low %v5537_v40, %v522_v6  ;;  %v8733_v5 = vld [vmem:[#allocation14_spill] sm:$0xff] }
 0x1b9   :  { %v5571_v41 = vcombine.high %v5551_v30, %v5534_v49  ;;  %v643_v58 = vcombine.low %v5216_v61, %v5264_v16  ;;  %v659_v2 = vcombine.low %v5284_v26, %v5316_v46  ;;  %v5594_v12 = vrot.slane %v556_v20, %v5084_v25  ;;  %v5607_v20 = vpop.permute.xlu0 %1447 }
 0x1ba   :  { %v1307_v44 = vcombine.low %v5152_v57, %v5250_v10  ;;  %v4963_v9 = vcombine.low %v5142_v55, %v5252_v11  ;;  %v779_v48 = vcombine.low %v5214_v60, %v5262_v15  ;;  %v5614_v52 = vrot.slane %v603_v19, %v5084_v25  ;;  %v8736_v10 = vld [vmem:[#allocation9_spill] sm:$0xff] }
 0x1bb   :  { %2803 = vperm.xlu0 %4982, %v5501_v14   ;;  %1537 = vrot.lane.b32.xlu1 %v5512_v36, %s5049_s27  ;;  %8731 = vst [vmem:[#allocation42_spill] sm:$0xff] %v5571_v41  ;;  %8732 = vst [vmem:[#allocation43_spill] sm:$0xff] %v5594_v12  ;;  %v5611_v57 = vcombine.high %v5594_v12, %v5574_v34  ;;  %v5617_v55 = vrot.slane %v900_v32, %v5079_v13 }
 0x1bc   :  { %8735 = vst [vmem:[#allocation44_spill] sm:$0xff] %v5614_v52  ;;  %v1172_v14 = vcombine.high %v8736_v10, %v5252_v11  ;;  %v5627_v29 = vrot.slane %v643_v58, %v5079_v13  ;;  %v667_v19 = vrot.slane %v659_v2, %v5079_v13  ;;  %v5632_v32 = vrot.slane %v571_v38, %v5084_v25 }
 0x1bd   :  { %8734 = vst [vmem:[#allocation14_spill] sm:$0xff] %v5611_v57  ;;  %v5635_v11 = vrot.slane %v1307_v44, %v5079_v13  ;;  %v5650_v38 = vpop.permute.xlu0 %1451 }
 0x1be   :  { %8737 = vst [vmem:[#allocation9_spill] sm:$0xff] %v5632_v32  ;;  %v5654_v58 = vcombine.high %v5632_v32, %v5614_v52  ;;  %v5660_v44 = vrot.slane %v1172_v14, %v5079_v13 }
 0x1bf   :  { %2809 = vperm.xlu0 %4982, %v5531_v22   ;;  %1541 = vrot.lane.b32.xlu1 %v5228_v1, %s5049_s27  ;;  %v604_v22 = vcombine.high %v538_v31, %v554_v4  ;;  %v780_v4 = vcombine.high %v5214_v60, %v5262_v15  ;;  %v644_v31 = vcombine.high %v5216_v61, %v5264_v16  ;;  %v8741_v16 = vld [vmem:[#allocation21_spill] sm:$0xff] }
 0x1c0   :  { %8738 = vst [vmem:[#allocation45_spill] sm:$0xff] %v5635_v11  ;;  %v5638_v60 = vrot.slane %v4964_v53, %v5079_v13  ;;  %v5641_v61 = vrot.slane %v4963_v9, %v5079_v13  ;;  %v5644_v15 = vrot.slane %v779_v48, %v5079_v13  ;;  %8742 = vst [vmem:[#allocation48_spill] sm:$0xff] %v5654_v58 }
 0x1c1   :  { %v5657_v2 = vrot.slane %v604_v22, %v5084_v25  ;;  %8744 = vst [vmem:[#allocation50_spill] sm:$0xff] %v5660_v44  ;;  %v5663_v53 = vrot.slane %v780_v4, %v5079_v13  ;;  %v5666_v9 = vrot.slane %v644_v31, %v5079_v13  ;;  %v1052_v48 = vcombine.high %v5220_v62, %v5266_v17  ;;  %v8746_v31 = vld [vmem:[#allocation12_spill] sm:$0xff] }
 0x1c2   :  { %8739 = vst [vmem:[#allocation46_spill] sm:$0xff] %v5638_v60  ;;  %8740 = vst [vmem:[#allocation47_spill] sm:$0xff] %v5641_v61  ;;  %v660_v22 = vcombine.high %v5284_v26, %v5316_v46  ;;  %v8780_v61 = vld [vmem:[#allocation29_spill] sm:$0xff] }
 0x1c3   :  { %2815 = vperm.xlu0 %4982, %v5571_v41   ;;  %1545 = vrot.lane.b32.xlu1 %v8733_v5, %s5049_s27  ;;  %v683_v41 = vrot.slane %v675_v18, %v5079_v13  ;;  %v572_v18 = vcombine.high %v5537_v40, %v522_v6  ;;  %v676_v40 = vcombine.high %v5300_v33, %v5361_v56 }
 0x1c4   :  { %8743 = vst [vmem:[#allocation49_spill] sm:$0xff] %v5657_v2  ;;  %v1051_v56 = vcombine.low %v5220_v62, %v5266_v17  ;;  %v691_v33 = vcombine.low %v5560_v51, %v5627_v29  ;;  %v8748_v17 = vld [vmem:[#allocation28_spill] sm:$0xff]  ;;  %v674_v44 = vrot.slane %v660_v22, %v5079_v13  ;;  %v8756_v22 = vld [vmem:[#allocation30_spill] sm:$0xff]  ;;  %v8774_v11 = vcombine.high %v5557_v47, %v5663_v53 }
 0x1c5   :  { %v723_v6 = vcombine.low %v667_v19, %v683_v41  ;;  %v5678_v14 = vrot.slane %v572_v18, %v5084_v25  ;;  %v5691_v26 = vrot.slane %v676_v40, %v5079_v13  ;;  %v724_v46 = vcombine.high %v667_v19, %v683_v41  ;;  %v5711_v19 = vpop.permute.xlu1 %345 }
 0x1c6   :  { %v692_v40 = vcombine.high %v5560_v51, %v5627_v29  ;;  %v5709_v41 = vrot.slane %v1051_v56, %v5079_v13  ;;  %8751 = vst [vmem:[#allocation52_spill] sm:$0xff] %v5711_v19  ;;  %v708_v29 = vcombine.high %v5563_v7, %v5666_v9  ;;  %v5725_v51 = vrot.slane %v1052_v48, %v5079_v13 }
 0x1c7   :  { %2821 = vperm.xlu0 %4982, %v5611_v57   ;;  %1549 = vrot.lane.b32.xlu1 %v8741_v16, %s5049_s27  ;;  %8745 = vst [vmem:[#allocation51_spill] sm:$0xff] %v5678_v14  ;;  %v8747_v57 = vld [vmem:[#allocation10_spill] sm:$0xff]  ;;  %v5697_v10 = vcombine.high %v5678_v14, %v5657_v2  ;;  %v5700_v4 = vrot.slane %v723_v6, %v5084_v25  ;;  %v8753_v6 = vld [vmem:[#allocation11_spill] sm:$0xff] }
 0x1c8   :  { %v915_v23 = vcombine.low %v8747_v57, %v8746_v31  ;;  %v916_v62 = vcombine.high %v8747_v57, %v8746_v31  ;;  %v707_v31 = vcombine.low %v5563_v7, %v5666_v9  ;;  %v1323_v63 = vcombine.low %v8753_v6, %v8752_v21  ;;  %8755 = vst [vmem:[#allocation11_spill] sm:$0xff] %v5725_v51 }
 0x1c9   :  { %8749 = vst [vmem:[#allocation12_spill] sm:$0xff] %v5697_v10  ;;  %8750 = vst [vmem:[#allocation10_spill] sm:$0xff] %v5700_v4  ;;  %v5720_v57 = vrot.slane %v691_v33, %v5084_v25  ;;  %v1324_v56 = vcombine.high %v8753_v6, %v8752_v21  ;;  %v739_v33 = vcombine.low %v674_v44, %v5691_v26  ;;  %v5751_v32 = vpop.permute.xlu1 %1445 }
 0x1ca   :  { %v5743_v9 = vrot.slane %v724_v46, %v5084_v25  ;;  %v923_v14 = vrot.slane %v915_v23, %v5079_v13  ;;  %v1188_v2 = vcombine.high %v5228_v1, %v8733_v5  ;;  %v8760_v46 = vld [vmem:[#allocation25_spill] sm:$0xff]  ;;  %v5762_v23 = vrot.slane %v692_v40, %v5084_v25 }
 0x1cb   :  { %2827 = vperm.xlu0 %4982, %v5654_v58   ;;  %1553 = vrot.lane.b32.xlu1 %v8748_v17, %s5049_s27  ;;  %8754 = vst [vmem:[#allocation13_spill] sm:$0xff] %v5720_v57  ;;  %v1187_v58 = vcombine.low %v5228_v1, %v8733_v5  ;;  %v5740_v7 = vcombine.high %v5720_v57, %v5700_v4  ;;  %v8761_v4 = vld [vmem:[#allocation15_spill] sm:$0xff] }
 0x1cc   :  { %v5756_v57 = vrot.slane %v1323_v63, %v5079_v13  ;;  %v795_v12 = vcombine.low %v8761_v4, %v8760_v46  ;;  %v5769_v5 = vrot.slane %v1324_v56, %v5079_v13  ;;  %v740_v40 = vcombine.high %v674_v44, %v5691_v26 }
 0x1cd   :  { %v5693_v18 = vpop.permute.xlu0 %1455  ;;  %8758 = vst [vmem:[#allocation30_spill] sm:$0xff] %v5740_v7  ;;  %v5772_v63 = vrot.slane %v1187_v58, %v5079_v13  ;;  %v5787_v56 = vrot.slane %v739_v33, %v5084_v25  ;;  %v963_v58 = vcombine.low %v5585_v45, %v923_v14  ;;  %v964_v1 = vcombine.high %v5585_v45, %v923_v14  ;;  %v8767_v14 = vld [vmem:[#allocation23_spill] sm:$0xff] }
 0x1ce   :  { %8762 = vst [vmem:[#allocation25_spill] sm:$0xff] %v5769_v5  ;;  %v5798_v26 = vrot.slane %v1188_v2, %v5079_v13  ;;  %v803_v51 = vrot.slane %v795_v12, %v5079_v13  ;;  %v5803_v33 = vrot.slane %v707_v31, %v5084_v25  ;;  %v796_v2 = vcombine.high %v8761_v4, %v8760_v46 }
 0x1cf   :  { %2833 = vperm.xlu0 %4982, %v5697_v10   ;;  %1557 = vrot.lane.b32.xlu1 %v8753_v6, %s5049_s27  ;;  %v8757_v10 = vld [vmem:[#allocation20_spill] sm:$0xff]  ;;  %v930_v6 = vrot.slane %v916_v62, %v5079_v13  ;;  %8763 = vst [vmem:[#allocation15_spill] sm:$0xff] %v5772_v63  ;;  %v5784_v62 = vcombine.high %v5762_v23, %v5743_v9 }
 0x1d0   :  { %v811_v16 = vcombine.low %v8757_v10, %v8756_v22  ;;  %8759 = vst [vmem:[#allocation20_spill] sm:$0xff] %v5756_v57  ;;  %v812_v12 = vcombine.high %v8757_v10, %v8756_v22  ;;  %v5822_v45 = vcombine.high %v5803_v33, %v5787_v56  ;;  %v5832_v10 = vrot.slane %v708_v29, %v5084_v25 }
 0x1d1   :  { %v5736_v17 = vpop.permute.xlu0 %1463  ;;  %8764 = vst [vmem:[#allocation53_spill] sm:$0xff] %v5784_v62  ;;  %v8770_v22 = vcombine.low %v5554_v54, %v5644_v15  ;;  %v8773_v46 = vcombine.low %v5557_v47, %v5663_v53 }
 0x1d2   :  { %v5777_v52 = vrot.slane %v811_v16, %v5079_v13  ;;  %v980_v16 = vcombine.high %v5617_v55, %v930_v6  ;;  %8766 = vst [vmem:[#allocation54_spill] sm:$0xff] %v5822_v45  ;;  %8769 = vst [vmem:[#allocation23_spill] sm:$0xff] %v5832_v10  ;;  %v826_v47 = vrot.slane %v812_v12, %v5079_v13 }
 0x1d3   :  { %2839 = vperm.xlu0 %4982, %v5740_v7   ;;  %1561 = vrot.lane.b32.xlu1 %v8752_v21, %s5049_s27  ;;  %v979_v21 = vcombine.low %v5617_v55, %v930_v6  ;;  %v5793_v7 = vpop.permute.xlu1 %1449  ;;  %v8765_v6 = vld [vmem:[#allocation22_spill] sm:$0xff]  ;;  %v5825_v55 = vrot.slane %v740_v40, %v5084_v25  ;;  %v5838_v57 = vrot.slane %v8770_v22, %v5084_v25 }
 0x1d4   :  { %v859_v31 = vcombine.low %v803_v51, %v5777_v52  ;;  %v8772_v40 = vcombine.high %v5554_v54, %v5644_v15  ;;  %v5851_v29 = vrot.slane %v8773_v46, %v5084_v25  ;;  %v5857_v22 = vrot.slane %v8774_v11, %v5084_v25 }
 0x1d5   :  { %v5780_v48 = vpop.permute.xlu0 %1467  ;;  %v5867_v15 = vrot.slane %v964_v1, %v5084_v25  ;;  %v5873_v46 = vrot.slane %v980_v16, %v5084_v25  ;;  %v860_v11 = vcombine.high %v803_v51, %v5777_v52  ;;  %v810_v1 = vrot.slane %v796_v2, %v5079_v13 }
 0x1d6   :  { %v5845_v4 = vrot.slane %v8772_v40, %v5084_v25  ;;  %v5870_v40 = vrot.slane %v979_v21, %v5084_v25  ;;  %v8777_v21 = vld [vmem:[#allocation26_spill] sm:$0xff]  ;;  %v5894_v52 = vcombine.high %v5450_v42, %v5443_v59  ;;  %v947_v51 = vcombine.low %v5304_v35, %v5371_v24 }
 0x1d7   :  { %2845 = vperm.xlu0 %4982, %v5784_v62   ;;  %1565 = vrot.lane.b32.xlu1 %v8765_v6, %s5049_s27  ;;  %v8768_v62 = vld [vmem:[#allocation17_spill] sm:$0xff]  ;;  %v1454_v5 = vpop.permute.xlu1 %1453  ;;  %v1667_v59 = vcombine.low %v5650_v38, %v5693_v18  ;;  %v1668_v42 = vcombine.high %v5650_v38, %v5693_v18  ;;  %v875_v6 = vcombine.low %v810_v1, %v826_v47 }
 0x1d8   :  { %v931_v60 = vcombine.low %v8768_v62, %v8767_v14  ;;  %8771 = vst [vmem:[#allocation17_spill] sm:$0xff] %v5838_v57  ;;  %v932_v54 = vcombine.high %v8768_v62, %v8767_v14  ;;  %v5881_v62 = vcombine.high %v5832_v10, %v5825_v55  ;;  %v8778_v14 = vld [vmem:[#allocation16_spill] sm:$0xff]  ;;  %8779 = vst [vmem:[#allocation26_spill] sm:$0xff] %v5894_v52 }
 0x1d9   :  { %v5818_v44 = vpop.permute.xlu0 %1471  ;;  %v876_v10 = vcombine.high %v810_v1, %v826_v47  ;;  %v5954_v1 = vcombine.low %v5490_v43, %v5484_v28 }
 0x1da   :  { %8775 = vst [vmem:[#allocation55_spill] sm:$0xff] %v5881_v62  ;;  %v5890_v16 = vrot.slane %v931_v60, %v5079_v13  ;;  %v5902_v2 = vrot.slane %v932_v54, %v5079_v13  ;;  %v1652_v60 = vcombine.high %v5751_v32, %v5793_v7 }
 0x1db   :  { %2851 = vperm.xlu0 %4982, %v5822_v45   ;;  %v5860_v45 = vrot.slane %v963_v58, %v5084_v25  ;;  %1569 = vrot.lane.b32.xlu1 %v5711_v19, %s5049_s27  ;;  %v5884_v58 = vrot.slane %v859_v31, %v5084_v25  ;;  %v1651_v31 = vcombine.low %v5751_v32, %v5793_v7 }
 0x1dc   :  { %v5920_v32 = vrot.slane %v860_v11, %v5084_v25  ;;  %v1636_v7 = vcombine.high %v8780_v61, %v5607_v20  ;;  %v5935_v11 = vrot.slane %v947_v51, %v5079_v13  ;;  %8784 = vst [vmem:[#allocation58_spill] sm:$0xff] %v5954_v1 }
 0x1dd   :  { %v5877_v53 = vpop.permute.xlu0 %1479  ;;  %8776 = vst [vmem:[#allocation56_spill] sm:$0xff] %v5884_v58  ;;  %v1458_v12 = vpop.permute.xlu1 %1457  ;;  %v5917_v54 = vcombine.high %v5838_v57, %v5884_v58  ;;  %v1659_v58 = vrot.slane %v1651_v31, %v5079_v13 }
 0x1de   :  { %v1683_v19 = vcombine.low %v1454_v5, %v1458_v12  ;;  %v1684_v63 = vcombine.high %v1454_v5, %v1458_v12  ;;  %v1635_v5 = vcombine.low %v8780_v61, %v5607_v20  ;;  %v948_v20 = vcombine.high %v5304_v35, %v5371_v24 }
 0x1df   :  { %2857 = vperm.xlu0 %4982, %v5881_v62   ;;  %2791 = vperm.xlu1 %4983, %v5894_v52   ;;  %8781 = vst [vmem:[#allocation16_spill] sm:$0xff] %v5917_v54  ;;  %v5930_v62 = vcombine.low %v5472_v8, %v5462_v27  ;;  %v1666_v61 = vrot.slane %v1652_v60, %v5079_v13 }
 0x1e0   :  { %v1691_v38 = vrot.slane %v1683_v19, %v5079_v13  ;;  %v1698_v18 = vrot.slane %v1684_v63, %v5079_v13  ;;  %v1675_v19 = vrot.slane %v1667_v59, %v5079_v13  ;;  %v1682_v27 = vrot.slane %v1668_v42, %v5079_v13 }
 0x1e1   :  { %v5913_v12 = vpop.permute.xlu0 %1483  ;;  %v5926_v52 = vpop.permute.xlu1 %1461  ;;  %8782 = vst [vmem:[#allocation29_spill] sm:$0xff] %v5930_v62  ;;  %v1643_v8 = vrot.slane %v1635_v5, %v5079_v13  ;;  %v5950_v47 = vcombine.high %v5845_v4, %v5920_v32  ;;  %v5957_v24 = vrot.slane %v875_v6, %v5084_v25  ;;  %v1650_v35 = vrot.slane %v1636_v7, %v5079_v13 }
 0x1e2   :  { %v1731_v51 = vcombine.low %v1675_v19, %v1691_v38  ;;  %v1732_v31 = vcombine.high %v1675_v19, %v1691_v38  ;;  %v1747_v60 = vcombine.low %v1682_v27, %v1698_v18  ;;  %v995_v42 = vcombine.low %v5890_v16, %v5935_v11 }
 0x1e3   :  { %2863 = vperm.xlu0 %4982, %v5917_v54   ;;  %2794 = vperm.xlu1 %4983, %v5930_v62   ;;  %8783 = vst [vmem:[#allocation57_spill] sm:$0xff] %v5950_v47  ;;  %v1699_v5 = vcombine.low %v1643_v8, %v1659_v58  ;;  %v1748_v57 = vcombine.high %v1682_v27, %v1698_v18  ;;  %v8803_v62 = vld [vmem:[#allocation43_spill] sm:$0xff] }
 0x1e4   :  { %v5964_v54 = vrot.slane %v876_v10, %v5084_v25  ;;  %v5967_v28 = vrot.slane %v948_v20, %v5079_v13  ;;  %v996_v43 = vcombine.high %v5890_v16, %v5935_v11  ;;  %v1700_v6 = vcombine.high %v1643_v8, %v1659_v58  ;;  %v8794_v8 = vld [vmem:[#allocation31_spill] sm:$0xff] }
 0x1e5   :  { %v5946_v63 = vpop.permute.xlu0 %1487  ;;  %v1466_v59 = vpop.permute.xlu1 %1465  ;;  %v1715_v7 = vcombine.low %v1650_v35, %v1666_v61  ;;  %v1716_v38 = vcombine.high %v1650_v35, %v1666_v61  ;;  %v5976_v18 = vcombine.high %v5851_v29, %v5957_v24  ;;  %v5980_v10 = vcombine.low %v5516_v0, %v5504_v3 }
 0x1e6   :  { %v5984_v20 = vcombine.low %v5551_v30, %v5534_v49  ;;  %v1787_v58 = vcombine.low %v5926_v52, %v1466_v59  ;;  %v5988_v11 = vrot.slane %v1731_v51, %v5084_v25  ;;  %v5991_v61 = vrot.slane %v1732_v31, %v5084_v25 }
 0x1e7   :  { %2869 = vperm.xlu0 %4982, %v5950_v47   ;;  %2800 = vperm.xlu1 %4983, %v5954_v1   ;;  %8785 = vst [vmem:[#allocation59_spill] sm:$0xff] %v5976_v18  ;;  %8786 = vst [vmem:[#allocation60_spill] sm:$0xff] %v5980_v10  ;;  %v5994_v27 = vrot.slane %v1747_v60, %v5084_v25  ;;  %v5999_v3 = vcombine.high %v5857_v22, %v5964_v54 }
 0x1e8   :  { %8787 = vst [vmem:[#allocation61_spill] sm:$0xff] %v5984_v20  ;;  %8788 = vst [vmem:[#allocation62_spill] sm:$0xff] %v5988_v11  ;;  %v6002_v0 = vrot.slane %v995_v42, %v5084_v25  ;;  %v6005_v49 = vrot.slane %v1699_v5, %v5084_v25  ;;  %v6008_v30 = vrot.slane %v1748_v57, %v5084_v25 }
 0x1e9   :  { %v5972_v19 = vpop.permute.xlu0 %1495  ;;  %v1470_v16 = vpop.permute.xlu1 %1469  ;;  %8789 = vst [vmem:[#allocation63_spill] sm:$0xff] %v5991_v61  ;;  %8790 = vst [vmem:[#allocation64_spill] sm:$0xff] %v5994_v27  ;;  %v1771_v35 = vcombine.low %v8794_v8, %v5736_v17  ;;  %v1788_v51 = vcombine.high %v5926_v52, %v1466_v59  ;;  %v6015_v31 = vrot.slane %v1700_v6, %v5084_v25 }
 0x1ea   :  { %8791 = vst [vmem:[#allocation65_spill] sm:$0xff] %v5999_v3  ;;  %8792 = vst [vmem:[#allocation66_spill] sm:$0xff] %v6005_v49  ;;  %v6018_v60 = vrot.slane %v1715_v7, %v5084_v25  ;;  %v1772_v42 = vcombine.high %v8794_v8, %v5736_v17  ;;  %v1803_v57 = vcombine.low %v5780_v48, %v5818_v44 }
 0x1eb   :  { %2875 = vperm.xlu0 %4982, %v5976_v18   ;;  %8793 = vst [vmem:[#allocation67_spill] sm:$0xff] %v6008_v30  ;;  %2806 = vperm.xlu1 %4983, %v5980_v10   ;;  %8795 = vst [vmem:[#allocation31_spill] sm:$0xff] %v6015_v31  ;;  %v1804_v5 = vcombine.high %v5780_v48, %v5818_v44  ;;  %v6029_v52 = vrot.slane %v1716_v38, %v5084_v25 }
 0x1ec   :  { %8796 = vst [vmem:[#allocation68_spill] sm:$0xff] %v6018_v60  ;;  %v1795_v59 = vrot.slane %v1787_v58, %v5079_v13  ;;  %v6034_v7 = vcombine.high %v6005_v49, %v5988_v11  ;;  %v6038_v17 = vcombine.low %v6015_v31, %v5991_v61  ;;  %v6042_v8 = vcombine.low %v6018_v60, %v5994_v27 }
 0x1ed   :  { %v6026_v1 = vpop.permute.xlu0 %1499  ;;  %8797 = vst [vmem:[#allocation69_spill] sm:$0xff] %v6029_v52  ;;  %v1474_v6 = vpop.permute.xlu1 %1473  ;;  %v1011_v48 = vcombine.low %v5902_v2, %v5967_v28  ;;  %v6049_v58 = vcombine.low %v6029_v52, %v6008_v30  ;;  %v1802_v10 = vrot.slane %v1788_v51, %v5079_v13  ;;  %v1786_v51 = vrot.slane %v1772_v42, %v5079_v13 }
 0x1ee   :  { %8798 = vst [vmem:[#allocation70_spill] sm:$0xff] %v6034_v7  ;;  %8799 = vst [vmem:[#allocation71_spill] sm:$0xff] %v6038_v17  ;;  %v1819_v44 = vcombine.low %v1470_v16, %v1474_v6  ;;  %v1820_v38 = vcombine.high %v1470_v16, %v1474_v6  ;;  %v1779_v7 = vrot.slane %v1771_v35, %v5079_v13 }
 0x1ef   :  { %8800 = vst [vmem:[#allocation72_spill] sm:$0xff] %v6042_v8  ;;  %2881 = vperm.xlu0 %4982, %v5999_v3   ;;  %8801 = vst [vmem:[#allocation73_spill] sm:$0xff] %v6049_v58  ;;  %2812 = vperm.xlu1 %4983, %v5984_v20   ;;  %v6056_v8 = vcombine.high %v5860_v45, %v6002_v0  ;;  %v6059_v17 = vrot.slane %v996_v43, %v5084_v25 }
 0x1f0   :  { %v1811_v16 = vrot.slane %v1803_v57, %v5079_v13  ;;  %v1818_v6 = vrot.slane %v1804_v5, %v5079_v13  ;;  %v1827_v3 = vrot.slane %v1819_v44, %v5079_v13  ;;  %v1834_v58 = vrot.slane %v1820_v38, %v5079_v13 }
 0x1f1   :  { %8802 = vst [vmem:[#allocation74_spill] sm:$0xff] %v6056_v8  ;;  %v6065_v35 = vpop.permute.xlu0 %1503  ;;  %v1835_v20 = vcombine.low %v1779_v7, %v1795_v59  ;;  %v1836_v18 = vcombine.high %v1779_v7, %v1795_v59  ;;  %v1478_v47 = vpop.permute.xlu1 %1477  ;;  %v6070_v52 = vcombine.low %v8803_v62, %v5574_v34  ;;  %v8805_v5 = vcombine.low %v5308_v39, %v5512_v36 }
 0x1f2   :  { %v1867_v43 = vcombine.low %v1811_v16, %v1827_v3  ;;  %v1868_v30 = vcombine.high %v1811_v16, %v1827_v3  ;;  %v1883_v57 = vcombine.low %v1818_v6, %v1834_v58  ;;  %v1884_v60 = vcombine.high %v1818_v6, %v1834_v58  ;;  %v8810_v16 = vld [vmem:[#allocation44_spill] sm:$0xff]  ;;  %v8811_v6 = vld [vmem:[#allocation9_spill] sm:$0xff] }
 0x1f3   :  { %8804 = vst [vmem:[#allocation43_spill] sm:$0xff] %v6070_v52  ;;  %2887 = vperm.xlu0 %4982, %v6056_v8   ;;  %v6077_v44 = vrot.slane %v8805_v5, %v5079_v13  ;;  %v1012_v42 = vcombine.high %v5902_v2, %v5967_v28  ;;  %v1851_v59 = vcombine.low %v1786_v51, %v1802_v10 }
 0x1f4   :  { %v1852_v7 = vcombine.high %v1786_v51, %v1802_v10  ;;  %2818 = vperm.xlu1 %4983, %v6070_v52   ;;  %v6086_v62 = vcombine.high %v5867_v15, %v6059_v17  ;;  %v6089_v3 = vrot.slane %v1011_v48, %v5084_v25  ;;  %v6092_v38 = vrot.slane %v1867_v43, %v5084_v25 }
 0x1f5   :  { %v6082_v34 = vpop.permute.xlu0 %1511  ;;  %v6095_v58 = vrot.slane %v1868_v30, %v5084_v25  ;;  %v8809_v2 = vcombine.low %v8778_v14, %v8777_v21  ;;  %v1482_v10 = vpop.permute.xlu1 %1481  ;;  %v6103_v51 = vcombine.low %v8811_v6, %v8810_v16  ;;  %v6106_v5 = vrot.slane %v1883_v57, %v5084_v25  ;;  %v8818_v6 = vld [vmem:[#allocation51_spill] sm:$0xff] }
 0x1f6   :  { %8806 = vst [vmem:[#allocation75_spill] sm:$0xff] %v6086_v62  ;;  %8807 = vst [vmem:[#allocation76_spill] sm:$0xff] %v6092_v38  ;;  %v6109_v48 = vrot.slane %v1884_v60, %v5084_v25  ;;  %v1068_v30 = vcombine.high %v8778_v14, %v8777_v21  ;;  %v1084_v43 = vcombine.high %v5308_v39, %v5512_v36  ;;  %v8817_v60 = vld [vmem:[#allocation49_spill] sm:$0xff] }
 0x1f7   :  { %8808 = vst [vmem:[#allocation77_spill] sm:$0xff] %v6095_v58  ;;  %v1075_v28 = vrot.slane %v8809_v2, %v5079_v13  ;;  %8812 = vst [vmem:[#allocation44_spill] sm:$0xff] %v6103_v51  ;;  %2893 = vperm.xlu0 %4982, %v6086_v62   ;;  %v6117_v2 = vrot.slane %v1835_v20, %v5084_v25  ;;  %v6120_v16 = vrot.slane %v1836_v18, %v5084_v25 }
 0x1f8   :  { %8813 = vst [vmem:[#allocation9_spill] sm:$0xff] %v6106_v5  ;;  %8814 = vst [vmem:[#allocation78_spill] sm:$0xff] %v6109_v48  ;;  %2824 = vperm.xlu1 %4983, %v6103_v51   ;;  %v6126_v52 = vcombine.low %v8818_v6, %v8817_v60  ;;  %v6129_v21 = vrot.slane %v1851_v59, %v5084_v25  ;;  %v6132_v39 = vrot.slane %v1852_v7, %v5084_v25 }
 0x1f9   :  { %8815 = vst [vmem:[#allocation79_spill] sm:$0xff] %v6117_v2  ;;  %8816 = vst [vmem:[#allocation80_spill] sm:$0xff] %v6120_v16  ;;  %v1131_v57 = vcombine.low %v1075_v28, %v6077_v44  ;;  %v6134_v36 = vpop.permute.xlu0 %1515  ;;  %v6138_v14 = vcombine.high %v5870_v40, %v6089_v3  ;;  %v6141_v18 = vrot.slane %v1012_v42, %v5084_v25  ;;  %v1486_v6 = vpop.permute.xlu1 %1485 }
 0x1fa   :  { %8819 = vst [vmem:[#allocation49_spill] sm:$0xff] %v6126_v52  ;;  %8820 = vst [vmem:[#allocation51_spill] sm:$0xff] %v6129_v21  ;;  %v6145_v20 = vcombine.low %v6117_v2, %v6092_v38  ;;  %v6149_v59 = vcombine.low %v6120_v16, %v6095_v58  ;;  %v1923_v60 = vcombine.low %v1478_v47, %v1482_v10  ;;  %v8836_v16 = vld [vmem:[#allocation13_spill] sm:$0xff] }
 0x1fb   :  { %8821 = vst [vmem:[#allocation81_spill] sm:$0xff] %v6132_v39  ;;  %8822 = vst [vmem:[#allocation82_spill] sm:$0xff] %v6138_v14  ;;  %v1924_v7 = vcombine.high %v1478_v47, %v1482_v10  ;;  %v6153_v51 = vcombine.low %v6129_v21, %v6106_v5  ;;  %v6157_v62 = vcombine.low %v6132_v39, %v6109_v48  ;;  %2899 = vperm.xlu0 %4982, %v6138_v14   ;;  %v8831_v39 = vld [vmem:[#allocation19_spill] sm:$0xff]  ;;  %v8835_v5 = vld [vmem:[#allocation10_spill] sm:$0xff] }
 0x1fc   :  { %8823 = vst [vmem:[#allocation83_spill] sm:$0xff] %v6145_v20  ;;  %8824 = vst [vmem:[#allocation84_spill] sm:$0xff] %v6149_v59  ;;  %v6160_v42 = vrot.slane %v1068_v30, %v5079_v13  ;;  %v6163_v20 = vrot.slane %v1084_v43, %v5079_v13  ;;  %v8827_v47 = vcombine.low %v5577_v50, %v5709_v41  ;;  %2830 = vperm.xlu1 %4983, %v6126_v52  }
 0x1fd   :  { %8825 = vst [vmem:[#allocation85_spill] sm:$0xff] %v6153_v51  ;;  %8826 = vst [vmem:[#allocation86_spill] sm:$0xff] %v6157_v62  ;;  %v8828_v51 = vcombine.high %v5577_v50, %v5709_v41  ;;  %v1132_v30 = vcombine.high %v1075_v28, %v6077_v44  ;;  %v8829_v62 = vld [vmem:[#allocation32_spill] sm:$0xff]  ;;  %v6185_v8 = vrot.slane %v1131_v57, %v5084_v25  ;;  %v6193_v44 = vpop.permute.xlu0 %1519  ;;  %v1490_v21 = vpop.permute.xlu1 %1489 }
 0x1fe   :  { %v6170_v10 = vrot.slane %v8827_v47, %v5084_v25  ;;  %v1907_v43 = vcombine.low %v8829_v62, %v5877_v53  ;;  %v1908_v14 = vcombine.high %v8829_v62, %v5877_v53  ;;  %v8830_v47 = vld [vmem:[#allocation24_spill] sm:$0xff]  ;;  %v1939_v50 = vcombine.low %v5913_v12, %v5946_v63  ;;  %v8834_v62 = vld [vmem:[#allocation21_spill] sm:$0xff] }
 0x1ff   :  { %v6176_v59 = vrot.slane %v8828_v51, %v5084_v25  ;;  %v1203_v48 = vcombine.low %v8831_v39, %v8830_v47  ;;  %v1940_v41 = vcombine.high %v5913_v12, %v5946_v63  ;;  %v6197_v28 = vcombine.high %v5873_v46, %v6141_v18  ;;  %v8833_v53 = vld [vmem:[#allocation28_spill] sm:$0xff] }
 0x200   :  { %v1219_v51 = vcombine.low %v8834_v62, %v8833_v53  ;;  %v1931_v57 = vrot.slane %v1923_v60, %v5079_v13  ;;  %v1938_v52 = vrot.slane %v1924_v7, %v5079_v13  ;;  %v6205_v58 = vcombine.low %v8836_v16, %v8835_v5 }
 0x201   :  { %8832 = vst [vmem:[#allocation32_spill] sm:$0xff] %v6197_v28  ;;  %v1147_v12 = vcombine.low %v6160_v42, %v6163_v20  ;;  %v1955_v63 = vcombine.low %v1486_v6, %v1490_v21  ;;  %v1956_v2 = vcombine.high %v1486_v6, %v1490_v21  ;;  %2905 = vperm.xlu0 %4982, %v6197_v28   ;;  %v6230_v31 = vpop.permute.xlu1 %1493 }
 0x202   :  { %8837 = vst [vmem:[#allocation24_spill] sm:$0xff] %v6205_v58  ;;  %v6212_v38 = vcombine.low %v5762_v23, %v5743_v9  ;;  %v1915_v60 = vrot.slane %v1907_v43, %v5079_v13  ;;  %v1922_v7 = vrot.slane %v1908_v14, %v5079_v13  ;;  %2836 = vperm.xlu1 %4983, %v6205_v58   ;;  %v6228_v43 = vpop.permute.xlu0 %1527 }
 0x203   :  { %v6219_v5 = vcombine.high %v6170_v10, %v6185_v8  ;;  %v6222_v16 = vrot.slane %v1132_v30, %v5084_v25  ;;  %v1947_v21 = vrot.slane %v1939_v50, %v5079_v13  ;;  %v1954_v6 = vrot.slane %v1940_v41, %v5079_v13 }
 0x204   :  { %8838 = vst [vmem:[#allocation19_spill] sm:$0xff] %v6212_v38  ;;  %v1963_v9 = vrot.slane %v1955_v63, %v5079_v13  ;;  %v1970_v23 = vrot.slane %v1956_v2, %v5079_v13  ;;  %v1971_v14 = vcombine.low %v1915_v60, %v1931_v57  ;;  %v1972_v28 = vcombine.high %v1915_v60, %v1931_v57 }
 0x205   :  { %8839 = vst [vmem:[#allocation28_spill] sm:$0xff] %v6219_v5  ;;  %v1987_v58 = vcombine.low %v1922_v7, %v1938_v52  ;;  %v1988_v27 = vcombine.high %v1922_v7, %v1938_v52  ;;  %2911 = vperm.xlu0 %4982, %v6219_v5   ;;  %v1148_v50 = vcombine.high %v6160_v42, %v6163_v20  ;;  %v1498_v7 = vpop.permute.xlu1 %1497 }
 0x206   :  { %v2003_v61 = vcombine.low %v1947_v21, %v1963_v9  ;;  %v2004_v49 = vcombine.high %v1947_v21, %v1963_v9  ;;  %v2019_v30 = vcombine.low %v1954_v6, %v1970_v23  ;;  %v2020_v11 = vcombine.high %v1954_v6, %v1970_v23  ;;  %2842 = vperm.xlu1 %4983, %v6212_v38   ;;  %v6246_v57 = vpop.permute.xlu0 %1531  ;;  %v8857_v23 = vld [vmem:[#allocation50_spill] sm:$0xff] }
 0x207   :  { %v6236_v41 = vrot.slane %v1219_v51, %v5079_v13  ;;  %v6241_v2 = vcombine.high %v6176_v59, %v6222_v16  ;;  %v6244_v52 = vrot.slane %v1147_v12, %v5084_v25  ;;  %v1211_v51 = vrot.slane %v1203_v48, %v5079_v13 }
 0x208   :  { %v6249_v63 = vrot.slane %v2003_v61, %v5084_v25  ;;  %v6252_v60 = vrot.slane %v2004_v49, %v5084_v25  ;;  %v6255_v20 = vrot.slane %v2019_v30, %v5084_v25  ;;  %v6258_v42 = vrot.slane %v2020_v11, %v5084_v25  ;;  %v8848_v11 = vld [vmem:[#allocation11_spill] sm:$0xff] }
 0x209   :  { %8840 = vst [vmem:[#allocation21_spill] sm:$0xff] %v6241_v2  ;;  %v6263_v12 = vcombine.low %v5803_v33, %v5787_v56  ;;  %v6266_v21 = vrot.slane %v1971_v14, %v5084_v25  ;;  %v6269_v61 = vrot.slane %v1972_v28, %v5084_v25  ;;  %v1220_v49 = vcombine.high %v8834_v62, %v8833_v53  ;;  %v8862_v30 = vld [vmem:[#allocation47_spill] sm:$0xff] }
 0x20a   :  { %8841 = vst [vmem:[#allocation10_spill] sm:$0xff] %v6249_v63  ;;  %8842 = vst [vmem:[#allocation13_spill] sm:$0xff] %v6252_v60  ;;  %2917 = vperm.xlu0 %4982, %v6241_v2   ;;  %v8849_v48 = vcombine.low %v5580_v37, %v8848_v11  ;;  %v6281_v56 = vrot.slane %v1987_v58, %v5084_v25  ;;  %v6284_v33 = vrot.slane %v1988_v27, %v5084_v25  ;;  %v8863_v2 = vld [vmem:[#allocation15_spill] sm:$0xff] }
 0x20b   :  { %8843 = vst [vmem:[#allocation87_spill] sm:$0xff] %v6255_v20  ;;  %8844 = vst [vmem:[#allocation88_spill] sm:$0xff] %v6258_v42  ;;  %v1204_v28 = vcombine.high %v8831_v39, %v8830_v47  ;;  %v1267_v9 = vcombine.low %v1211_v51, %v6236_v41  ;;  %2848 = vperm.xlu1 %4983, %v6263_v12   ;;  %v6292_v53 = vcombine.low %v6266_v21, %v6249_v63 }
 0x20c   :  { %8845 = vst [vmem:[#allocation89_spill] sm:$0xff] %v6263_v12  ;;  %8846 = vst [vmem:[#allocation90_spill] sm:$0xff] %v6266_v21  ;;  %v6278_v6 = vrot.slane %v8849_v48, %v5084_v25  ;;  %v6296_v62 = vcombine.low %v6269_v61, %v6252_v60  ;;  %v6303_v27 = vrot.slane %v1148_v50, %v5084_v25  ;;  %v8858_v50 = vld [vmem:[#allocation23_spill] sm:$0xff] }
 0x20d   :  { %8847 = vst [vmem:[#allocation91_spill] sm:$0xff] %v6269_v61  ;;  %8850 = vst [vmem:[#allocation11_spill] sm:$0xff] %v6281_v56  ;;  %v6307_v39 = vcombine.low %v6281_v56, %v6255_v20  ;;  %v6311_v47 = vcombine.low %v6284_v33, %v6258_v42  ;;  %v1251_v14 = vcombine.low %v8857_v23, %v5798_v26  ;;  %v8874_v56 = vld [vmem:[#allocation22_spill] sm:$0xff] }
 0x20e   :  { %8851 = vst [vmem:[#allocation92_spill] sm:$0xff] %v6284_v33  ;;  %8852 = vst [vmem:[#allocation93_spill] sm:$0xff] %v6292_v53  ;;  %v6300_v58 = vcombine.high %v6278_v6, %v6244_v52  ;;  %v2059_v48 = vcombine.low %v6230_v31, %v1498_v7  ;;  %v6318_v53 = vpop.permute.xlu0 %1535  ;;  %v6322_v12 = vcombine.low %v8858_v50, %v5825_v55 }
 0x20f   :  { %8853 = vst [vmem:[#allocation94_spill] sm:$0xff] %v6296_v62  ;;  %8855 = vst [vmem:[#allocation96_spill] sm:$0xff] %v6307_v39  ;;  %v1502_v62 = vpop.permute.xlu1 %1501  ;;  %v6325_v39 = vrot.slane %v1220_v49, %v5079_v13  ;;  %v8864_v5 = vcombine.low %v8862_v30, %v8863_v2  ;;  %v8866_v55 = vcombine.high %v8862_v30, %v8863_v2  ;;  %v8871_v30 = vld [vmem:[#allocation17_spill] sm:$0xff] }
 0x210   :  { %8854 = vst [vmem:[#allocation95_spill] sm:$0xff] %v6300_v58  ;;  %8856 = vst [vmem:[#allocation97_spill] sm:$0xff] %v6311_v47  ;;  %2923 = vperm.xlu0 %4982, %v6300_v58   ;;  %v8860_v47 = vcombine.high %v5580_v37, %v8848_v11  ;;  %v1268_v50 = vcombine.high %v1211_v51, %v6236_v41  ;;  %v8867_v58 = vld [vmem:[#allocation33_spill] sm:$0xff]  ;;  %v2060_v37 = vcombine.high %v6230_v31, %v1498_v7 }
 0x211   :  { %8859 = vst [vmem:[#allocation50_spill] sm:$0xff] %v6322_v12  ;;  %v6338_v33 = vrot.slane %v8864_v5, %v5084_v25  ;;  %v6344_v49 = vrot.slane %v8866_v55, %v5084_v25  ;;  %v2043_v42 = vcombine.low %v8867_v58, %v5972_v19  ;;  %2854 = vperm.xlu1 %4983, %v6322_v12   ;;  %v8873_v12 = vld [vmem:[#allocation52_spill] sm:$0xff] }
 0x212   :  { %v6332_v38 = vrot.slane %v8860_v47, %v5084_v25  ;;  %v6352_v11 = vrot.slane %v1267_v9, %v5084_v25  ;;  %v1218_v5 = vrot.slane %v1204_v28, %v5079_v13  ;;  %v2075_v47 = vcombine.low %v6026_v1, %v6065_v35  ;;  %v8870_v9 = vld [vmem:[#allocation56_spill] sm:$0xff] }
 0x213   :  { %8865 = vst [vmem:[#allocation47_spill] sm:$0xff] %v6338_v33  ;;  %v2076_v2 = vcombine.high %v6026_v1, %v6065_v35  ;;  %v2044_v31 = vcombine.high %v8867_v58, %v5972_v19  ;;  %v2067_v51 = vrot.slane %v2059_v48, %v5079_v13  ;;  %v1506_v7 = vpop.permute.xlu1 %1505  ;;  %v6368_v55 = vcombine.low %v8871_v30, %v8870_v9  ;;  %v6379_v48 = vpop.permute.xlu0 %1543 }
 0x214   :  { %8861 = vst [vmem:[#allocation23_spill] sm:$0xff] %v6332_v38  ;;  %8868 = vst [vmem:[#allocation15_spill] sm:$0xff] %v6352_v11  ;;  %v6361_v41 = vcombine.high %v6332_v38, %v6303_v27  ;;  %v6371_v28 = vrot.slane %v1251_v14, %v5084_v25  ;;  %v1355_v1 = vcombine.low %v8874_v56, %v8873_v12 }
 0x215   :  { %8872 = vst [vmem:[#allocation56_spill] sm:$0xff] %v6368_v55  ;;  %v1283_v35 = vcombine.low %v1218_v5, %v6325_v39  ;;  %v2091_v20 = vcombine.low %v1502_v62, %v1506_v7  ;;  %v2092_v61 = vcombine.high %v1502_v62, %v1506_v7  ;;  %v2051_v19 = vrot.slane %v2043_v42, %v5079_v13 }
 0x216   :  { %8869 = vst [vmem:[#allocation33_spill] sm:$0xff] %v6361_v41  ;;  %2929 = vperm.xlu0 %4982, %v6361_v41   ;;  %v2074_v58 = vrot.slane %v2060_v37, %v5079_v13  ;;  %8875 = vst [vmem:[#allocation17_spill] sm:$0xff] %v6379_v48  ;;  %2860 = vperm.xlu1 %4983, %v6368_v55   ;;  %v6384_v14 = vcombine.high %v6338_v33, %v6352_v11  ;;  %v8877_v37 = vld [vmem:[#allocation27_spill] sm:$0xff]  ;;  %v8878_v41 = vld [vmem:[#allocation18_spill] sm:$0xff] }
 0x217   :  { %v6387_v9 = vrot.slane %v1268_v50, %v5084_v25  ;;  %v2083_v30 = vrot.slane %v2075_v47, %v5079_v13  ;;  %v2090_v62 = vrot.slane %v2076_v2, %v5079_v13  ;;  %v2099_v7 = vrot.slane %v2091_v20, %v5079_v13  ;;  %v1510_v63 = vpop.permute.xlu1 %1509 }
 0x218   :  { %8876 = vst [vmem:[#allocation52_spill] sm:$0xff] %v6384_v14  ;;  %v2106_v42 = vrot.slane %v2092_v61, %v5079_v13  ;;  %v1339_v60 = vcombine.low %v8878_v41, %v8877_v37  ;;  %v2058_v55 = vrot.slane %v2044_v31, %v5079_v13  ;;  %v2107_v21 = vcombine.low %v2051_v19, %v2067_v51 }
 0x219   :  { %v6398_v33 = vcombine.low %v5845_v4, %v5920_v32  ;;  %v2108_v50 = vcombine.high %v2051_v19, %v2067_v51  ;;  %v2139_v11 = vcombine.low %v2083_v30, %v2099_v7  ;;  %v2140_v47 = vcombine.high %v2083_v30, %v2099_v7 }
 0x21a   :  { %v2155_v48 = vcombine.low %v2090_v62, %v2106_v42  ;;  %2935 = vperm.xlu0 %4982, %v6384_v14   ;;  %v6402_v20 = vrot.slane %v1355_v1, %v5079_v13  ;;  %v1284_v61 = vcombine.high %v1218_v5, %v6325_v39  ;;  %v2123_v2 = vcombine.low %v2058_v55, %v2074_v58  ;;  %v6420_v5 = vpop.permute.xlu0 %1547 }
 0x21b   :  { %8879 = vst [vmem:[#allocation22_spill] sm:$0xff] %v6398_v33  ;;  %v2156_v38 = vcombine.high %v2090_v62, %v2106_v42  ;;  %2866 = vperm.xlu1 %4983, %v6398_v33   ;;  %v6408_v31 = vcombine.high %v6344_v49, %v6387_v9  ;;  %v6411_v4 = vrot.slane %v1283_v35, %v5084_v25  ;;  %v1514_v19 = vpop.permute.xlu1 %1513 }
 0x21c   :  { %v6414_v32 = vrot.slane %v2139_v11, %v5084_v25  ;;  %v6417_v51 = vrot.slane %v2140_v47, %v5084_v25  ;;  %v1347_v1 = vrot.slane %v1339_v60, %v5079_v13  ;;  %v2124_v39 = vcombine.high %v2058_v55, %v2074_v58 }
 0x21d   :  { %8880 = vst [vmem:[#allocation27_spill] sm:$0xff] %v6408_v31  ;;  %v6424_v30 = vcombine.low %v5851_v29, %v5957_v24  ;;  %v6427_v62 = vrot.slane %v2155_v48, %v5084_v25  ;;  %v1340_v11 = vcombine.high %v8878_v41, %v8877_v37  ;;  %v1356_v35 = vcombine.high %v8874_v56, %v8873_v12 }
 0x21e   :  { %2941 = vperm.xlu0 %4982, %v6408_v31   ;;  %v6435_v60 = vrot.slane %v2107_v21, %v5084_v25  ;;  %v6438_v55 = vrot.slane %v2108_v50, %v5084_v25  ;;  %v1403_v29 = vcombine.low %v1347_v1, %v6402_v20  ;;  %v6444_v24 = vcombine.low %v5857_v22, %v5964_v54 }
 0x21f   :  { %8881 = vst [vmem:[#allocation18_spill] sm:$0xff] %v6424_v30  ;;  %2872 = vperm.xlu1 %4983, %v6424_v30   ;;  %v6447_v41 = vrot.slane %v2123_v2, %v5084_v25  ;;  %v6450_v12 = vrot.slane %v2156_v38, %v5084_v25  ;;  %v6454_v21 = vcombine.high %v6371_v28, %v6411_v4  ;;  %v1518_v7 = vpop.permute.xlu1 %1517  ;;  %v8889_v2 = vld [vmem:[#allocation20_spill] sm:$0xff] }
 0x220   :  { %8882 = vst [vmem:[#allocation98_spill] sm:$0xff] %v6444_v24  ;;  %v6457_v56 = vrot.slane %v1284_v61, %v5084_v25  ;;  %v6461_v58 = vcombine.low %v6435_v60, %v6414_v32  ;;  %v6465_v22 = vcombine.low %v6438_v55, %v6417_v51  ;;  %v2195_v54 = vcombine.low %v1510_v63, %v1514_v19  ;;  %v8888_v61 = vld [vmem:[#allocation45_spill] sm:$0xff] }
 0x221   :  { %8883 = vst [vmem:[#allocation99_spill] sm:$0xff] %v6454_v21  ;;  %v2196_v48 = vcombine.high %v1510_v63, %v1514_v19  ;;  %v6468_v38 = vrot.slane %v2124_v39, %v5084_v25  ;;  %v6472_v42 = vcombine.low %v6447_v41, %v6427_v62  ;;  %v6475_v37 = vrot.slane %v1356_v35, %v5079_v13 }
 0x222   :  { %8884 = vst [vmem:[#allocation100_spill] sm:$0xff] %v6461_v58  ;;  %8885 = vst [vmem:[#allocation101_spill] sm:$0xff] %v6465_v22  ;;  %v1404_v50 = vcombine.high %v1347_v1, %v6402_v20  ;;  %2947 = vperm.xlu0 %4982, %v6454_v21   ;;  %v8887_v47 = vcombine.high %v8857_v23, %v5798_v26  ;;  %v8890_v39 = vcombine.low %v8888_v61, %v8889_v2  ;;  %v6495_v1 = vpop.permute.xlu0 %1551 }
 0x223   :  { %8886 = vst [vmem:[#allocation102_spill] sm:$0xff] %v6472_v42  ;;  %v8891_v42 = vld [vmem:[#allocation34_spill] sm:$0xff]  ;;  %2878 = vperm.xlu1 %4983, %v6444_v24   ;;  %v6499_v26 = vrot.slane %v1403_v29, %v5084_v25  ;;  %v6503_v23 = vcombine.low %v6468_v38, %v6450_v12  ;;  %v2212_v22 = vcombine.high %v6134_v36, %v6193_v44  ;;  %v1522_v58 = vpop.permute.xlu1 %1521 }
 0x224   :  { %v6483_v63 = vrot.slane %v8887_v47, %v5084_v25  ;;  %v6489_v19 = vrot.slane %v8890_v39, %v5084_v25  ;;  %v2179_v35 = vcombine.low %v8891_v42, %v6082_v34  ;;  %v2180_v20 = vcombine.high %v8891_v42, %v6082_v34 }
 0x225   :  { %8892 = vst [vmem:[#allocation45_spill] sm:$0xff] %v6503_v23  ;;  %v1354_v47 = vrot.slane %v1340_v11, %v5079_v13  ;;  %v2211_v39 = vcombine.low %v6134_v36, %v6193_v44  ;;  %v2203_v42 = vrot.slane %v2195_v54, %v5079_v13  ;;  %v2210_v29 = vrot.slane %v2196_v48, %v5079_v13 }
 0x226   :  { %v6512_v34 = vcombine.high %v6483_v63, %v6457_v56  ;;  %v6518_v23 = vcombine.low %v5860_v45, %v6002_v0  ;;  %v8895_v11 = vcombine.high %v8888_v61, %v8889_v2  ;;  %v2227_v44 = vcombine.low %v1518_v7, %v1522_v58 }
 0x227   :  { %v1419_v36 = vcombine.low %v1354_v47, %v6475_v37  ;;  %v2228_v30 = vcombine.high %v1518_v7, %v1522_v58  ;;  %v6530_v54 = vcombine.low %v5867_v15, %v6059_v17  ;;  %v2187_v48 = vrot.slane %v2179_v35, %v5079_v13  ;;  %v1526_v33 = vpop.permute.xlu1 %1525 }
 0x228   :  { %8893 = vst [vmem:[#allocation20_spill] sm:$0xff] %v6512_v34  ;;  %8894 = vst [vmem:[#allocation34_spill] sm:$0xff] %v6518_v23  ;;  %v6524_v24 = vrot.slane %v8895_v11, %v5084_v25  ;;  %2953 = vperm.xlu0 %4982, %v6512_v34   ;;  %v2194_v45 = vrot.slane %v2180_v20, %v5079_v13  ;;  %2884 = vperm.xlu1 %4983, %v6518_v23   ;;  %v6546_v23 = vpop.permute.xlu0 %1559 }
 0x229   :  { %8896 = vst [vmem:[#allocation103_spill] sm:$0xff] %v6530_v54  ;;  %v6537_v0 = vcombine.high %v6489_v19, %v6499_v26  ;;  %v6540_v61 = vrot.slane %v1404_v50, %v5084_v25  ;;  %v2219_v58 = vrot.slane %v2211_v39, %v5079_v13  ;;  %v2226_v7 = vrot.slane %v2212_v22, %v5079_v13 }
 0x22a   :  { %v2235_v15 = vrot.slane %v2227_v44, %v5079_v13  ;;  %v2242_v17 = vrot.slane %v2228_v30, %v5079_v13  ;;  %v2243_v2 = vcombine.low %v2187_v48, %v2203_v42  ;;  %v2244_v35 = vcombine.high %v2187_v48, %v2203_v42 }
 0x22b   :  { %8897 = vst [vmem:[#allocation104_spill] sm:$0xff] %v6537_v0  ;;  %v2259_v20 = vcombine.low %v2194_v45, %v2210_v29  ;;  %v2260_v11 = vcombine.high %v2194_v45, %v2210_v29  ;;  %v1420_v39 = vcombine.high %v1354_v47, %v6475_v37  ;;  %v6553_v30 = vcombine.high %v6524_v24, %v6540_v61  ;;  %v1530_v47 = vpop.permute.xlu1 %1529  ;;  %v8900_v45 = vld [vmem:[#allocation25_spill] sm:$0xff] }
 0x22c   :  { %v2275_v34 = vcombine.low %v2219_v58, %v2235_v15  ;;  %v2276_v21 = vcombine.high %v2219_v58, %v2235_v15  ;;  %v2291_v31 = vcombine.low %v2226_v7, %v2242_v17  ;;  %v2292_v50 = vcombine.high %v2226_v7, %v2242_v17  ;;  %2959 = vperm.xlu0 %4982, %v6537_v0   ;;  %v6595_v15 = vpop.permute.xlu0 %1563 }
 0x22d   :  { %2890 = vperm.xlu1 %4983, %v6530_v54   ;;  %8898 = vst [vmem:[#allocation105_spill] sm:$0xff] %v6553_v30  ;;  %v6556_v22 = vrot.slane %v1419_v36, %v5084_v25  ;;  %v6572_v48 = vcombine.low %v5870_v40, %v6089_v3  ;;  %v6575_v36 = vrot.slane %v2243_v2, %v5084_v25 }
 0x22e   :  { %v6559_v42 = vrot.slane %v2275_v34, %v5084_v25  ;;  %v6562_v29 = vrot.slane %v2276_v21, %v5084_v25  ;;  %v6565_v44 = vrot.slane %v2291_v31, %v5084_v25  ;;  %v6568_v37 = vrot.slane %v2292_v50, %v5084_v25  ;;  %v8901_v21 = vld [vmem:[#allocation46_spill] sm:$0xff] }
 0x22f   :  { %8899 = vst [vmem:[#allocation106_spill] sm:$0xff] %v6572_v48  ;;  %v6578_v34 = vrot.slane %v2244_v35, %v5084_v25  ;;  %v1388_v58 = vcombine.high %v8901_v21, %v8900_v45  ;;  %v8902_v31 = vcombine.low %v8901_v21, %v8900_v45  ;;  %v6590_v40 = vrot.slane %v2259_v20, %v5084_v25 }
 0x230   :  { %2965 = vperm.xlu0 %4982, %v6553_v30   ;;  %v6593_v3 = vrot.slane %v2260_v11, %v5084_v25  ;;  %v6600_v17 = vcombine.low %v6575_v36, %v6559_v42  ;;  %v6611_v20 = vrot.slane %v1420_v39, %v5084_v25  ;;  %v2331_v45 = vcombine.low %v1526_v33, %v1530_v47  ;;  %v8913_v30 = vld [vmem:[#allocation66_spill] sm:$0xff] }
 0x231   :  { %v6587_v7 = vrot.slane %v8902_v31, %v5084_v25  ;;  %2896 = vperm.xlu1 %4983, %v6572_v48   ;;  %v6604_v2 = vcombine.low %v6578_v34, %v6562_v29  ;;  %v6615_v11 = vcombine.low %v6590_v40, %v6565_v44  ;;  %v2332_v21 = vcombine.high %v1526_v33, %v1530_v47  ;;  %v1534_v31 = vpop.permute.xlu1 %1533  ;;  %v6642_v47 = vpop.permute.xlu0 %1567 }
 0x232   :  { %8903 = vst [vmem:[#allocation25_spill] sm:$0xff] %v6600_v17  ;;  %v6619_v50 = vcombine.low %v6593_v3, %v6568_v37  ;;  %v6627_v39 = vrot.slane %v1388_v58, %v5084_v25  ;;  %v8909_v17 = vld [vmem:[#allocation36_spill] sm:$0xff]  ;;  %v2347_v33 = vcombine.low %v6246_v57, %v6318_v53  ;;  %v2339_v58 = vrot.slane %v2331_v45, %v5079_v13 }
 0x233   :  { %8904 = vst [vmem:[#allocation46_spill] sm:$0xff] %v6604_v2  ;;  %v6608_v35 = vcombine.high %v6587_v7, %v6556_v22  ;;  %8906 = vst [vmem:[#allocation108_spill] sm:$0xff] %v6615_v11  ;;  %v6623_v2 = vcombine.low %v5873_v46, %v6141_v18  ;;  %v2315_v48 = vcombine.low %v8909_v17, %v6228_v43 }
 0x234   :  { %8907 = vst [vmem:[#allocation109_spill] sm:$0xff] %v6619_v50  ;;  %v2316_v11 = vcombine.high %v8909_v17, %v6228_v43  ;;  %v2348_v46 = vcombine.high %v6246_v57, %v6318_v53  ;;  %v6640_v18 = vcombine.high %v6627_v39, %v6611_v20  ;;  %v2346_v50 = vrot.slane %v2332_v21, %v5079_v13 }
 0x235   :  { %8905 = vst [vmem:[#allocation107_spill] sm:$0xff] %v6608_v35  ;;  %8908 = vst [vmem:[#allocation110_spill] sm:$0xff] %v6623_v2  ;;  %2971 = vperm.xlu0 %4982, %v6608_v35   ;;  %2902 = vperm.xlu1 %4983, %v6623_v2   ;;  %v1538_v54 = vpop.permute.xlu1 %1537  ;;  %v6648_v43 = vcombine.low %v6170_v10, %v6185_v8  ;;  %v2323_v57 = vrot.slane %v2315_v48, %v5079_v13  ;;  %v8912_v35 = vld [vmem:[#allocation62_spill] sm:$0xff]  ;;  %v6662_v14 = vpop.permute.xlu0 %2788 }
 0x236   :  { %8910 = vst [vmem:[#allocation36_spill] sm:$0xff] %v6640_v18  ;;  %v2363_v17 = vcombine.low %v1534_v31, %v1538_v54  ;;  %v2364_v2 = vcombine.high %v1534_v31, %v1538_v54  ;;  %v2330_v53 = vrot.slane %v2316_v11, %v5079_v13  ;;  %v6656_v45 = vcombine.low %v8913_v30, %v8912_v35 }
 0x237   :  { %8911 = vst [vmem:[#allocation111_spill] sm:$0xff] %v6648_v43  ;;  %v2355_v21 = vrot.slane %v2347_v33, %v5079_v13  ;;  %v2362_v0 = vrot.slane %v2348_v46, %v5079_v13  ;;  %v2379_v54 = vcombine.low %v2323_v57, %v2339_v58  ;;  %v2380_v31 = vcombine.high %v2323_v57, %v2339_v58 }
 0x238   :  { %8914 = vst [vmem:[#allocation62_spill] sm:$0xff] %v6656_v45  ;;  %v2371_v8 = vrot.slane %v2363_v17, %v5079_v13  ;;  %v2378_v10 = vrot.slane %v2364_v2, %v5079_v13  ;;  %8915 = vst [vmem:[#allocation66_spill] sm:$0xff] %v6662_v14  ;;  %v6666_v11 = vcombine.low %v6176_v59, %v6222_v16  ;;  %v8917_v2 = vld [vmem:[#allocation63_spill] sm:$0xff] }
 0x239   :  { %2977 = vperm.xlu0 %4982, %v6640_v18   ;;  %2908 = vperm.xlu1 %4983, %v6648_v43   ;;  %v2395_v18 = vcombine.low %v2330_v53, %v2346_v50  ;;  %v1542_v48 = vpop.permute.xlu1 %1541  ;;  %v2396_v46 = vcombine.high %v2330_v53, %v2346_v50  ;;  %v8918_v17 = vld [vmem:[#allocation31_spill] sm:$0xff]  ;;  %v6687_v50 = vcombine.low %v6278_v6, %v6244_v52  ;;  %v8924_v6 = vld [vmem:[#allocation64_spill] sm:$0xff] }
 0x23a   :  { %8916 = vst [vmem:[#allocation112_spill] sm:$0xff] %v6666_v11  ;;  %v2411_v30 = vcombine.low %v2355_v21, %v2371_v8  ;;  %v2412_v35 = vcombine.high %v2355_v21, %v2371_v8  ;;  %v2427_v43 = vcombine.low %v2362_v0, %v2378_v10  ;;  %v2428_v33 = vcombine.high %v2362_v0, %v2378_v10  ;;  %v6683_v0 = vpop.permute.xlu0 %2797 }
 0x23b   :  { %v6672_v58 = vcombine.high %v8918_v17, %v8917_v2  ;;  %8920 = vst [vmem:[#allocation31_spill] sm:$0xff] %v6683_v0  ;;  %8921 = vst [vmem:[#allocation113_spill] sm:$0xff] %v6687_v50  ;;  %v6690_v53 = vrot.slane %v2379_v54, %v5084_v25  ;;  %v6697_v8 = vrot.slane %v2380_v31, %v5084_v25  ;;  %v8925_v54 = vld [vmem:[#allocation68_spill] sm:$0xff]  ;;  %v8930_v17 = vld [vmem:[#allocation23_spill] sm:$0xff] }
 0x23c   :  { %v6675_v57 = vrot.slane %v2411_v30, %v5084_v25  ;;  %v6678_v14 = vrot.slane %v2412_v35, %v5084_v25  ;;  %v6681_v59 = vrot.slane %v2427_v43, %v5084_v25  ;;  %v6693_v21 = vrot.slane %v2428_v33, %v5084_v25  ;;  %v8934_v0 = vld [vmem:[#allocation38_spill] sm:$0xff] }
 0x23d   :  { %3914 = vperm.xlu0 %4982, %v6656_v45   ;;  %2914 = vperm.xlu1 %4983, %v6666_v11   ;;  %8919 = vst [vmem:[#allocation63_spill] sm:$0xff] %v6672_v58  ;;  %v1546_v16 = vpop.permute.xlu1 %1545  ;;  %v6700_v43 = vrot.slane %v2395_v18, %v5084_v25  ;;  %v6704_v10 = vrot.slane %v2396_v46, %v5084_v25 }
 0x23e   :  { %v6708_v52 = vcombine.low %v6690_v53, %v6675_v57  ;;  %v6712_v30 = vcombine.high %v8925_v54, %v8924_v6  ;;  %v6716_v31 = vcombine.low %v6697_v8, %v6678_v14  ;;  %v2467_v35 = vcombine.low %v1542_v48, %v1546_v16  ;;  %v6722_v2 = vpop.permute.xlu0 %2803  ;;  %v8933_v54 = vld [vmem:[#allocation17_spill] sm:$0xff] }
 0x23f   :  { %8922 = vst [vmem:[#allocation114_spill] sm:$0xff] %v6704_v10  ;;  %v6720_v18 = vcombine.low %v6700_v43, %v6681_v59  ;;  %v2468_v33 = vcombine.high %v1542_v48, %v1546_v16  ;;  %8929 = vst [vmem:[#allocation117_spill] sm:$0xff] %v6722_v2  ;;  %v6730_v6 = vcombine.low %v6704_v10, %v6693_v21  ;;  %v8935_v16 = vld [vmem:[#allocation67_spill] sm:$0xff] }
 0x240   :  { %8923 = vst [vmem:[#allocation115_spill] sm:$0xff] %v6708_v52  ;;  %8926 = vst [vmem:[#allocation64_spill] sm:$0xff] %v6712_v30  ;;  %v2451_v45 = vcombine.low %v8934_v0, %v8933_v54  ;;  %v2483_v48 = vcombine.low %v6420_v5, %v6495_v1 }
 0x241   :  { %3923 = vperm.xlu0 %4982, %v6672_v58   ;;  %2920 = vperm.xlu1 %4983, %v6687_v50   ;;  %8927 = vst [vmem:[#allocation68_spill] sm:$0xff] %v6716_v31  ;;  %8928 = vst [vmem:[#allocation116_spill] sm:$0xff] %v6720_v18  ;;  %v1550_v46 = vpop.permute.xlu1 %1549  ;;  %v6726_v58 = vcombine.low %v8930_v17, %v6303_v27  ;;  %v2452_v18 = vcombine.high %v8934_v0, %v8933_v54  ;;  %v8936_v17 = vld [vmem:[#allocation69_spill] sm:$0xff]  ;;  %v8939_v0 = vld [vmem:[#allocation15_spill] sm:$0xff] }
 0x242   :  { %8932 = vst [vmem:[#allocation118_spill] sm:$0xff] %v6730_v6  ;;  %v2484_v27 = vcombine.high %v6420_v5, %v6495_v1  ;;  %v6744_v2 = vcombine.high %v8936_v17, %v8935_v16  ;;  %v2482_v6 = vrot.slane %v2468_v33, %v5079_v13  ;;  %v6748_v52 = vpop.permute.xlu0 %2809  ;;  %v8940_v54 = vld [vmem:[#allocation47_spill] sm:$0xff]  ;;  %v2459_v5 = vrot.slane %v2451_v45, %v5079_v13 }
 0x243   :  { %8931 = vst [vmem:[#allocation23_spill] sm:$0xff] %v6726_v58  ;;  %8938 = vst [vmem:[#allocation38_spill] sm:$0xff] %v6748_v52  ;;  %v2466_v1 = vrot.slane %v2452_v18, %v5079_v13  ;;  %v8943_v16 = vld [vmem:[#allocation79_spill] sm:$0xff]  ;;  %v2491_v17 = vrot.slane %v2483_v48, %v5079_v13  ;;  %v6770_v18 = vcombine.low %v6344_v49, %v6387_v9 }
 0x244   :  { %8937 = vst [vmem:[#allocation17_spill] sm:$0xff] %v6744_v2  ;;  %v2498_v52 = vrot.slane %v2484_v27, %v5079_v13 }
 0x245   :  { %3929 = vperm.xlu0 %4982, %v6712_v30   ;;  %2926 = vperm.xlu1 %4983, %v6726_v58   ;;  %v2475_v30 = vrot.slane %v2467_v35, %v5079_v13  ;;  %v1554_v31 = vpop.permute.xlu1 %1553  ;;  %v6752_v58 = vcombine.low %v8940_v54, %v8939_v0  ;;  %v8942_v35 = vld [vmem:[#allocation76_spill] sm:$0xff]  ;;  %v2532_v27 = vcombine.high %v2466_v1, %v2482_v6 }
 0x246   :  { %v2499_v50 = vcombine.low %v1550_v46, %v1554_v31  ;;  %v2500_v11 = vcombine.high %v1550_v46, %v1554_v31  ;;  %v6760_v33 = vcombine.high %v8943_v16, %v8942_v35  ;;  %v6766_v10 = vpop.permute.xlu0 %2815 }
 0x247   :  { %8941 = vst [vmem:[#allocation67_spill] sm:$0xff] %v6752_v58  ;;  %v2515_v46 = vcombine.low %v2459_v5, %v2475_v30  ;;  %v2516_v54 = vcombine.high %v2459_v5, %v2475_v30  ;;  %8945 = vst [vmem:[#allocation15_spill] sm:$0xff] %v6766_v10 }
 0x248   :  { %8944 = vst [vmem:[#allocation69_spill] sm:$0xff] %v6760_v33  ;;  %v2507_v0 = vrot.slane %v2499_v50, %v5079_v13  ;;  %v2514_v31 = vrot.slane %v2500_v11, %v5079_v13  ;;  %v8946_v11 = vld [vmem:[#allocation77_spill] sm:$0xff]  ;;  %v8947_v50 = vld [vmem:[#allocation80_spill] sm:$0xff] }
 0x249   :  { %3935 = vperm.xlu0 %4982, %v6744_v2   ;;  %2932 = vperm.xlu1 %4983, %v6752_v58   ;;  %v2531_v2 = vcombine.low %v2466_v1, %v2482_v6  ;;  %v1558_v45 = vpop.permute.xlu1 %1557  ;;  %v6776_v30 = vcombine.high %v8947_v50, %v8946_v11  ;;  %v6791_v6 = vcombine.low %v6371_v28, %v6411_v4  ;;  %v8951_v4 = vld [vmem:[#allocation9_spill] sm:$0xff] }
 0x24a   :  { %v2547_v35 = vcombine.low %v2491_v17, %v2507_v0  ;;  %v2548_v16 = vcombine.high %v2491_v17, %v2507_v0  ;;  %v2563_v58 = vcombine.low %v2498_v52, %v2514_v31  ;;  %v2564_v48 = vcombine.high %v2498_v52, %v2514_v31  ;;  %v6787_v52 = vpop.permute.xlu0 %2821 }
 0x24b   :  { %8948 = vst [vmem:[#allocation47_spill] sm:$0xff] %v6776_v30  ;;  %8949 = vst [vmem:[#allocation76_spill] sm:$0xff] %v6787_v52  ;;  %v6794_v1 = vrot.slane %v2515_v46, %v5084_v25  ;;  %v6801_v0 = vrot.slane %v2516_v54, %v5084_v25  ;;  %v6808_v31 = vrot.slane %v2532_v27, %v5084_v25  ;;  %v8952_v46 = vld [vmem:[#allocation51_spill] sm:$0xff] }
 0x24c   :  { %v6779_v5 = vrot.slane %v2547_v35, %v5084_v25  ;;  %v6782_v10 = vrot.slane %v2548_v16, %v5084_v25  ;;  %v6785_v49 = vrot.slane %v2563_v58, %v5084_v25  ;;  %v6797_v17 = vrot.slane %v2564_v48, %v5084_v25 }
 0x24d   :  { %3941 = vperm.xlu0 %4982, %v6760_v33   ;;  %2938 = vperm.xlu1 %4983, %v6770_v18   ;;  %v1562_v9 = vpop.permute.xlu1 %1561  ;;  %v6804_v58 = vrot.slane %v2531_v2, %v5084_v25  ;;  %v6816_v35 = vcombine.high %v8952_v46, %v8951_v4  ;;  %v6830_v50 = vcombine.low %v6483_v63, %v6457_v56  ;;  %v8959_v46 = vld [vmem:[#allocation41_spill] sm:$0xff]  ;;  %v8960_v63 = vld [vmem:[#allocation78_spill] sm:$0xff] }
 0x24e   :  { %v6812_v28 = vcombine.low %v6794_v1, %v6779_v5  ;;  %v6820_v54 = vcombine.low %v6801_v0, %v6782_v10  ;;  %v2603_v16 = vcombine.low %v1558_v45, %v1562_v9  ;;  %v2604_v48 = vcombine.high %v1558_v45, %v1562_v9  ;;  %v6826_v11 = vpop.permute.xlu0 %2827  ;;  %v8961_v9 = vld [vmem:[#allocation81_spill] sm:$0xff] }
 0x24f   :  { %8953 = vst [vmem:[#allocation77_spill] sm:$0xff] %v6816_v35  ;;  %v6824_v2 = vcombine.low %v6804_v58, %v6785_v49  ;;  %8956 = vst [vmem:[#allocation51_spill] sm:$0xff] %v6826_v11  ;;  %v6834_v4 = vcombine.low %v6808_v31, %v6797_v17  ;;  %v2588_v33 = vcombine.high %v8959_v46, %v6546_v23 }
 0x250   :  { %8950 = vst [vmem:[#allocation79_spill] sm:$0xff] %v6812_v28  ;;  %8954 = vst [vmem:[#allocation80_spill] sm:$0xff] %v6820_v54  ;;  %v2619_v45 = vcombine.low %v6595_v15, %v6642_v47  ;;  %v2620_v56 = vcombine.high %v6595_v15, %v6642_v47  ;;  %v6848_v11 = vcombine.high %v8961_v9, %v8960_v63  ;;  %v8966_v63 = vld [vmem:[#allocation90_spill] sm:$0xff] }
 0x251   :  { %3947 = vperm.xlu0 %4982, %v6776_v30   ;;  %2944 = vperm.xlu1 %4983, %v6791_v6   ;;  %8955 = vst [vmem:[#allocation9_spill] sm:$0xff] %v6824_v2  ;;  %v1566_v27 = vpop.permute.xlu1 %1565  ;;  %8957 = vst [vmem:[#allocation119_spill] sm:$0xff] %v6830_v50  ;;  %v2587_v30 = vcombine.low %v8959_v46, %v6546_v23  ;;  %v2618_v52 = vrot.slane %v2604_v48, %v5079_v13  ;;  %v8965_v48 = vld [vmem:[#allocation10_spill] sm:$0xff] }
 0x252   :  { %8958 = vst [vmem:[#allocation120_spill] sm:$0xff] %v6834_v4  ;;  %8962 = vst [vmem:[#allocation41_spill] sm:$0xff] %v6848_v11  ;;  %v6852_v2 = vpop.permute.xlu0 %2833  ;;  %v6856_v23 = vcombine.low %v6489_v19, %v6499_v26  ;;  %v2602_v47 = vrot.slane %v2588_v33, %v5079_v13  ;;  %v6868_v9 = vcombine.high %v8966_v63, %v8965_v48 }
 0x253   :  { %8963 = vst [vmem:[#allocation78_spill] sm:$0xff] %v6852_v2  ;;  %v2595_v15 = vrot.slane %v2587_v30, %v5079_v13  ;;  %v2627_v19 = vrot.slane %v2619_v45, %v5079_v13  ;;  %v2634_v26 = vrot.slane %v2620_v56, %v5079_v13  ;;  %v8968_v45 = vld [vmem:[#allocation13_spill] sm:$0xff]  ;;  %v8969_v56 = vld [vmem:[#allocation91_spill] sm:$0xff] }
 0x254   :  { %8964 = vst [vmem:[#allocation81_spill] sm:$0xff] %v6856_v23  ;;  %8967 = vst [vmem:[#allocation10_spill] sm:$0xff] %v6868_v9  ;;  %v2668_v2 = vcombine.high %v2602_v47, %v2618_v52  ;;  %v6880_v48 = vcombine.high %v8969_v56, %v8968_v45  ;;  %v8628_v56 = vmov 1  }
 0x255   :  { %3953 = vperm.xlu0 %4982, %v6816_v35   ;;  %2950 = vperm.xlu1 %4983, %v6830_v50   ;;  %v2611_v35 = vrot.slane %v2603_v16, %v5079_v13  ;;  %v1570_v4 = vpop.permute.xlu1 %1569  ;;  %v6864_v16 = vcombine.low %v6524_v24, %v6540_v61 }
 0x256   :  { %v2635_v46 = vcombine.low %v1566_v27, %v1570_v4  ;;  %v2636_v54 = vcombine.high %v1566_v27, %v1570_v4  ;;  %v6874_v28 = vpop.permute.xlu0 %2839  ;;  %8970 = vst [vmem:[#allocation90_spill] sm:$0xff] %v6880_v48 }
 0x257   :  { %v2651_v4 = vcombine.low %v2595_v15, %v2611_v35  ;;  %v2652_v33 = vcombine.high %v2595_v15, %v2611_v35  ;;  %v6898_v15 = vcombine.low %v6587_v7, %v6556_v22 }
 0x258   :  { %v2643_v27 = vrot.slane %v2635_v46, %v5079_v13  ;;  %v2650_v30 = vrot.slane %v2636_v54, %v5079_v13 }
 0x259   :  { %3959 = vperm.xlu0 %4982, %v6848_v11   ;;  %2956 = vperm.xlu1 %4983, %v6856_v23   ;;  %v2667_v11 = vcombine.low %v2602_v47, %v2618_v52  ;;  %v6901_v47 = vrot.slane %v2651_v4, %v5084_v25  ;;  %v6904_v63 = vrot.slane %v2652_v33, %v5084_v25  ;;  %v8978_v4 = vld [vmem:[#allocation88_spill] sm:$0xff] }
 0x25a   :  { %v2683_v24 = vcombine.low %v2627_v19, %v2643_v27  ;;  %v2684_v61 = vcombine.high %v2627_v19, %v2643_v27  ;;  %v2699_v23 = vcombine.low %v2634_v26, %v2650_v30  ;;  %v2700_v50 = vcombine.high %v2634_v26, %v2650_v30  ;;  %v6894_v46 = vpop.permute.xlu0 %2845  ;;  %v8975_v26 = vld [vmem:[#allocation11_spill] sm:$0xff]  ;;  %v8979_v33 = vld [vmem:[#allocation92_spill] sm:$0xff] }
 0x25b   :  { %v6907_v19 = vrot.slane %v2667_v11, %v5084_v25  ;;  %v8974_v11 = vld [vmem:[#allocation87_spill] sm:$0xff]  ;;  %v6938_v30 = vcombine.low %v6627_v39, %v6611_v20  ;;  %v6955_v20 = vcombine.high %v6435_v60, %v6414_v32  ;;  %v8985_v32 = vld [vmem:[#allocation37_spill] sm:$0xff]  ;;  %v6975_v60 = vcombine.high %v6447_v41, %v6427_v62  ;;  %v8989_v62 = vld [vmem:[#allocation40_spill] sm:$0xff] }
 0x25c   :  { %v6883_v13 = vrot.slane %v2683_v24, %v5084_v25  ;;  %v6886_v35 = vrot.slane %v2684_v61, %v5084_v25  ;;  %v6889_v52 = vrot.slane %v2699_v23, %v5084_v25  ;;  %v6892_v54 = vrot.slane %v2700_v50, %v5084_v25 }
 0x25d   :  { %3965 = vperm.xlu0 %4982, %v6868_v9   ;;  %2962 = vperm.xlu1 %4983, %v6864_v16   ;;  %v6911_v50 = vrot.slane %v2668_v2, %v5084_v25  ;;  %v6928_v27 = vcombine.high %v8975_v26, %v8974_v11  ;;  %v6944_v24 = vcombine.high %v8979_v33, %v8978_v4  ;;  %v8981_v11 = vld [vmem:[#allocation35_spill] sm:$0xff]  ;;  %v8983_v4 = vld [vmem:[#allocation29_spill] sm:$0xff]  ;;  %v9038_v9 = vmov 1  }
 0x25e   :  { %v6916_v22 = vcombine.low %v6901_v47, %v6883_v13  ;;  %v6920_v7 = vcombine.low %v6904_v63, %v6886_v35  ;;  %v6924_v23 = vcombine.low %v6907_v19, %v6889_v52  ;;  %v6934_v2 = vpop.permute.xlu0 %2851  ;;  %v6948_v45 = vpop.permute.xlu1 %2791  ;;  %8982 = vst [vmem:[#allocation92_spill] sm:$0xff] %v6955_v20  ;;  %v6965_v33 = vcombine.high %v6438_v55, %v6417_v51  ;;  %v8987_v51 = vld [vmem:[#allocation39_spill] sm:$0xff] }
 0x25f   :  { %8976 = vst [vmem:[#allocation87_spill] sm:$0xff] %v6928_v27  ;;  %v6932_v25 = vcombine.low %v6911_v50, %v6892_v54  ;;  %8980 = vst [vmem:[#allocation88_spill] sm:$0xff] %v6944_v24  ;;  %v6985_v55 = vcombine.high %v6468_v38, %v6450_v12  ;;  %v6995_v41 = vcombine.high %v6575_v36, %v6559_v42  ;;  %v8991_v12 = vld [vmem:[#allocation42_spill] sm:$0xff] }
 0x260   :  { %8971 = vst [vmem:[#allocation13_spill] sm:$0xff] %v6916_v22  ;;  %8972 = vst [vmem:[#allocation91_spill] sm:$0xff] %v6920_v7  ;;  %v7005_v38 = vcombine.high %v6578_v34, %v6562_v29  ;;  %v8993_v42 = vld [vmem:[#allocation14_spill] sm:$0xff]  ;;  %v7015_v36 = vcombine.high %v6590_v40, %v6565_v44  ;;  %v8995_v29 = vld [vmem:[#allocation48_spill] sm:$0xff]  ;;  %v7025_v34 = vcombine.high %v6593_v3, %v6568_v37 }
 0x261   :  { %3971 = vperm.xlu0 %4982, %v6880_v48   ;;  %2968 = vperm.xlu1 %4983, %v6898_v15   ;;  %8973 = vst [vmem:[#allocation121_spill] sm:$0xff] %v6924_v23  ;;  %8977 = vst [vmem:[#allocation11_spill] sm:$0xff] %v6932_v25  ;;  %v8997_v44 = vld [vmem:[#allocation12_spill] sm:$0xff]  ;;  %v7035_v40 = vcombine.high %v6690_v53, %v6675_v57  ;;  %v8999_v37 = vld [vmem:[#allocation30_spill] sm:$0xff]  ;;  %v7045_v3 = vcombine.high %v6697_v8, %v6678_v14 }
 0x262   :  { %v6946_v61 = vpop.permute.xlu0 %2857  ;;  %v6959_v26 = vpop.permute.xlu1 %2794  ;;  %8984 = vst [vmem:[#allocation35_spill] sm:$0xff] %v6965_v33  ;;  %8986 = vst [vmem:[#allocation29_spill] sm:$0xff] %v6975_v60  ;;  %v9002_v57 = vld [vmem:[#allocation53_spill] sm:$0xff]  ;;  %v7055_v53 = vcombine.high %v6700_v43, %v6681_v59  ;;  %v9005_v14 = vld [vmem:[#allocation54_spill] sm:$0xff]  ;;  %v7075_v43 = vcombine.high %v6794_v1, %v6779_v5  ;;  %v7095_v1 = vcombine.high %v6804_v58, %v6785_v49 }
 0x263   :  { %8988 = vst [vmem:[#allocation37_spill] sm:$0xff] %v6985_v55  ;;  %8990 = vst [vmem:[#allocation39_spill] sm:$0xff] %v6995_v41  ;;  %v9006_v8 = vld [vmem:[#allocation114_spill] sm:$0xff]  ;;  %v9009_v59 = vld [vmem:[#allocation55_spill] sm:$0xff]  ;;  %v7115_v58 = vcombine.high %v6901_v47, %v6883_v13  ;;  %v7135_v47 = vcombine.high %v6907_v19, %v6889_v52 }
 0x264   :  { %8992 = vst [vmem:[#allocation40_spill] sm:$0xff] %v7005_v38  ;;  %8994 = vst [vmem:[#allocation42_spill] sm:$0xff] %v7015_v36  ;;  %v9015_v5 = vld [vmem:[#allocation57_spill] sm:$0xff]  ;;  %v9027_v13 = vld [vmem:[#allocation75_spill] sm:$0xff] }
 0x265   :  { %3977 = vperm.xlu0 %4982, %v6928_v27   ;;  %2974 = vperm.xlu1 %4983, %v6938_v30   ;;  %8996 = vst [vmem:[#allocation14_spill] sm:$0xff] %v7025_v34  ;;  %8998 = vst [vmem:[#allocation48_spill] sm:$0xff] %v7035_v40  ;;  %v9021_v49 = vld [vmem:[#allocation65_spill] sm:$0xff]  ;;  %v9035_v52 = vld [vmem:[#allocation32_spill] sm:$0xff] }
 0x266   :  { %v6957_v39 = vpop.permute.xlu0 %2863  ;;  %9000 = vst [vmem:[#allocation12_spill] sm:$0xff] %v7045_v3  ;;  %9003 = vst [vmem:[#allocation53_spill] sm:$0xff] %v7055_v53 }
 0x267   :  { %9010 = vst [vmem:[#allocation55_spill] sm:$0xff] %v7075_v43  ;;  %9016 = vst [vmem:[#allocation57_spill] sm:$0xff] %v7095_v1 }
 0x268   :  { %9022 = vst [vmem:[#allocation65_spill] sm:$0xff] %v7115_v58  ;;  %9028 = vst [vmem:[#allocation75_spill] sm:$0xff] %v7135_v47 }
 0x269   :  { %3983 = vperm.xlu0 %4982, %v6944_v24   ;;  %4984 = vset.pattern.permute.xlu1 %v8628_v56  ;;  %v6969_v56 = vpop.permute.xlu1 %2800 }
 0x26a   :  { %3323 = vperm.xlu1 %4984, %v8981_v11   ;;  %v6967_v24 = vpop.permute.xlu0 %2869 }
 0x26d   :  { %3989 = vperm.xlu0 %4982, %v6955_v20   ;;  %v6979_v20 = vpop.permute.xlu1 %2806 }
 0x26e   :  { %3329 = vperm.xlu1 %4984, %v8983_v4   ;;  %v6977_v11 = vpop.permute.xlu0 %2875 }
 0x271   :  { %3995 = vperm.xlu0 %4982, %v6965_v33   ;;  %v6989_v33 = vpop.permute.xlu1 %2812 }
 0x272   :  { %3332 = vperm.xlu1 %4984, %v8985_v32   ;;  %v6987_v4 = vpop.permute.xlu0 %2881 }
 0x275   :  { %4001 = vperm.xlu0 %4982, %v6975_v60   ;;  %v6999_v60 = vpop.permute.xlu1 %2818 }
 0x276   :  { %3338 = vperm.xlu1 %4984, %v8987_v51   ;;  %v6997_v32 = vpop.permute.xlu0 %2887 }
 0x279   :  { %4007 = vperm.xlu0 %4982, %v6985_v55   ;;  %v7009_v55 = vpop.permute.xlu1 %2824 }
 0x27a   :  { %3344 = vperm.xlu1 %4984, %v8989_v62   ;;  %v7007_v51 = vpop.permute.xlu0 %2893 }
 0x27d   :  { %4013 = vperm.xlu0 %4982, %v6995_v41   ;;  %v7019_v41 = vpop.permute.xlu1 %2830 }
 0x27e   :  { %3350 = vperm.xlu1 %4984, %v8991_v12   ;;  %v7017_v62 = vpop.permute.xlu0 %2899 }
 0x281   :  { %4019 = vperm.xlu0 %4982, %v7005_v38   ;;  %v7029_v38 = vpop.permute.xlu1 %2836 }
 0x282   :  { %3356 = vperm.xlu1 %4984, %v8993_v42   ;;  %v7027_v12 = vpop.permute.xlu0 %2905 }
 0x285   :  { %4025 = vperm.xlu0 %4982, %v7015_v36   ;;  %v7039_v36 = vpop.permute.xlu1 %2842 }
 0x286   :  { %3362 = vperm.xlu1 %4984, %v8995_v29   ;;  %v7037_v42 = vpop.permute.xlu0 %2911 }
 0x289   :  { %4031 = vperm.xlu0 %4982, %v7025_v34  }
 0x28a   :  { %3368 = vperm.xlu1 %4984, %v8997_v44   ;;  %v7047_v29 = vpop.permute.xlu0 %2917  ;;  %v7049_v34 = vpop.permute.xlu1 %2848 }
 0x28b   :  { %9001 = vst [vmem:[#allocation30_spill] sm:$0xff] %v7047_v29  ;;  %v9142_v29 = vld [vmem:[#allocation119_spill] sm:$0xff] }
 0x28d   :  { %4037 = vperm.xlu0 %4982, %v7035_v40  }
 0x28e   :  { %3374 = vperm.xlu1 %4984, %v8999_v37   ;;  %v7065_v37 = vcombine.high %v9006_v8, %v6693_v21  ;;  %v9012_v21 = vld [vmem:[#allocation16_spill] sm:$0xff] }
 0x28f   :  { %v7057_v44 = vpop.permute.xlu0 %2923 }
 0x290   :  { %9004 = vst [vmem:[#allocation122_spill] sm:$0xff] %v7057_v44  ;;  %v7059_v40 = vpop.permute.xlu1 %2854  ;;  %9007 = vst [vmem:[#allocation54_spill] sm:$0xff] %v7065_v37  ;;  %v9132_v44 = vld [vmem:[#allocation67_spill] sm:$0xff] }
 0x291   :  { %4043 = vperm.xlu0 %4982, %v7045_v3  }
 0x292   :  { %3380 = vperm.xlu1 %4984, %v9002_v57  }
 0x295   :  { %4049 = vperm.xlu0 %4982, %v7055_v53   ;;  %v7067_v27 = vpop.permute.xlu0 %2929  ;;  %v7069_v3 = vpop.permute.xlu1 %2860 }
 0x296   :  { %3386 = vperm.xlu1 %4984, %v9005_v14   ;;  %9008 = vst [vmem:[#allocation114_spill] sm:$0xff] %v7067_v27  ;;  %v7085_v14 = vcombine.high %v6801_v0, %v6782_v10  ;;  %v9018_v10 = vld [vmem:[#allocation59_spill] sm:$0xff]  ;;  %v7105_v0 = vcombine.high %v6808_v31, %v6797_v17  ;;  %v9024_v17 = vld [vmem:[#allocation74_spill] sm:$0xff]  ;;  %v7125_v31 = vcombine.high %v6904_v63, %v6886_v35  ;;  %v9120_v27 = vld [vmem:[#allocation112_spill] sm:$0xff] }
 0x297   :  { %v9031_v35 = vld [vmem:[#allocation82_spill] sm:$0xff]  ;;  %v7145_v63 = vcombine.high %v6911_v50, %v6892_v54 }
 0x298   :  { %9013 = vst [vmem:[#allocation16_spill] sm:$0xff] %v7085_v14  ;;  %9019 = vst [vmem:[#allocation59_spill] sm:$0xff] %v7105_v0 }
 0x299   :  { %4055 = vperm.xlu0 %4982, %v7065_v37   ;;  %v7077_v57 = vpop.permute.xlu0 %2935  ;;  %9025 = vst [vmem:[#allocation74_spill] sm:$0xff] %v7125_v31  ;;  %9032 = vst [vmem:[#allocation82_spill] sm:$0xff] %v7145_v63 }
 0x29a   :  { %3392 = vperm.xlu1 %4984, %v9009_v59   ;;  %9011 = vst [vmem:[#allocation123_spill] sm:$0xff] %v7077_v57  ;;  %v7079_v53 = vpop.permute.xlu1 %2866  ;;  %v9108_v57 = vld [vmem:[#allocation106_spill] sm:$0xff] }
 0x29d   :  { %4061 = vperm.xlu0 %4982, %v7075_v43   ;;  %v7087_v8 = vpop.permute.xlu0 %2941  ;;  %v9044_v43 = vld [vmem:[#allocation21_spill] sm:$0xff] }
 0x29e   :  { %3398 = vperm.xlu1 %4984, %v9012_v21   ;;  %9014 = vst [vmem:[#allocation124_spill] sm:$0xff] %v7087_v8  ;;  %v7089_v37 = vpop.permute.xlu1 %2872 }
 0x2a1   :  { %4067 = vperm.xlu0 %4982, %v7085_v14   ;;  %v7097_v59 = vpop.permute.xlu0 %2947 }
 0x2a2   :  { %3404 = vperm.xlu1 %4984, %v9015_v5   ;;  %9017 = vst [vmem:[#allocation125_spill] sm:$0xff] %v7097_v59  ;;  %v7099_v48 = vpop.permute.xlu1 %2878 }
 0x2a5   :  { %4073 = vperm.xlu0 %4982, %v7095_v1  }
 0x2a6   :  { %3410 = vperm.xlu1 %4984, %v9018_v10  }
 0x2a7   :  { %v7107_v21 = vpop.permute.xlu0 %2953  ;;  %v7109_v14 = vpop.permute.xlu1 %2884 }
 0x2a8   :  { %9020 = vst [vmem:[#allocation126_spill] sm:$0xff] %v7107_v21 }
 0x2a9   :  { %4079 = vperm.xlu0 %4982, %v7105_v0  }
 0x2aa   :  { %3416 = vperm.xlu1 %4984, %v9021_v49  }
 0x2ab   :  { %v7117_v5 = vpop.permute.xlu0 %2959 }
 0x2ac   :  { %9023 = vst [vmem:[#allocation127_spill] sm:$0xff] %v7117_v5  ;;  %v7119_v1 = vpop.permute.xlu1 %2890  ;;  %v9100_v5 = vld [vmem:[#allocation34_spill] sm:$0xff] }
 0x2ad   :  { %4085 = vperm.xlu0 %4982, %v7115_v58  }
 0x2ae   :  { %3422 = vperm.xlu1 %4984, %v9024_v17  }
 0x2af   :  { %v7127_v10 = vpop.permute.xlu0 %2965 }
 0x2b0   :  { %9026 = vst [vmem:[#allocation128_spill] sm:$0xff] %v7127_v10  ;;  %v7129_v0 = vpop.permute.xlu1 %2896 }
 0x2b1   :  { %4091 = vperm.xlu0 %4982, %v7125_v31  }
 0x2b2   :  { %3428 = vperm.xlu1 %4984, %v9027_v13  }
 0x2b4   :  { %v7137_v49 = vpop.permute.xlu0 %2971  ;;  %v7139_v58 = vpop.permute.xlu1 %2902 }
 0x2b5   :  { %9029 = vst [vmem:[#allocation129_spill] sm:$0xff] %v7137_v49  ;;  %9030 = vst [vmem:[#allocation130_spill] sm:$0xff] %v7139_v58  ;;  %4097 = vperm.xlu0 %4982, %v7135_v47   ;;  %v9039_v47 = vld [vmem:[#allocation26_spill] sm:$0xff]  ;;  %v9048_v49 = vld [vmem:[#allocation95_spill] sm:$0xff] }
 0x2b6   :  { %3434 = vperm.xlu1 %4984, %v9031_v35   ;;  %v9040_v35 = vld [vmem:[#allocation28_spill] sm:$0xff] }
 0x2b8   :  { %v7147_v17 = vpop.permute.xlu0 %2977  ;;  %v7149_v31 = vpop.permute.xlu1 %2908 }
 0x2b9   :  { %9033 = vst [vmem:[#allocation131_spill] sm:$0xff] %v7147_v17  ;;  %9034 = vst [vmem:[#allocation132_spill] sm:$0xff] %v7149_v31  ;;  %4103 = vperm.xlu0 %4982, %v7145_v63   ;;  %v9043_v17 = vld [vmem:[#allocation58_spill] sm:$0xff]  ;;  %v9146_v31 = vld [vmem:[#allocation81_spill] sm:$0xff] }
 0x2ba   :  { %3440 = vperm.xlu1 %4984, %v9035_v52  }
 0x2bc   :  { %v7153_v19 = vpop.permute.xlu0 %3914  ;;  %v7155_v13 = vpop.permute.xlu1 %2914 }
 0x2bd   :  { %9036 = vst [vmem:[#allocation32_spill] sm:$0xff] %v7153_v19  ;;  %9037 = vst [vmem:[#allocation133_spill] sm:$0xff] %v7155_v13  ;;  %4986 = vset.pattern.permute.xlu0 %v9038_v9  ;;  %v9047_v19 = vld [vmem:[#allocation60_spill] sm:$0xff]  ;;  %v9128_v13 = vld [vmem:[#allocation23_spill] sm:$0xff] }
 0x2be   :  { %3326 = vperm.xlu0 %4986, %v9039_v47   ;;  %3446 = vperm.xlu1 %4984, %v9040_v35   ;;  %v9051_v35 = vld [vmem:[#allocation61_spill] sm:$0xff] }
 0x2c0   :  { %v7160_v54 = vpop.permute.xlu0 %3923  ;;  %v7162_v50 = vpop.permute.xlu1 %2920 }
 0x2c1   :  { %9041 = vst [vmem:[#allocation26_spill] sm:$0xff] %v7160_v54  ;;  %9042 = vst [vmem:[#allocation28_spill] sm:$0xff] %v7162_v50  ;;  %v9052_v54 = vld [vmem:[#allocation33_spill] sm:$0xff] }
 0x2c2   :  { %3335 = vperm.xlu0 %4986, %v9043_v17   ;;  %3452 = vperm.xlu1 %4984, %v9044_v43   ;;  %v9055_v43 = vld [vmem:[#allocation43_spill] sm:$0xff] }
 0x2c4   :  { %v7166_v63 = vpop.permute.xlu0 %3929  ;;  %v7168_v52 = vpop.permute.xlu1 %2926 }
 0x2c5   :  { %9045 = vst [vmem:[#allocation58_spill] sm:$0xff] %v7166_v63  ;;  %9046 = vst [vmem:[#allocation21_spill] sm:$0xff] %v7168_v52  ;;  %v9056_v63 = vld [vmem:[#allocation52_spill] sm:$0xff] }
 0x2c6   :  { %3341 = vperm.xlu0 %4986, %v9047_v19   ;;  %3458 = vperm.xlu1 %4984, %v9048_v49   ;;  %v9059_v49 = vld [vmem:[#allocation44_spill] sm:$0xff] }
 0x2c8   :  { %v7172_v21 = vpop.permute.xlu0 %3935  ;;  %v7174_v47 = vpop.permute.xlu1 %2932 }
 0x2c9   :  { %9049 = vst [vmem:[#allocation60_spill] sm:$0xff] %v7172_v21  ;;  %9050 = vst [vmem:[#allocation95_spill] sm:$0xff] %v7174_v47  ;;  %v9060_v21 = vld [vmem:[#allocation27_spill] sm:$0xff]  ;;  %v9124_v47 = vld [vmem:[#allocation113_spill] sm:$0xff] }
 0x2ca   :  { %3347 = vperm.xlu0 %4986, %v9051_v35   ;;  %3464 = vperm.xlu1 %4984, %v9052_v54   ;;  %v9063_v54 = vld [vmem:[#allocation49_spill] sm:$0xff] }
 0x2cc   :  { %v7178_v10 = vpop.permute.xlu0 %3941  ;;  %v7180_v17 = vpop.permute.xlu1 %2938 }
 0x2cd   :  { %9053 = vst [vmem:[#allocation61_spill] sm:$0xff] %v7178_v10  ;;  %9054 = vst [vmem:[#allocation33_spill] sm:$0xff] %v7180_v17  ;;  %v9064_v10 = vld [vmem:[#allocation99_spill] sm:$0xff] }
 0x2ce   :  { %3353 = vperm.xlu0 %4986, %v9055_v43   ;;  %3470 = vperm.xlu1 %4984, %v9056_v63   ;;  %v9067_v63 = vld [vmem:[#allocation24_spill] sm:$0xff]  ;;  %v9116_v17 = vld [vmem:[#allocation111_spill] sm:$0xff] }
 0x2d0   :  { %v7184_v52 = vpop.permute.xlu0 %3947  ;;  %v7186_v19 = vpop.permute.xlu1 %2944 }
 0x2d1   :  { %9057 = vst [vmem:[#allocation43_spill] sm:$0xff] %v7184_v52  ;;  %9058 = vst [vmem:[#allocation52_spill] sm:$0xff] %v7186_v19  ;;  %v9068_v52 = vld [vmem:[#allocation20_spill] sm:$0xff] }
 0x2d2   :  { %3359 = vperm.xlu0 %4986, %v9059_v49   ;;  %3476 = vperm.xlu1 %4984, %v9060_v21   ;;  %v9071_v21 = vld [vmem:[#allocation19_spill] sm:$0xff] }
 0x2d4   :  { %v7190_v59 = vpop.permute.xlu0 %3953  ;;  %v7192_v35 = vpop.permute.xlu1 %2950 }
 0x2d5   :  { %9061 = vst [vmem:[#allocation44_spill] sm:$0xff] %v7190_v59  ;;  %9062 = vst [vmem:[#allocation27_spill] sm:$0xff] %v7192_v35  ;;  %v9072_v59 = vld [vmem:[#allocation104_spill] sm:$0xff] }
 0x2d6   :  { %3365 = vperm.xlu0 %4986, %v9063_v54   ;;  %3482 = vperm.xlu1 %4984, %v9064_v10   ;;  %v9075_v10 = vld [vmem:[#allocation89_spill] sm:$0xff] }
 0x2d8   :  { %v7196_v8 = vpop.permute.xlu0 %3959  ;;  %v7198_v43 = vpop.permute.xlu1 %2956 }
 0x2d9   :  { %9065 = vst [vmem:[#allocation49_spill] sm:$0xff] %v7196_v8  ;;  %9066 = vst [vmem:[#allocation99_spill] sm:$0xff] %v7198_v43  ;;  %v9076_v8 = vld [vmem:[#allocation105_spill] sm:$0xff]  ;;  %v9112_v43 = vld [vmem:[#allocation110_spill] sm:$0xff] }
 0x2da   :  { %3371 = vperm.xlu0 %4986, %v9067_v63   ;;  %3488 = vperm.xlu1 %4984, %v9068_v52   ;;  %v9079_v52 = vld [vmem:[#allocation50_spill] sm:$0xff] }
 0x2dc   :  { %v7202_v19 = vpop.permute.xlu0 %3965  ;;  %v7204_v49 = vpop.permute.xlu1 %2962 }
 0x2dd   :  { %9069 = vst [vmem:[#allocation24_spill] sm:$0xff] %v7202_v19  ;;  %9070 = vst [vmem:[#allocation20_spill] sm:$0xff] %v7204_v49  ;;  %v9080_v19 = vld [vmem:[#allocation107_spill] sm:$0xff] }
 0x2de   :  { %3377 = vperm.xlu0 %4986, %v9071_v21   ;;  %3494 = vperm.xlu1 %4984, %v9072_v59   ;;  %v9083_v59 = vld [vmem:[#allocation56_spill] sm:$0xff]  ;;  %v9104_v49 = vld [vmem:[#allocation103_spill] sm:$0xff] }
 0x2e0   :  { %v7208_v35 = vpop.permute.xlu0 %3971  ;;  %v7210_v54 = vpop.permute.xlu1 %2968 }
 0x2e1   :  { %9073 = vst [vmem:[#allocation19_spill] sm:$0xff] %v7208_v35  ;;  %9074 = vst [vmem:[#allocation104_spill] sm:$0xff] %v7210_v54  ;;  %v9084_v35 = vld [vmem:[#allocation36_spill] sm:$0xff] }
 0x2e2   :  { %3383 = vperm.xlu0 %4986, %v9075_v10   ;;  %3500 = vperm.xlu1 %4984, %v9076_v8   ;;  %v9087_v8 = vld [vmem:[#allocation22_spill] sm:$0xff] }
 0x2e4   :  { %v7214_v50 = vpop.permute.xlu0 %3977  ;;  %v7216_v63 = vpop.permute.xlu1 %2974 }
 0x2e5   :  { %9077 = vst [vmem:[#allocation89_spill] sm:$0xff] %v7214_v50  ;;  %9078 = vst [vmem:[#allocation105_spill] sm:$0xff] %v7216_v63  ;;  %v9088_v50 = vmov 0   ;;  %v9089_v63 = vld [vmem:[#allocation70_spill] sm:$0xff] }
 0x2e6   :  { %3389 = vperm.xlu0 %4986, %v9079_v52   ;;  %3506 = vperm.xlu1 %4984, %v9080_v19  }
 0x2e8   :  { %v7220_v58 = vpop.permute.xlu0 %3983 }
 0x2e9   :  { %9081 = vst [vmem:[#allocation50_spill] sm:$0xff] %v7220_v58  ;;  %v7222_v21 = vpop.permute.xlu1 %3323  ;;  %v9092_v58 = vld [vmem:[#allocation18_spill] sm:$0xff] }
 0x2ea   :  { %9082 = vst [vmem:[#allocation107_spill] sm:$0xff] %v7222_v21  ;;  %3395 = vperm.xlu0 %4986, %v9083_v59   ;;  %3512 = vperm.xlu1 %4984, %v9084_v35   ;;  %v9093_v21 = vld [vmem:[#allocation71_spill] sm:$0xff] }
 0x2ec   :  { %v7226_v54 = vpop.permute.xlu0 %3989 }
 0x2ed   :  { %9085 = vst [vmem:[#allocation56_spill] sm:$0xff] %v7226_v54  ;;  %v7228_v10 = vpop.permute.xlu1 %3329  ;;  %v9096_v54 = vld [vmem:[#allocation98_spill] sm:$0xff] }
 0x2ee   :  { %9086 = vst [vmem:[#allocation36_spill] sm:$0xff] %v7228_v10  ;;  %3401 = vperm.xlu0 %4986, %v9087_v8   ;;  %4985 = vset.pattern.permute.xlu1 %v9088_v50  ;;  %v9097_v10 = vld [vmem:[#allocation72_spill] sm:$0xff] }
 0x2ef   :  { %3917 = vperm.xlu1 %4985, %v9089_v63  }
 0x2f0   :  { %v7233_v52 = vpop.permute.xlu0 %3995 }
 0x2f1   :  { %9090 = vst [vmem:[#allocation22_spill] sm:$0xff] %v7233_v52  ;;  %v7235_v19 = vpop.permute.xlu1 %3332  ;;  %v9101_v52 = vld [vmem:[#allocation73_spill] sm:$0xff] }
 0x2f2   :  { %9091 = vst [vmem:[#allocation70_spill] sm:$0xff] %v7235_v19  ;;  %3407 = vperm.xlu0 %4986, %v9092_v58  }
 0x2f3   :  { %3920 = vperm.xlu1 %4985, %v9093_v21  }
 0x2f4   :  { %v7239_v59 = vpop.permute.xlu0 %4001 }
 0x2f5   :  { %9094 = vst [vmem:[#allocation18_spill] sm:$0xff] %v7239_v59  ;;  %v7241_v35 = vpop.permute.xlu1 %3338  ;;  %v9105_v59 = vld [vmem:[#allocation83_spill] sm:$0xff] }
 0x2f6   :  { %9095 = vst [vmem:[#allocation71_spill] sm:$0xff] %v7241_v35  ;;  %3413 = vperm.xlu0 %4986, %v9096_v54  }
 0x2f7   :  { %3926 = vperm.xlu1 %4985, %v9097_v10  }
 0x2f8   :  { %v7245_v8 = vpop.permute.xlu0 %4007 }
 0x2f9   :  { %9098 = vst [vmem:[#allocation98_spill] sm:$0xff] %v7245_v8  ;;  %v7247_v50 = vpop.permute.xlu1 %3344  ;;  %v9109_v8 = vld [vmem:[#allocation84_spill] sm:$0xff] }
 0x2fa   :  { %9099 = vst [vmem:[#allocation72_spill] sm:$0xff] %v7247_v50  ;;  %3419 = vperm.xlu0 %4986, %v9100_v5  }
 0x2fb   :  { %3932 = vperm.xlu1 %4985, %v9101_v52  }
 0x2fc   :  { %v7251_v19 = vpop.permute.xlu0 %4013 }
 0x2fd   :  { %9102 = vst [vmem:[#allocation34_spill] sm:$0xff] %v7251_v19  ;;  %v7253_v58 = vpop.permute.xlu1 %3350  ;;  %v9113_v19 = vld [vmem:[#allocation85_spill] sm:$0xff] }
 0x2fe   :  { %9103 = vst [vmem:[#allocation73_spill] sm:$0xff] %v7253_v58  ;;  %3425 = vperm.xlu0 %4986, %v9104_v49  }
 0x2ff   :  { %3938 = vperm.xlu1 %4985, %v9105_v59  }
 0x300   :  { %v7257_v35 = vpop.permute.xlu0 %4019 }
 0x301   :  { %9106 = vst [vmem:[#allocation103_spill] sm:$0xff] %v7257_v35  ;;  %v7259_v54 = vpop.permute.xlu1 %3356  ;;  %v9117_v35 = vld [vmem:[#allocation86_spill] sm:$0xff] }
 0x302   :  { %9107 = vst [vmem:[#allocation83_spill] sm:$0xff] %v7259_v54  ;;  %3431 = vperm.xlu0 %4986, %v9108_v57  }
 0x303   :  { %3944 = vperm.xlu1 %4985, %v9109_v8  }
 0x304   :  { %v7263_v50 = vpop.permute.xlu0 %4025 }
 0x305   :  { %9110 = vst [vmem:[#allocation106_spill] sm:$0xff] %v7263_v50  ;;  %v7265_v5 = vpop.permute.xlu1 %3362  ;;  %v9121_v50 = vld [vmem:[#allocation93_spill] sm:$0xff] }
 0x306   :  { %9111 = vst [vmem:[#allocation84_spill] sm:$0xff] %v7265_v5  ;;  %3437 = vperm.xlu0 %4986, %v9112_v43  }
 0x307   :  { %3950 = vperm.xlu1 %4985, %v9113_v19  }
 0x308   :  { %v7269_v58 = vpop.permute.xlu0 %4031 }
 0x309   :  { %9114 = vst [vmem:[#allocation110_spill] sm:$0xff] %v7269_v58  ;;  %v7271_v49 = vpop.permute.xlu1 %3368  ;;  %v9125_v58 = vld [vmem:[#allocation94_spill] sm:$0xff] }
 0x30a   :  { %9115 = vst [vmem:[#allocation85_spill] sm:$0xff] %v7271_v49  ;;  %3443 = vperm.xlu0 %4986, %v9116_v17  }
 0x30b   :  { %3956 = vperm.xlu1 %4985, %v9117_v35  }
 0x30c   :  { %v7275_v54 = vpop.permute.xlu0 %4037 }
 0x30d   :  { %9118 = vst [vmem:[#allocation111_spill] sm:$0xff] %v7275_v54  ;;  %v7277_v57 = vpop.permute.xlu1 %3374  ;;  %v9129_v54 = vld [vmem:[#allocation96_spill] sm:$0xff] }
 0x30e   :  { %9119 = vst [vmem:[#allocation86_spill] sm:$0xff] %v7277_v57  ;;  %3449 = vperm.xlu0 %4986, %v9120_v27  }
 0x30f   :  { %3962 = vperm.xlu1 %4985, %v9121_v50  }
 0x310   :  { %v7281_v5 = vpop.permute.xlu0 %4043 }
 0x311   :  { %9122 = vst [vmem:[#allocation112_spill] sm:$0xff] %v7281_v5  ;;  %v7283_v43 = vpop.permute.xlu1 %3380  ;;  %v9133_v5 = vld [vmem:[#allocation97_spill] sm:$0xff] }
 0x312   :  { %9123 = vst [vmem:[#allocation93_spill] sm:$0xff] %v7283_v43  ;;  %3455 = vperm.xlu0 %4986, %v9124_v47  }
 0x313   :  { %3968 = vperm.xlu1 %4985, %v9125_v58  }
 0x314   :  { %v7287_v49 = vpop.permute.xlu0 %4049 }
 0x315   :  { %9126 = vst [vmem:[#allocation113_spill] sm:$0xff] %v7287_v49  ;;  %v7289_v17 = vpop.permute.xlu1 %3386  ;;  %v9136_v49 = vld [vmem:[#allocation100_spill] sm:$0xff] }
 0x316   :  { %9127 = vst [vmem:[#allocation94_spill] sm:$0xff] %v7289_v17  ;;  %3461 = vperm.xlu0 %4986, %v9128_v13  }
 0x317   :  { %3974 = vperm.xlu1 %4985, %v9129_v54  }
 0x318   :  { %v7293_v57 = vpop.permute.xlu0 %4055 }
 0x319   :  { %9130 = vst [vmem:[#allocation23_spill] sm:$0xff] %v7293_v57  ;;  %v7295_v27 = vpop.permute.xlu1 %3392  ;;  %v9139_v57 = vld [vmem:[#allocation101_spill] sm:$0xff] }
 0x31a   :  { %9131 = vst [vmem:[#allocation96_spill] sm:$0xff] %v7295_v27  ;;  %3467 = vperm.xlu0 %4986, %v9132_v44  }
 0x31b   :  { %3980 = vperm.xlu1 %4985, %v9133_v5  }
 0x31c   :  { %v7299_v43 = vpop.permute.xlu0 %4061 }
 0x31d   :  { %9134 = vst [vmem:[#allocation67_spill] sm:$0xff] %v7299_v43  ;;  %v7301_v47 = vpop.permute.xlu1 %3398  ;;  %v9143_v43 = vld [vmem:[#allocation102_spill] sm:$0xff] }
 0x31e   :  { %9135 = vst [vmem:[#allocation97_spill] sm:$0xff] %v7301_v47  ;;  %3473 = vperm.xlu0 %4986, %v6770_v18  }
 0x31f   :  { %3986 = vperm.xlu1 %4985, %v9136_v49  }
 0x320   :  { %v7305_v17 = vpop.permute.xlu0 %4067 }
 0x321   :  { %9137 = vst [vmem:[#allocation100_spill] sm:$0xff] %v7305_v17  ;;  %v7307_v13 = vpop.permute.xlu1 %3404  ;;  %v9147_v17 = vld [vmem:[#allocation45_spill] sm:$0xff] }
 0x322   :  { %9138 = vst [vmem:[#allocation134_spill] sm:$0xff] %v7307_v13  ;;  %3479 = vperm.xlu0 %4986, %v6791_v6  }
 0x323   :  { %3992 = vperm.xlu1 %4985, %v9139_v57  }
 0x324   :  { %v7311_v27 = vpop.permute.xlu0 %4073 }
 0x325   :  { %9140 = vst [vmem:[#allocation101_spill] sm:$0xff] %v7311_v27  ;;  %v7313_v44 = vpop.permute.xlu1 %3410  ;;  %v9150_v27 = vld [vmem:[#allocation25_spill] sm:$0xff] }
 0x326   :  { %9141 = vst [vmem:[#allocation135_spill] sm:$0xff] %v7313_v44  ;;  %3485 = vperm.xlu0 %4986, %v9142_v29  }
 0x327   :  { %3998 = vperm.xlu1 %4985, %v9143_v43  }
 0x328   :  { %v7317_v47 = vpop.permute.xlu0 %4079 }
 0x329   :  { %9144 = vst [vmem:[#allocation119_spill] sm:$0xff] %v7317_v47  ;;  %v7319_v18 = vpop.permute.xlu1 %3416  ;;  %v9153_v47 = vld [vmem:[#allocation46_spill] sm:$0xff] }
 0x32a   :  { %9145 = vst [vmem:[#allocation102_spill] sm:$0xff] %v7319_v18  ;;  %3491 = vperm.xlu0 %4986, %v9146_v31  }
 0x32b   :  { %4004 = vperm.xlu1 %4985, %v9147_v17  }
 0x32c   :  { %v7323_v13 = vpop.permute.xlu0 %4085 }
 0x32d   :  { %9148 = vst [vmem:[#allocation81_spill] sm:$0xff] %v7323_v13  ;;  %v7325_v6 = vpop.permute.xlu1 %3422  ;;  %v9156_v13 = vld [vmem:[#allocation108_spill] sm:$0xff] }
 0x32e   :  { %9149 = vst [vmem:[#allocation45_spill] sm:$0xff] %v7325_v6  ;;  %3497 = vperm.xlu0 %4986, %v6864_v16  }
 0x32f   :  { %4010 = vperm.xlu1 %4985, %v9150_v27  }
 0x330   :  { %v7329_v44 = vpop.permute.xlu0 %4091 }
 0x331   :  { %9151 = vst [vmem:[#allocation25_spill] sm:$0xff] %v7329_v44  ;;  %v7331_v29 = vpop.permute.xlu1 %3428  ;;  %v9159_v44 = vld [vmem:[#allocation109_spill] sm:$0xff] }
 0x332   :  { %9152 = vst [vmem:[#allocation136_spill] sm:$0xff] %v7331_v29  ;;  %3503 = vperm.xlu0 %4986, %v6898_v15  }
 0x333   :  { %4016 = vperm.xlu1 %4985, %v9153_v47  }
 0x334   :  { %v7335_v18 = vpop.permute.xlu0 %4097 }
 0x335   :  { %9154 = vst [vmem:[#allocation46_spill] sm:$0xff] %v7335_v18  ;;  %v7337_v31 = vpop.permute.xlu1 %3434  ;;  %v9162_v18 = vld [vmem:[#allocation115_spill] sm:$0xff] }
 0x336   :  { %9155 = vst [vmem:[#allocation137_spill] sm:$0xff] %v7337_v31  ;;  %3509 = vperm.xlu0 %4986, %v6938_v30  }
 0x337   :  { %4022 = vperm.xlu1 %4985, %v9156_v13  }
 0x338   :  { %v7341_v6 = vpop.permute.xlu0 %4103 }
 0x339   :  { %9157 = vst [vmem:[#allocation108_spill] sm:$0xff] %v7341_v6  ;;  %v7343_v16 = vpop.permute.xlu1 %3440  ;;  %v9165_v6 = vld [vmem:[#allocation68_spill] sm:$0xff] }
 0x33a   :  { %9158 = vst [vmem:[#allocation138_spill] sm:$0xff] %v7343_v16  ;;  %4429 = vperm.xlu0 %4986, %v9089_v63  }
 0x33b   :  { %4028 = vperm.xlu1 %4985, %v9159_v44  }
 0x33d   :  { %v7347_v29 = vpop.permute.xlu0 %3326  ;;  %v7349_v15 = vpop.permute.xlu1 %3446 }
 0x33e   :  { %9160 = vst [vmem:[#allocation109_spill] sm:$0xff] %v7347_v29  ;;  %9161 = vst [vmem:[#allocation139_spill] sm:$0xff] %v7349_v15  ;;  %4438 = vperm.xlu0 %4986, %v9097_v10   ;;  %v9168_v29 = vld [vmem:[#allocation116_spill] sm:$0xff] }
 0x33f   :  { %4034 = vperm.xlu1 %4985, %v9162_v18  }
 0x341   :  { %v7353_v31 = vpop.permute.xlu0 %3335  ;;  %v7355_v30 = vpop.permute.xlu1 %3452 }
 0x342   :  { %9163 = vst [vmem:[#allocation115_spill] sm:$0xff] %v7353_v31  ;;  %9164 = vst [vmem:[#allocation140_spill] sm:$0xff] %v7355_v30  ;;  %4444 = vperm.xlu0 %4986, %v9101_v52   ;;  %v9171_v31 = vld [vmem:[#allocation118_spill] sm:$0xff] }
 0x343   :  { %4040 = vperm.xlu1 %4985, %v9165_v6  }
 0x345   :  { %v7359_v16 = vpop.permute.xlu0 %3341  ;;  %v7361_v63 = vpop.permute.xlu1 %3458 }
 0x346   :  { %9166 = vst [vmem:[#allocation68_spill] sm:$0xff] %v7359_v16  ;;  %9167 = vst [vmem:[#allocation141_spill] sm:$0xff] %v7361_v63  ;;  %4450 = vperm.xlu0 %4986, %v9105_v59   ;;  %v9174_v16 = vld [vmem:[#allocation79_spill] sm:$0xff] }
 0x347   :  { %4046 = vperm.xlu1 %4985, %v9168_v29   ;;  %v9209_v29 = vld [vmem:[#allocation78_spill] sm:$0xff] }
 0x349   :  { %v7365_v15 = vpop.permute.xlu0 %3347  ;;  %v7367_v10 = vpop.permute.xlu1 %3464 }
 0x34a   :  { %9169 = vst [vmem:[#allocation142_spill] sm:$0xff] %v7365_v15  ;;  %9170 = vst [vmem:[#allocation143_spill] sm:$0xff] %v7367_v10  ;;  %4456 = vperm.xlu0 %4986, %v9109_v8   ;;  %v9177_v15 = vld [vmem:[#allocation80_spill] sm:$0xff] }
 0x34b   :  { %4052 = vperm.xlu1 %4985, %v9171_v31   ;;  %v9180_v31 = vld [vmem:[#allocation9_spill] sm:$0xff] }
 0x34d   :  { %v7371_v30 = vpop.permute.xlu0 %3353  ;;  %v7373_v52 = vpop.permute.xlu1 %3470 }
 0x34e   :  { %9172 = vst [vmem:[#allocation144_spill] sm:$0xff] %v7371_v30  ;;  %9173 = vst [vmem:[#allocation145_spill] sm:$0xff] %v7373_v52  ;;  %4462 = vperm.xlu0 %4986, %v9113_v19  }
 0x34f   :  { %4058 = vperm.xlu1 %4985, %v9174_v16   ;;  %v9183_v16 = vld [vmem:[#allocation120_spill] sm:$0xff] }
 0x351   :  { %v7377_v63 = vpop.permute.xlu0 %3359  ;;  %v7379_v59 = vpop.permute.xlu1 %3476 }
 0x352   :  { %9175 = vst [vmem:[#allocation146_spill] sm:$0xff] %v7377_v63  ;;  %9176 = vst [vmem:[#allocation147_spill] sm:$0xff] %v7379_v59  ;;  %4468 = vperm.xlu0 %4986, %v9117_v35  }
 0x353   :  { %4064 = vperm.xlu1 %4985, %v9177_v15  }
 0x355   :  { %v7383_v10 = vpop.permute.xlu0 %3365  ;;  %v7385_v8 = vpop.permute.xlu1 %3482 }
 0x356   :  { %9178 = vst [vmem:[#allocation148_spill] sm:$0xff] %v7383_v10  ;;  %9179 = vst [vmem:[#allocation149_spill] sm:$0xff] %v7385_v8  ;;  %4474 = vperm.xlu0 %4986, %v9121_v50  }
 0x357   :  { %4070 = vperm.xlu1 %4985, %v9180_v31  }
 0x359   :  { %v7389_v52 = vpop.permute.xlu0 %3371  ;;  %v7391_v19 = vpop.permute.xlu1 %3488 }
 0x35a   :  { %9181 = vst [vmem:[#allocation150_spill] sm:$0xff] %v7389_v52  ;;  %9182 = vst [vmem:[#allocation151_spill] sm:$0xff] %v7391_v19  ;;  %4480 = vperm.xlu0 %4986, %v9125_v58   ;;  %v9189_v58 = vlaneseq }
 0x35b   :  { %4076 = vperm.xlu1 %4985, %v9183_v16  }
 0x35c   :  { %v7410_v16 = vand.u32 127, %v9189_v58 }
 0x35d   :  { %v7395_v59 = vpop.permute.xlu0 %3377  ;;  %v7397_v35 = vpop.permute.xlu1 %3494 }
 0x35e   :  { %9184 = vst [vmem:[#allocation152_spill] sm:$0xff] %v7395_v59  ;;  %9185 = vst [vmem:[#allocation153_spill] sm:$0xff] %v7397_v35  ;;  %4486 = vperm.xlu0 %4986, %v9129_v54   ;;  %v2985_v54 = vadd.s32 4294967288, %v7410_v16  ;;  %v2992_v35 = vadd.s32 4294967280, %v7410_v16  ;;  %v3027_v58 = vadd.s32 4294967240, %v7410_v16  ;;  %v3006_v8 = vadd.s32 4294967264, %v7410_v16 }
 0x35f   :  { %4082 = vperm.xlu1 %4985, %v6916_v22  }
 0x361   :  { %v7401_v15 = vpop.permute.xlu0 %3383  ;;  %v7403_v50 = vpop.permute.xlu1 %3500 }
 0x362   :  { %9186 = vst [vmem:[#allocation154_spill] sm:$0xff] %v7401_v15  ;;  %9187 = vst [vmem:[#allocation155_spill] sm:$0xff] %v7403_v50  ;;  %4492 = vperm.xlu0 %4986, %v9133_v5   ;;  %v2999_v5 = vadd.s32 4294967272, %v7410_v16 }
 0x363   :  { %4088 = vperm.xlu1 %4985, %v6920_v7   ;;  %v3013_v7 = vadd.s32 4294967256, %v7410_v16 }
 0x365   :  { %v7407_v31 = vpop.permute.xlu0 %3389  ;;  %v7412_v19 = vpop.permute.xlu1 %3506 }
 0x366   :  { %9188 = vst [vmem:[#allocation156_spill] sm:$0xff] %v7407_v31  ;;  %9190 = vst [vmem:[#allocation157_spill] sm:$0xff] %v7412_v19  ;;  %4498 = vperm.xlu0 %4986, %v9136_v49   ;;  %v9193_v19 = vld [vmem:[#allocation8_spill] sm:$0xff] }
 0x367   :  { %4094 = vperm.xlu1 %4985, %v6924_v23   ;;  %v7428_v49 = vsub.s32 %v7410_v16, %v9193_v19  ;;  %v7431_v23 = vsub.s32 %v2985_v54, %v9193_v19  ;;  %v7436_v15 = vsub.s32 %v2992_v35, %v9193_v19  ;;  %v7445_v10 = vsub.s32 %v3013_v7, %v9193_v19 }
 0x369   :  { %v7418_v50 = vpop.permute.xlu0 %3395  ;;  %v7422_v31 = vpop.permute.xlu1 %3512  ;;  %9196 = vst [vmem:[#allocation161_spill] sm:$0xff] %v7445_v10  ;;  %v3037_v54 = vrot.slane %v6989_v33, %v7428_v49  ;;  %v3046_v35 = vrot.slane %v6999_v60, %v7436_v15  ;;  %v2989_v7 = vrot.slane %v6948_v45, %v7431_v23  ;;  %v7462_v33 = vsub.s32 %v3006_v8, %v9193_v19  ;;  %v9203_v45 = vld [vmem:[#allocation66_spill] sm:$0xff]  ;;  %v9204_v8 = vld [vmem:[#allocation31_spill] sm:$0xff] }
 0x36a   :  { %9191 = vst [vmem:[#allocation158_spill] sm:$0xff] %v7418_v50  ;;  %9192 = vst [vmem:[#allocation159_spill] sm:$0xff] %v7422_v31  ;;  %4504 = vperm.xlu0 %4986, %v9139_v57   ;;  %v3020_v31 = vadd.s32 4294967248, %v7410_v16  ;;  %v7442_v57 = vsub.s32 %v2999_v5, %v9193_v19  ;;  %v9199_v5 = vld [vmem:[#allocation15_spill] sm:$0xff] }
 0x36b   :  { %4100 = vperm.xlu1 %4985, %v6932_v25   ;;  %v7451_v25 = vsub.s32 %v3027_v58, %v9193_v19  ;;  %v3041_v59 = vrot.slane %v9199_v5, %v7431_v23  ;;  %v9201_v58 = vld [vmem:[#allocation62_spill] sm:$0xff] }
 0x36c   :  { %9195 = vst [vmem:[#allocation160_spill] sm:$0xff] %v7442_v57  ;;  %v7468_v60 = vsub.s32 %v3020_v31, %v9193_v19  ;;  %v3003_v52 = vrot.slane %v9204_v8, %v7442_v57  ;;  %v9206_v31 = vld [vmem:[#allocation38_spill] sm:$0xff]  ;;  %v9207_v8 = vld [vmem:[#allocation76_spill] sm:$0xff] }
 0x36d   :  { %v7439_v50 = vpop.permute.xlu0 %3401  ;;  %9197 = vst [vmem:[#allocation162_spill] sm:$0xff] %v7451_v25  ;;  %v3051_v22 = vrot.slane %v9207_v8, %v7442_v57  ;;  %v3071_v30 = vrot.slane %v9209_v29, %v7451_v25 }
 0x36e   :  { %9194 = vst [vmem:[#allocation8_spill] sm:$0xff] %v7439_v50  ;;  %4510 = vperm.xlu0 %4986, %v9143_v43   ;;  %v7455_v50 = vpop.permute.xlu1 %3917  ;;  %v2996_v43 = vrot.slane %v6959_v26, %v7436_v15  ;;  %9200 = vst [vmem:[#allocation15_spill] sm:$0xff] %v7468_v60  ;;  %v9205_v26 = vld [vmem:[#allocation117_spill] sm:$0xff] }
 0x36f   :  { %9198 = vst [vmem:[#allocation163_spill] sm:$0xff] %v7455_v50  ;;  %4987 = vset.pattern.permute.xlu1 %v9038_v9  ;;  %v2984_v50 = vrot.slane %v9203_v45, %v7428_v49  ;;  %v3042_v9 = vsel %vm2990_vm0, %v3041_v59, %v3037_v54  ;;  %v3017_v63 = vrot.slane %v9205_v26, %v7445_v10  ;;  %v9208_v59 = vld [vmem:[#allocation51_spill] sm:$0xff]  ;;  %v3514_v26 = vadd.s32 4294967232, %v7410_v16 }
 0x370   :  { %4426 = vperm.xlu1 %4987, %v9201_v58   ;;  %v3047_v58 = vsel %vm2997_vm1, %v3046_v35, %v3042_v9  ;;  %v3061_v54 = vrot.slane %v9208_v59, %v7445_v10  ;;  %v3076_v9 = vrot.slane %v7029_v38, %v7428_v49 }
 0x371   :  { %v7471_v5 = vpop.permute.xlu0 %3407  ;;  %v3052_v29 = vsel %vm8680_vm2, %v3051_v22, %v3047_v58  ;;  %v3547_v58 = vadd.s32 4294967192, %v7410_v16 }
 0x372   :  { %9202 = vst [vmem:[#allocation62_spill] sm:$0xff] %v7471_v5  ;;  %4516 = vperm.xlu0 %4986, %v9147_v17   ;;  %v3056_v5 = vrot.slane %v7009_v55, %v7462_v33  ;;  %v7486_v45 = vpop.permute.xlu1 %3920  ;;  %v2991_v17 = vsel %vm2990_vm0, %v2989_v7, %v2984_v50  ;;  %v3010_v55 = vrot.slane %v6969_v56, %v7462_v33 }
 0x373   :  { %v2998_v35 = vsel %vm2997_vm1, %v2996_v43, %v2991_v17  ;;  %v3080_v50 = vrot.slane %v6874_v28, %v7431_v23  ;;  %v3090_v7 = vrot.slane %v6894_v46, %v7442_v57  ;;  %v3085_v43 = vrot.slane %v7039_v36, %v7436_v15  ;;  %v9211_v17 = vld [vmem:[#allocation63_spill] sm:$0xff] }
 0x374   :  { %4432 = vperm.xlu1 %4987, %v9093_v21   ;;  %v3100_v56 = vrot.slane %v6934_v2, %v7445_v10  ;;  %v3057_v38 = vsel %vm8679_vm3, %v3056_v5, %v3052_v29  ;;  %v3066_v21 = vrot.slane %v7019_v41, %v7468_v60  ;;  %v3526_v28 = vadd.s32 4294967216, %v7410_v16 }
 0x375   :  { %v7502_v8 = vpop.permute.xlu0 %3413  ;;  %v3110_v46 = vrot.slane %v6946_v61, %v7451_v25  ;;  %v3005_v22 = vsel %vm8680_vm2, %v3003_v52, %v2998_v35  ;;  %v7524_v36 = vsub.s32 %v3514_v26, %v9193_v19  ;;  %v3533_v2 = vadd.s32 4294967208, %v7410_v16 }
 0x376   :  { %4522 = vperm.xlu0 %4986, %v9150_v27   ;;  %v7518_v59 = vpop.permute.xlu1 %3926  ;;  %v3012_v27 = vsel %vm8679_vm3, %v3010_v55, %v3005_v22  ;;  %v3024_v5 = vrot.slane %v6979_v20, %v7468_v60  ;;  %v3081_v41 = vsel %vm2990_vm0, %v3080_v50, %v3076_v9  ;;  %v3062_v52 = vsel %vm8678_vm4, %v3061_v54, %v3057_v38  ;;  %v9213_v22 = vld [vmem:[#allocation64_spill] sm:$0xff] }
 0x377   :  { %9210 = vst [vmem:[#allocation66_spill] sm:$0xff] %v7518_v59  ;;  %v3086_v26 = vsel %vm2997_vm1, %v3085_v43, %v3081_v41  ;;  %v3095_v35 = vrot.slane %v7049_v34, %v7462_v33  ;;  %v3115_v55 = vrot.slane %v7069_v3, %v7428_v49  ;;  %v3119_v20 = vrot.slane %v6957_v39, %v7431_v23  ;;  %v9289_v59 = vld [vmem:[#allocation150_spill] sm:$0xff] }
 0x378   :  { %4435 = vperm.xlu1 %4987, %v9211_v17   ;;  %v3067_v9 = vsel %vm8677_vm5, %v3066_v21, %v3062_v52  ;;  %v3124_v50 = vrot.slane %v7079_v53, %v7436_v15  ;;  %v7548_v54 = vsub.s32 %v3526_v28, %v9193_v19  ;;  %v3129_v34 = vrot.slane %v6967_v24, %v7442_v57 }
 0x379   :  { %v7533_v29 = vpop.permute.xlu0 %3419  ;;  %v3019_v3 = vsel %vm8678_vm4, %v3017_v63, %v3012_v27  ;;  %v3561_v39 = vadd.s32 4294967176, %v7410_v16  ;;  %v3139_v53 = vrot.slane %v6977_v11, %v7445_v10  ;;  %v3091_v21 = vsel %vm8680_vm2, %v3090_v7, %v3086_v26 }
 0x37a   :  { %4528 = vperm.xlu0 %4986, %v9153_v47   ;;  %v7550_v43 = vpop.permute.xlu1 %3932  ;;  %v7556_v47 = vsub.s32 %v3533_v2, %v9193_v19  ;;  %v3026_v38 = vsel %vm8677_vm5, %v3024_v5, %v3019_v3  ;;  %v3519_v28 = vadd.s32 4294967224, %v7410_v16  ;;  %v3072_v24 = vsel %vm8681_vm6, %v3071_v30, %v3067_v9 }
 0x37b   :  { %9212 = vst [vmem:[#allocation31_spill] sm:$0xff] %v7550_v43  ;;  %v3096_v63 = vsel %vm8679_vm3, %v3095_v35, %v3091_v21  ;;  %v3120_v2 = vsel %vm2990_vm0, %v3119_v20, %v3115_v55  ;;  %v7571_v27 = vsub.s32 %v3547_v58, %v9193_v19  ;;  %v3105_v11 = vrot.slane %v7059_v40, %v7468_v60  ;;  %v9215_v55 = vld [vmem:[#allocation17_spill] sm:$0xff] }
 0x37c   :  { %4441 = vperm.xlu1 %4987, %v9213_v22   ;;  %v3125_v7 = vsel %vm2997_vm1, %v3124_v50, %v3120_v2  ;;  %v3134_v5 = vrot.slane %v7089_v37, %v7462_v33  ;;  %v3154_v30 = vrot.slane %v7109_v14, %v7428_v49  ;;  %v9214_v58 = vrot.slane %v9206_v31, %v7451_v25  ;;  %v9219_v22 = vld [vmem:[#allocation122_spill] sm:$0xff] }
 0x37d   :  { %v7565_v41 = vpop.permute.xlu0 %3425  ;;  %v3163_v40 = vrot.slane %v7119_v1, %v7436_v15  ;;  %v7592_v26 = vsub.s32 %v3561_v39, %v9193_v19  ;;  %v3158_v37 = vrot.slane %v6997_v32, %v7431_v23  ;;  %v3168_v14 = vrot.slane %v7007_v51, %v7442_v57 }
 0x37e   :  { %4534 = vperm.xlu0 %4986, %v9156_v13   ;;  %v7581_v17 = vpop.permute.xlu1 %3938  ;;  %v3033_v52 = vsel %vm8681_vm6, %v9214_v58, %v3026_v38  ;;  %v3149_v13 = vrot.slane %v6987_v4, %v7451_v25  ;;  %v3178_v31 = vrot.slane %v7017_v62, %v7445_v10  ;;  %v7601_v35 = vsub.s32 %v3519_v28, %v9193_v19 }
 0x37f   :  { %v3308_v1 = vsel %vm3307_vm7, %v3072_v24, %v3033_v52  ;;  %v3188_v20 = vrot.slane %v7027_v12, %v7451_v25  ;;  %v3101_v32 = vsel %vm8678_vm4, %v3100_v56, %v3096_v63  ;;  %v3130_v9 = vsel %vm8680_vm2, %v3129_v34, %v3125_v7  ;;  %v9220_v63 = vld [vmem:[#allocation133_spill] sm:$0xff] }
 0x380   :  { %4447 = vperm.xlu1 %4987, %v9215_v55   ;;  %v3197_v51 = vrot.slane %v7037_v42, %v7431_v23  ;;  %v3106_v62 = vsel %vm8677_vm5, %v3105_v11, %v3101_v32  ;;  %v3135_v50 = vsel %vm8679_vm3, %v3134_v5, %v3130_v9  ;;  %v3159_v3 = vsel %vm2990_vm0, %v3158_v37, %v3154_v30  ;;  %v9218_v42 = vld [vmem:[#allocation30_spill] sm:$0xff]  ;;  %v9221_v11 = vld [vmem:[#allocation95_spill] sm:$0xff]  ;;  %v9222_v7 = vld [vmem:[#allocation69_spill] sm:$0xff] }
 0x381   :  { %v7604_v4 = vpop.permute.xlu0 %3431  ;;  %v3144_v38 = vrot.slane %v7099_v48, %v7468_v60  ;;  %v3164_v56 = vsel %vm2997_vm1, %v3163_v40, %v3159_v3  ;;  %v3173_v34 = vrot.slane %v7129_v0, %v7462_v33  ;;  %v3207_v28 = vrot.slane %v9218_v42, %v7442_v57  ;;  %v9223_v30 = vld [vmem:[#allocation114_spill] sm:$0xff]  ;;  %v9224_v52 = vld [vmem:[#allocation33_spill] sm:$0xff]  ;;  %v9225_v37 = vld [vmem:[#allocation99_spill] sm:$0xff] }
 0x382   :  { %4540 = vperm.xlu0 %4986, %v9159_v44   ;;  %v7617_v39 = vpop.permute.xlu1 %3944  ;;  %v9217_v44 = vld [vmem:[#allocation132_spill] sm:$0xff]  ;;  %v3217_v24 = vrot.slane %v9219_v22, %v7445_v10  ;;  %v3202_v2 = vrot.slane %v9220_v63, %v7436_v15  ;;  %v3232_v48 = vrot.slane %v9221_v11, %v7428_v49  ;;  %v3111_v0 = vsel %vm8681_vm6, %v3110_v46, %v3106_v62  ;;  %v9226_v32 = vld [vmem:[#allocation123_spill] sm:$0xff] }
 0x383   :  { %9216 = vst [vmem:[#allocation117_spill] sm:$0xff] %v7617_v39  ;;  %v3193_v21 = vrot.slane %v9217_v44, %v7428_v49  ;;  %v3227_v58 = vrot.slane %v9223_v30, %v7451_v25  ;;  %v3241_v40 = vrot.slane %v9224_v52, %v7436_v15  ;;  %v3271_v55 = vrot.slane %v9225_v37, %v7428_v49  ;;  %v9227_v46 = vld [vmem:[#allocation20_spill] sm:$0xff]  ;;  %v9229_v63 = vld [vmem:[#allocation127_spill] sm:$0xff]  ;;  %v9230_v52 = vld [vmem:[#allocation130_spill] sm:$0xff] }
 0x384   :  { %4453 = vperm.xlu1 %4987, %v9222_v7   ;;  %v3236_v9 = vrot.slane %v9226_v32, %v7431_v23  ;;  %v3140_v3 = vsel %vm8678_vm4, %v3139_v53, %v3135_v50  ;;  %v3169_v61 = vsel %vm8680_vm2, %v3168_v14, %v3164_v56  ;;  %v3280_v62 = vrot.slane %v9227_v46, %v7436_v15  ;;  %v9231_v50 = vld [vmem:[#allocation28_spill] sm:$0xff]  ;;  %v9232_v32 = vld [vmem:[#allocation47_spill] sm:$0xff]  ;;  %v9258_v30 = vld [vmem:[#allocation13_spill] sm:$0xff] }
 0x385   :  { %v7635_v5 = vpop.permute.xlu0 %3437  ;;  %v3145_v42 = vsel %vm8677_vm5, %v3144_v38, %v3140_v3  ;;  %v3275_v11 = vrot.slane %v9229_v63, %v7431_v23  ;;  %v3174_v7 = vsel %vm8679_vm3, %v3173_v34, %v3169_v61  ;;  %v3183_v53 = vrot.slane %v9230_v52, %v7468_v60  ;;  %v9238_v52 = vld [vmem:[#allocation128_spill] sm:$0xff]  ;;  %v9304_v39 = vld [vmem:[#allocation158_spill] sm:$0xff] }
 0x386   :  { %4546 = vperm.xlu0 %4986, %v9162_v18   ;;  %v7654_v44 = vpop.permute.xlu1 %3950  ;;  %v3198_v18 = vsel %vm2990_vm0, %v3197_v51, %v3193_v21  ;;  %v3212_v56 = vrot.slane %v9231_v50, %v7462_v33  ;;  %v3237_v37 = vsel %vm2990_vm0, %v3236_v9, %v3232_v48  ;;  %v3310_v3 = vsel %vm3309_vm8, %v3111_v0, %v3308_v1  ;;  %v9233_v51 = vld [vmem:[#allocation52_spill] sm:$0xff]  ;;  %v9235_v48 = vld [vmem:[#allocation125_spill] sm:$0xff] }
 0x387   :  { %9228 = vst [vmem:[#allocation38_spill] sm:$0xff] %v7654_v44  ;;  %v3203_v14 = vsel %vm2997_vm1, %v3202_v2, %v3198_v18  ;;  %v3242_v34 = vsel %vm2997_vm1, %v3241_v40, %v3237_v37  ;;  %v3251_v21 = vrot.slane %v9233_v51, %v7462_v33  ;;  %v3276_v61 = vsel %vm2990_vm0, %v3275_v11, %v3271_v55  ;;  %v9234_v2 = vld [vmem:[#allocation124_spill] sm:$0xff] }
 0x388   :  { %4459 = vperm.xlu1 %4987, %v9232_v32   ;;  %v3246_v46 = vrot.slane %v9234_v2, %v7442_v57  ;;  %v3256_v9 = vrot.slane %v9235_v48, %v7445_v10  ;;  %v3281_v63 = vsel %vm2997_vm1, %v3280_v62, %v3276_v61  ;;  %v9236_v18 = vld [vmem:[#allocation104_spill] sm:$0xff]  ;;  %v3150_v40 = vsel %vm8681_vm6, %v3149_v13, %v3145_v42  ;;  %v9239_v62 = vld [vmem:[#allocation21_spill] sm:$0xff] }
 0x389   :  { %v7668_v38 = vpop.permute.xlu0 %3443  ;;  %v3290_v1 = vrot.slane %v9236_v18, %v7462_v33  ;;  %v3285_v55 = vrot.slane %v9238_v52, %v7442_v57  ;;  %v3208_v11 = vsel %vm8680_vm2, %v3207_v28, %v3203_v14  ;;  %v3222_v32 = vrot.slane %v9239_v62, %v7468_v60  ;;  %v9240_v61 = vld [vmem:[#allocation77_spill] sm:$0xff]  ;;  %v9246_v18 = vld [vmem:[#allocation126_spill] sm:$0xff] }
 0x38a   :  { %4552 = vperm.xlu0 %4986, %v9165_v6   ;;  %v7683_v0 = vpop.permute.xlu1 %3956  ;;  %v3179_v6 = vsel %vm8678_vm4, %v3178_v31, %v3174_v7  ;;  %v3213_v37 = vsel %vm8679_vm3, %v3212_v56, %v3208_v11  ;;  %v3247_v51 = vsel %vm8680_vm2, %v3246_v46, %v3242_v34  ;;  %v9241_v31 = vld [vmem:[#allocation27_spill] sm:$0xff]  ;;  %v9243_v56 = vld [vmem:[#allocation116_spill] sm:$0xff]  ;;  %v9244_v2 = vld [vmem:[#allocation105_spill] sm:$0xff]  ;;  %v3540_v48 = vadd.s32 4294967200, %v7410_v16 }
 0x38b   :  { %9237 = vst [vmem:[#allocation76_spill] sm:$0xff] %v7683_v0  ;;  %v3184_v50 = vsel %vm8677_vm5, %v3183_v53, %v3179_v6  ;;  %v3252_v42 = vsel %vm8679_vm3, %v3251_v21, %v3247_v51  ;;  %v3261_v28 = vrot.slane %v9241_v31, %v7468_v60  ;;  %v3286_v7 = vsel %vm8680_vm2, %v3285_v55, %v3281_v63  ;;  %v9242_v53 = vld [vmem:[#allocation109_spill] sm:$0xff] }
 0x38c   :  { %4465 = vperm.xlu1 %4987, %v9240_v61   ;;  %v3523_v14 = vrot.slane %v9242_v53, %v7601_v35  ;;  %v3291_v34 = vsel %vm8679_vm3, %v3290_v1, %v3286_v7  ;;  %v3300_v46 = vrot.slane %v9244_v2, %v7468_v60  ;;  %v3266_v52 = vrot.slane %v9246_v18, %v7451_v25  ;;  %v9247_v63 = vld [vmem:[#allocation129_spill] sm:$0xff]  ;;  %v9248_v1 = vld [vmem:[#allocation107_spill] sm:$0xff] }
 0x38d   :  { %v7696_v13 = vpop.permute.xlu0 %3449  ;;  %v3295_v55 = vrot.slane %v9247_v63, %v7445_v10  ;;  %v3218_v6 = vsel %vm8678_vm4, %v3217_v24, %v3213_v37  ;;  %v3518_v11 = vrot.slane %v9248_v1, %v7524_v36  ;;  %v3312_v62 = vsel %vm3311_vm9, %v3150_v40, %v3310_v3  ;;  %v9249_v7 = vld [vmem:[#allocation41_spill] sm:$0xff]  ;;  %v9250_v40 = vld [vmem:[#allocation55_spill] sm:$0xff]  ;;  %v9256_v63 = vld [vmem:[#allocation10_spill] sm:$0xff] }
 0x38e   :  { %4558 = vperm.xlu0 %4986, %v9243_v56   ;;  %v7709_v21 = vpop.permute.xlu1 %3962  ;;  %v3189_v51 = vsel %vm8681_vm6, %v3188_v20, %v3184_v50  ;;  %v3223_v61 = vsel %vm8677_vm5, %v3222_v32, %v3218_v6  ;;  %v3257_v31 = vsel %vm8678_vm4, %v3256_v9, %v3252_v42  ;;  %v9251_v20 = vld [vmem:[#allocation36_spill] sm:$0xff]  ;;  %v7739_v9 = vsub.s32 %v3540_v48, %v9193_v19  ;;  %v9257_v1 = vld [vmem:[#allocation70_spill] sm:$0xff] }
 0x38f   :  { %9245 = vst [vmem:[#allocation51_spill] sm:$0xff] %v7709_v21  ;;  %v3262_v22 = vsel %vm8677_vm5, %v3261_v28, %v3257_v31  ;;  %v3296_v24 = vsel %vm8678_vm4, %v3295_v55, %v3291_v34  ;;  %v3525_v3 = vsel %vm3524_vm14, %v3523_v14, %v3518_v11  ;;  %v3530_v50 = vrot.slane %v9251_v20, %v7548_v54  ;;  %v9253_v28 = vld [vmem:[#allocation131_spill] sm:$0xff]  ;;  %v9285_v34 = vld [vmem:[#allocation134_spill] sm:$0xff]  ;;  %v9298_v31 = vld [vmem:[#allocation140_spill] sm:$0xff] }
 0x390   :  { %4471 = vperm.xlu1 %4987, %v9249_v7   ;;  %v3301_v12 = vsel %vm8677_vm5, %v3300_v46, %v3296_v24  ;;  %v3554_v37 = vadd.s32 4294967184, %v7410_v16  ;;  %v3314_v42 = vsel %vm3313_vm10, %v3189_v51, %v3312_v62  ;;  %v3305_v56 = vrot.slane %v9253_v28, %v7451_v25  ;;  %v9282_v25 = vld [vmem:[#allocation96_spill] sm:$0xff]  ;;  %v9291_v46 = vld [vmem:[#allocation102_spill] sm:$0xff] }
 0x391   :  { %v7729_v53 = vpop.permute.xlu0 %3455  ;;  %v3228_v2 = vsel %vm8681_vm6, %v3227_v58, %v3223_v61  ;;  %v3267_v16 = vsel %vm8681_vm6, %v3266_v52, %v3262_v22  ;;  %v3532_v18 = vsel %vm3531_vm15, %v3530_v50, %v3525_v3  ;;  %vm8696_vm5 = vcmask 786112   ;;  %v9259_v52 = vld [vmem:[#allocation115_spill] sm:$0xff]  ;;  %v9287_v3 = vld [vmem:[#allocation53_spill] sm:$0xff]  ;;  %v9302_v10 = vld [vmem:[#allocation74_spill] sm:$0xff] }
 0x392   :  { %4573 = vperm.xlu0 %4986, %v9250_v40   ;;  %v7742_v32 = vpop.permute.xlu1 %3968  ;;  %v3306_v6 = vsel %vm8681_vm6, %v3305_v56, %v3301_v12  ;;  %v3537_v11 = vrot.slane %v9257_v1, %v7556_v47  ;;  %vm8691_vm4 = vcmask 851712   ;;  %vm8695_vm3 = vcmask 917312   ;;  %v9267_v56 = vld [vmem:[#allocation72_spill] sm:$0xff] }
 0x393   :  { %9252 = vst [vmem:[#allocation78_spill] sm:$0xff] %v7742_v32  ;;  %v3316_v58 = vsel %vm3315_vm11, %v3228_v2, %v3314_v42  ;;  %v3544_v62 = vrot.slane %v9259_v52, %v7739_v9  ;;  %v7768_v51 = vsub.s32 %v3554_v37, %v9193_v19  ;;  %vm8692_vm2 = vcmask 982912   ;;  %v9264_v19 = vld [vmem:[#allocation71_spill] sm:$0xff]  ;;  %v9265_v37 = vld [vmem:[#allocation90_spill] sm:$0xff] }
 0x394   :  { %4477 = vperm.xlu1 %4987, %v9256_v63   ;;  %v3539_v22 = vsel %vm8696_vm5, %v3537_v11, %v3532_v18  ;;  %vm8693_vm6 = vcmask 1048512   ;;  %v3318_v24 = vsel %vm3317_vm12, %v3267_v16, %v3316_v58  ;;  %v3551_v50 = vrot.slane %v9264_v19, %v7571_v27  ;;  %v9268_v16 = vld [vmem:[#allocation34_spill] sm:$0xff]  ;;  %v9269_v63 = vld [vmem:[#allocation73_spill] sm:$0xff]  ;;  %v9271_v58 = vld [vmem:[#allocation16_spill] sm:$0xff] }
 0x395   :  { %v7758_v55 = vpop.permute.xlu0 %3461  ;;  %v7786_v28 = vsel %vm8690_vm13, %v3306_v6, %v3318_v24  ;;  %v3565_v2 = vrot.slane %v9267_v56, %v7592_v26  ;;  %v3575_v1 = vrot.slane %v9269_v63, %v7601_v35  ;;  %v9270_v11 = vld [vmem:[#allocation142_spill] sm:$0xff]  ;;  %v3546_v6 = vsel %vm8691_vm4, %v3544_v62, %v3539_v22  ;;  %v9273_v24 = vld [vmem:[#allocation68_spill] sm:$0xff]  ;;  %v9276_v63 = vld [vmem:[#allocation83_spill] sm:$0xff] }
 0x396   :  { %4594 = vperm.xlu0 %4986, %v9258_v30   ;;  %v7770_v61 = vpop.permute.xlu1 %3974  ;;  %9266 = vst [vmem:[#allocation64_spill] sm:$0xff] %v7786_v28  ;;  %v3571_v30 = vrot.slane %v9270_v11, %v7524_v36  ;;  %v9274_v56 = vld [vmem:[#allocation144_spill] sm:$0xff]  ;;  %v3585_v40 = vrot.slane %v9276_v63, %v7556_v47  ;;  %v9279_v19 = vld [vmem:[#allocation86_spill] sm:$0xff]  ;;  %v9280_v22 = vld [vmem:[#allocation93_spill] sm:$0xff]  ;;  %v3610_v44 = vrot.slane %v9289_v59, %v7524_v36  ;;  %vm8694_vm13 = vcmask 523264  }
 0x397   :  { %9260 = vst [vmem:[#allocation63_spill] sm:$0xff] %v7770_v61  ;;  %v3580_v20 = vrot.slane %v9274_v56, %v7548_v54  ;;  %v9277_v11 = vld [vmem:[#allocation84_spill] sm:$0xff]  ;;  %v3614_v62 = vrot.slane %v9279_v19, %v7601_v35  ;;  %v9281_v18 = vld [vmem:[#allocation94_spill] sm:$0xff]  ;;  %v9283_v63 = vld [vmem:[#allocation97_spill] sm:$0xff]  ;;  %v3741_v14 = vrot.slane %v9298_v31, %v7556_v47 }
 0x398   :  { %4483 = vperm.xlu1 %4987, %v9265_v37   ;;  %v3558_v37 = vrot.slane %v9273_v24, %v7768_v51  ;;  %v3595_v7 = vrot.slane %v9277_v11, %v7571_v27  ;;  %v3624_v24 = vrot.slane %v9280_v22, %v7556_v47  ;;  %v3653_v43 = vrot.slane %v9283_v63, %v7601_v35  ;;  %v9286_v19 = vld [vmem:[#allocation135_spill] sm:$0xff]  ;;  %v9299_v28 = vld [vmem:[#allocation88_spill] sm:$0xff] }
 0x399   :  { %v7783_v42 = vpop.permute.xlu0 %3467  ;;  %v3553_v22 = vsel %vm8695_vm3, %v3551_v50, %v3546_v6  ;;  %v3576_v56 = vsel %vm3524_vm14, %v3575_v1, %v3571_v30  ;;  %v9292_v50 = vld [vmem:[#allocation45_spill] sm:$0xff]  ;;  %v9294_v6 = vld [vmem:[#allocation152_spill] sm:$0xff]  ;;  %v3615_v21 = vsel %vm3524_vm14, %v3614_v62, %v3610_v44  ;;  %v9309_v44 = vld [vmem:[#allocation147_spill] sm:$0xff] }
 0x39a   :  { %4579 = vperm.xlu0 %4986, %v9271_v58   ;;  %v7804_v48 = vpop.permute.xlu1 %3980  ;;  %v9278_v58 = vld [vmem:[#allocation85_spill] sm:$0xff]  ;;  %v3560_v12 = vsel %vm8692_vm2, %v3558_v37, %v3553_v22  ;;  %v3581_v63 = vsel %vm3531_vm15, %v3580_v20, %v3576_v56  ;;  %v3692_v1 = vrot.slane %v9292_v50, %v7601_v35  ;;  %v3619_v20 = vrot.slane %v9294_v6, %v7548_v54  ;;  %v9296_v22 = vld [vmem:[#allocation138_spill] sm:$0xff]  ;;  %v9301_v56 = vld [vmem:[#allocation143_spill] sm:$0xff] }
 0x39b   :  { %9275 = vst [vmem:[#allocation17_spill] sm:$0xff] %v7804_v48  ;;  %v9284_v48 = vld [vmem:[#allocation87_spill] sm:$0xff]  ;;  %v9295_v37 = vld [vmem:[#allocation137_spill] sm:$0xff]  ;;  %v7862_v6 = vsel %vm8693_vm6, %v3565_v2, %v3560_v12  ;;  %v3586_v59 = vsel %vm8696_vm5, %v3585_v40, %v3581_v63  ;;  %v9303_v31 = vld [vmem:[#allocation148_spill] sm:$0xff]  ;;  %v3780_v62 = vrot.slane %v9309_v44, %v7556_v47  ;;  %v3766_v44 = vrot.slane %v7783_v42, %v7524_v36 }
 0x39c   :  { %4489 = vperm.xlu1 %4987, %v9284_v48   ;;  %v9288_v48 = vld [vmem:[#allocation146_spill] sm:$0xff]  ;;  %v3620_v12 = vsel %vm3531_vm15, %v3619_v20, %v3615_v21  ;;  %v9307_v40 = vld [vmem:[#allocation8_spill] sm:$0xff]  ;;  %v9308_v63 = vld [vmem:[#allocation145_spill] sm:$0xff]  ;;  %v3727_v21 = vrot.slane %v7668_v38, %v7524_v36 }
 0x39d   :  { %v7823_v11 = vpop.permute.xlu0 %3473  ;;  %v3590_v61 = vrot.slane %v9288_v48, %v7739_v9  ;;  %v9297_v48 = vld [vmem:[#allocation139_spill] sm:$0xff]  ;;  %v9306_v2 = vld [vmem:[#allocation154_spill] sm:$0xff]  ;;  %v9310_v20 = vld [vmem:[#allocation92_spill] sm:$0xff]  ;;  %v3625_v38 = vsel %vm8696_vm5, %v3624_v24, %v3620_v12 }
 0x39e   :  { %4561 = vperm.xlu0 %4986, %v9287_v3   ;;  %v7838_v0 = vpop.permute.xlu1 %3986  ;;  %v9293_v3 = vld [vmem:[#allocation136_spill] sm:$0xff]  ;;  %v3731_v60 = vrot.slane %v9297_v48, %v7601_v35  ;;  %v3629_v32 = vrot.slane %v9306_v2, %v7739_v9  ;;  %v9311_v2 = vld [vmem:[#allocation149_spill] sm:$0xff]  ;;  %v3775_v52 = vrot.slane %v7823_v11, %v7548_v54  ;;  %v9315_v11 = vld [vmem:[#allocation35_spill] sm:$0xff] }
 0x39f   :  { %9290 = vst [vmem:[#allocation132_spill] sm:$0xff] %v7838_v0  ;;  %v3702_v30 = vrot.slane %v9293_v3, %v7556_v47  ;;  %v9300_v3 = vld [vmem:[#allocation141_spill] sm:$0xff]  ;;  %v3591_v48 = vsel %vm8691_vm4, %v3590_v61, %v3586_v59  ;;  %v3649_v0 = vrot.slane %v9304_v39, %v7524_v36  ;;  %v3688_v61 = vrot.slane %v7533_v29, %v7524_v36 }
 0x3a0   :  { %4495 = vperm.xlu1 %4987, %v9299_v28   ;;  %v3600_v28 = vrot.slane %v9303_v31, %v7768_v51  ;;  %v3770_v59 = vrot.slane %v9308_v63, %v7601_v35  ;;  %v3697_v39 = vrot.slane %v7565_v41, %v7548_v54  ;;  %v3596_v29 = vsel %vm8695_vm3, %v3595_v7, %v3591_v48  ;;  %v9313_v48 = vld [vmem:[#allocation62_spill] sm:$0xff]  ;;  %v9316_v12 = vld [vmem:[#allocation153_spill] sm:$0xff] }
 0x3a1   :  { %v7857_v50 = vpop.permute.xlu0 %3479  ;;  %v3736_v63 = vrot.slane %v7696_v13, %v7548_v54  ;;  %v3630_v7 = vsel %vm8691_vm4, %v3629_v32, %v3625_v38  ;;  %v3668_v42 = vrot.slane %v9313_v48, %v7739_v9 }
 0x3a2   :  { %4603 = vperm.xlu0 %4986, %v9302_v10   ;;  %v7874_v57 = vpop.permute.xlu1 %3992  ;;  %v3658_v10 = vrot.slane %v9307_v40, %v7548_v54  ;;  %v3601_v41 = vsel %vm8692_vm2, %v3600_v28, %v3596_v29  ;;  %v9314_v28 = vld [vmem:[#allocation156_spill] sm:$0xff] }
 0x3a3   :  { %9305 = vst [vmem:[#allocation30_spill] sm:$0xff] %v7874_v57  ;;  %v9312_v57 = vld [vmem:[#allocation57_spill] sm:$0xff]  ;;  %v3639_v29 = vrot.slane %v9314_v28, %v7768_v51 }
 0x3a4   :  { %4501 = vperm.xlu1 %4987, %v9310_v20   ;;  %v3654_v20 = vsel %vm3524_vm14, %v3653_v43, %v3649_v0  ;;  %v3707_v43 = vrot.slane %v7604_v4, %v7739_v9  ;;  %v3732_v0 = vsel %vm3524_vm14, %v3731_v60, %v3727_v21  ;;  %v9318_v4 = vrot.slane %v9285_v34, %v7556_v47 }
 0x3a5   :  { %v7892_v31 = vpop.permute.xlu0 %3485  ;;  %v3659_v13 = vsel %vm3531_vm15, %v3658_v10, %v3654_v20  ;;  %v3809_v10 = vrot.slane %v9316_v12, %v7601_v35  ;;  %v3737_v38 = vsel %vm3531_vm15, %v3736_v63, %v3732_v0  ;;  %v9317_v20 = vld [vmem:[#allocation54_spill] sm:$0xff]  ;;  %v3785_v21 = vrot.slane %v7857_v50, %v7739_v9  ;;  %v9320_v0 = vld [vmem:[#allocation29_spill] sm:$0xff] }
 0x3a6   :  { %4585 = vperm.xlu0 %4986, %v9312_v57   ;;  %v7907_v40 = vpop.permute.xlu1 %3998  ;;  %v3693_v57 = vsel %vm3524_vm14, %v3692_v1, %v3688_v61  ;;  %v3746_v1 = vrot.slane %v7729_v53, %v7739_v9  ;;  %v3771_v61 = vsel %vm3524_vm14, %v3770_v59, %v3766_v44  ;;  %v3664_v60 = vsel %vm8696_vm5, %v9318_v4, %v3659_v13  ;;  %v9327_v4 = vld [vmem:[#allocation37_spill] sm:$0xff] }
 0x3a7   :  { %v3698_v24 = vsel %vm3531_vm15, %v3697_v39, %v3693_v57  ;;  %v3776_v39 = vsel %vm3531_vm15, %v3775_v52, %v3771_v61  ;;  %v9319_v53 = vrot.slane %v9281_v18, %v7571_v27  ;;  %v3669_v44 = vsel %vm8691_vm4, %v3668_v42, %v3664_v60 }
 0x3a8   :  { %4507 = vperm.xlu1 %4987, %v9315_v11   ;;  %v3678_v34 = vrot.slane %v7502_v8, %v7768_v51  ;;  %v3703_v13 = vsel %vm8696_vm5, %v3702_v30, %v3698_v24  ;;  %v3717_v57 = vrot.slane %v7635_v5, %v7768_v51  ;;  %v3742_v28 = vsel %vm8696_vm5, %v3741_v14, %v3737_v38 }
 0x3a9   :  { %v3492_v32 = vpop.permute.xlu0 %3491  ;;  %v3635_v59 = vsel %vm8695_vm3, %v9319_v53, %v3630_v7  ;;  %v3708_v50 = vsel %vm8691_vm4, %v3707_v43, %v3703_v13  ;;  %v3747_v7 = vsel %vm8691_vm4, %v3746_v1, %v3742_v28  ;;  %v3756_v42 = vrot.slane %v7758_v55, %v7768_v51 }
 0x3aa   :  { %4567 = vperm.xlu0 %4986, %v9317_v20   ;;  %v3805_v48 = vrot.slane %v3492_v32, %v7524_v36  ;;  %v7936_v63 = vpop.permute.xlu1 %4004  ;;  %v3640_v52 = vsel %vm8692_vm2, %v3639_v29, %v3635_v59  ;;  %v3781_v8 = vsel %vm8696_vm5, %v3780_v62, %v3776_v39  ;;  %v9321_v29 = vld [vmem:[#allocation75_spill] sm:$0xff]  ;;  %v9322_v24 = vrot.slane %v9286_v19, %v7571_v27 }
 0x3ab   :  { %v3786_v14 = vsel %vm8691_vm4, %v3785_v21, %v3781_v8  ;;  %v3795_v43 = vrot.slane %v7892_v31, %v7768_v51  ;;  %v9323_v55 = vrot.slane %v9278_v58, %v7592_v26  ;;  %v9324_v19 = vrot.slane %v9295_v37, %v7571_v27  ;;  %v9325_v31 = vld [vmem:[#allocation155_spill] sm:$0xff] }
 0x3ac   :  { %4513 = vperm.xlu1 %4987, %v9320_v0   ;;  %v3674_v5 = vsel %vm8695_vm3, %v9322_v24, %v3669_v44  ;;  %v3810_v11 = vsel %vm3524_vm14, %v3809_v10, %v3805_v48  ;;  %v3819_v61 = vrot.slane %v9325_v31, %v7556_v47  ;;  %v9326_v58 = vrot.slane %v9300_v3, %v7571_v27  ;;  %v9330_v59 = vld [vmem:[#allocation11_spill] sm:$0xff] }
 0x3ad   :  { %v3498_v18 = vpop.permute.xlu0 %3497  ;;  %v3606_v62 = vsel %vm8693_vm6, %v9323_v55, %v3601_v41  ;;  %v3679_v12 = vsel %vm8692_vm2, %v3678_v34, %v3674_v5  ;;  %v3713_v38 = vsel %vm8695_vm3, %v9324_v19, %v3708_v50  ;;  %v9328_v60 = vrot.slane %v9282_v25, %v7592_v26  ;;  %v9337_v24 = vld [vmem:[#allocation39_spill] sm:$0xff] }
 0x3ae   :  { %v3814_v30 = vrot.slane %v3498_v18, %v7548_v54  ;;  %4609 = vperm.xlu0 %4986, %v9321_v29   ;;  %v4011_v32 = vpop.permute.xlu1 %4010  ;;  %v3718_v10 = vsel %vm8692_vm2, %v3717_v57, %v3713_v38  ;;  %v3752_v41 = vsel %vm8695_vm3, %v9326_v58, %v3747_v7  ;;  %v9329_v48 = vrot.slane %v9311_v2, %v7571_v27  ;;  %v9332_v2 = vld [vmem:[#allocation151_spill] sm:$0xff] }
 0x3af   :  { %v4264_v20 = vrot.slane %v4011_v32, %v7428_v49  ;;  %v3645_v39 = vsel %vm8693_vm6, %v9328_v60, %v3640_v52  ;;  %v3757_v21 = vsel %vm8692_vm2, %v3756_v42, %v3752_v41  ;;  %v3841_v44 = vsel %vm3307_vm7, %v3606_v62, %v7862_v6  ;;  %v9339_v62 = vld [vmem:[#allocation163_spill] sm:$0xff] }
 0x3b0   :  { %v3815_v1 = vsel %vm3531_vm15, %v3814_v30, %v3810_v11  ;;  %4519 = vperm.xlu1 %4987, %v9327_v4   ;;  %v3791_v53 = vsel %vm8695_vm3, %v9329_v48, %v3786_v14  ;;  %v9331_v34 = vrot.slane %v9291_v46, %v7592_v26  ;;  %v3800_v57 = vrot.slane %v9332_v2, %v7592_v26  ;;  %v9334_v46 = vld [vmem:[#allocation157_spill] sm:$0xff]  ;;  %v9341_v4 = vld [vmem:[#allocation160_spill] sm:$0xff] }
 0x3b1   :  { %v3504_v37 = vpop.permute.xlu0 %3503  ;;  %v3796_v13 = vsel %vm8692_vm2, %v3795_v43, %v3791_v53  ;;  %v3820_v52 = vsel %vm8696_vm5, %v3819_v61, %v3815_v1  ;;  %v9333_v28 = vrot.slane %v9296_v22, %v7592_v26  ;;  %v3829_v7 = vrot.slane %v9334_v46, %v7571_v27  ;;  %v9345_v48 = vld [vmem:[#allocation117_spill] sm:$0xff]  ;;  %v9352_v2 = vld [vmem:[#allocation132_spill] sm:$0xff] }
 0x3b2   :  { %v3824_v3 = vrot.slane %v3504_v37, %v7739_v9  ;;  %4612 = vperm.xlu0 %4986, %v9330_v59   ;;  %v3684_v25 = vsel %vm8693_vm6, %v9331_v34, %v3679_v12  ;;  %v4017_v50 = vpop.permute.xlu1 %4016  ;;  %v3842_v42 = vsel %vm3309_vm8, %v3645_v39, %v3841_v44  ;;  %v9335_v8 = vrot.slane %v9301_v56, %v7592_v26  ;;  %v9338_v56 = vld [vmem:[#allocation159_spill] sm:$0xff]  ;;  %v9344_v39 = vld [vmem:[#allocation40_spill] sm:$0xff]  ;;  %v9349_v34 = vld [vmem:[#allocation161_spill] sm:$0xff] }
 0x3b3   :  { %v3723_v0 = vsel %vm8693_vm6, %v9333_v28, %v3718_v10  ;;  %v4273_v18 = vrot.slane %v4017_v50, %v7436_v15  ;;  %v9336_v29 = vrot.slane %v9268_v16, %v7431_v23  ;;  %v3843_v14 = vsel %vm3311_vm9, %v3684_v25, %v3842_v42  ;;  %v9350_v25 = vld [vmem:[#allocation106_spill] sm:$0xff] }
 0x3b4   :  { %v3825_v6 = vsel %vm8691_vm4, %v3824_v3, %v3820_v52  ;;  %v3762_v30 = vsel %vm8693_vm6, %v9335_v8, %v3757_v21  ;;  %4525 = vperm.xlu1 %4987, %v9337_v24   ;;  %v3801_v43 = vsel %vm8693_vm6, %v3800_v57, %v3796_v13  ;;  %v3839_v55 = vrot.slane %v9338_v56, %v7592_v26  ;;  %v9346_v3 = vld [vmem:[#allocation51_spill] sm:$0xff]  ;;  %v9351_v52 = vld [vmem:[#allocation78_spill] sm:$0xff] }
 0x3b5   :  { %v4269_v22 = vsel %vm2990_vm0, %v9336_v29, %v4264_v20  ;;  %v3510_v5 = vpop.permute.xlu0 %3509  ;;  %v4112_v12 = vrot.slane %v9339_v62, %v7431_v23  ;;  %v3844_v16 = vsel %vm3313_vm10, %v3723_v0, %v3843_v14  ;;  %v3830_v19 = vsel %vm8695_vm3, %v3829_v7, %v3825_v6  ;;  %v9340_v20 = vld [vmem:[#allocation103_spill] sm:$0xff]  ;;  %v9353_v0 = vld [vmem:[#allocation64_spill] sm:$0xff]  ;;  %v9363_v62 = vld [vmem:[#allocation42_spill] sm:$0xff] }
 0x3b6   :  { %v4274_v11 = vsel %vm2997_vm1, %v4273_v18, %v4269_v22  ;;  %v3834_v32 = vrot.slane %v3510_v5, %v7768_v51  ;;  %v4023_v38 = vpop.permute.xlu1 %4022  ;;  %v4117_v1 = vrot.slane %v7486_v45, %v7436_v15  ;;  %v3845_v31 = vsel %vm3315_vm11, %v3762_v30, %v3844_v16  ;;  %v9354_v18 = vld [vmem:[#allocation24_spill] sm:$0xff]  ;;  %v9357_v30 = vld [vmem:[#allocation30_spill] sm:$0xff]  ;;  %v9358_v22 = vld [vmem:[#allocation15_spill] sm:$0xff] }
 0x3b7   :  { %v4283_v10 = vrot.slane %v4023_v38, %v7462_v33  ;;  %v4147_v58 = vrot.slane %v7581_v17, %v7428_v49  ;;  %v9342_v37 = vrot.slane %v9340_v20, %v9341_v4  ;;  %vm9343_vm4 = vcmask 261312   ;;  %v9355_v7 = vld [vmem:[#allocation32_spill] sm:$0xff]  ;;  %v9364_v16 = vld [vmem:[#allocation38_spill] sm:$0xff] }
 0x3b8   :  { %v3835_v61 = vsel %vm8692_vm2, %v3834_v32, %v3830_v19  ;;  %4531 = vperm.xlu1 %4987, %v9344_v39   ;;  %v3846_v45 = vsel %vm3317_vm12, %v3801_v43, %v3845_v31  ;;  %v4156_v53 = vrot.slane %v9345_v48, %v7436_v15  ;;  %v4186_v59 = vrot.slane %v9346_v3, %v7428_v49  ;;  %v9359_v5 = vld [vmem:[#allocation56_spill] sm:$0xff]  ;;  %v9368_v39 = vld [vmem:[#allocation19_spill] sm:$0xff]  ;;  %v9369_v48 = vld [vmem:[#allocation89_spill] sm:$0xff] }
 0x3b9   :  { %v3840_v41 = vsel %vm8693_vm6, %v3839_v55, %v3835_v61  ;;  %v4279_v60 = vsel %vm9343_vm4, %v9342_v37, %v4274_v11  ;;  %v8047_v21 = vpop.permute.xlu0 %4429  ;;  %vm9347_vm2 = vcmask 326912   ;;  %vm9348_vm6 = vcmask 1047559   ;;  %v9360_v11 = vld [vmem:[#allocation61_spill] sm:$0xff] }
 0x3ba   :  { %v4284_v17 = vsel %vm9347_vm2, %v4283_v10, %v4279_v60  ;;  %v3847_v44 = vsel %vm9348_vm6, %v3840_v41, %v3846_v45  ;;  %v4288_v13 = vrot.slane %v9350_v25, %v9349_v34  ;;  %v4195_v50 = vrot.slane %v9351_v52, %v7436_v15  ;;  %v4029_v28 = vpop.permute.xlu1 %4028  ;;  %v9371_v25 = vld [vmem:[#allocation111_spill] sm:$0xff] }
 0x3bb   :  { %v4225_v57 = vrot.slane %v9352_v2, %v7428_v49  ;;  %v4938_v6 = vsel %vm8694_vm13, %v9353_v0, %v3847_v44  ;;  %v4190_v46 = vrot.slane %v9354_v18, %v7431_v23  ;;  %v9356_v42 = vrot.slane %v9355_v7, %v7428_v49  ;;  %v9372_v52 = vld [vmem:[#allocation43_spill] sm:$0xff]  ;;  %v9376_v0 = vld [vmem:[#allocation26_spill] sm:$0xff] }
 0x3bc   :  { %v4234_v29 = vrot.slane %v9357_v30, %v7436_v15  ;;  %v4293_v24 = vrot.slane %v4029_v28, %v9358_v22  ;;  %4940 = vst [vmem:[#allocation5] sm:$0xff] %v4938_v6  ;;  %v4229_v14 = vrot.slane %v9359_v5, %v7431_v23  ;;  %v9361_v32 = vrot.slane %v9360_v11, %v7431_v23  ;;  %v9375_v28 = vld [vmem:[#allocation14_spill] sm:$0xff]  ;;  %v9386_v11 = vld [vmem:[#allocation31_spill] sm:$0xff] }
 0x3bd   :  { %v4113_v8 = vsel %vm2990_vm0, %v4112_v12, %v9356_v42  ;;  %vm9362_vm2 = vcmask 392512   ;;  %4537 = vperm.xlu1 %4987, %v9363_v62   ;;  %v4166_v19 = vrot.slane %v9364_v16, %v7462_v33  ;;  %v4191_v38 = vsel %vm2990_vm0, %v4190_v46, %v4186_v59  ;;  %v8095_v37 = vpop.permute.xlu0 %4438  ;;  %v9380_v46 = vld [vmem:[#allocation76_spill] sm:$0xff]  ;;  %v9388_v62 = vld [vmem:[#allocation58_spill] sm:$0xff] }
 0x3be   :  { %v4118_v43 = vsel %vm2997_vm1, %v4117_v1, %v4113_v8  ;;  %v4152_v56 = vsel %vm2990_vm0, %v9361_v32, %v4147_v58  ;;  %v4289_v55 = vsel %vm9362_vm2, %v4288_v13, %v4284_v17  ;;  %vm9365_vm4 = vcmask 458112   ;;  %v9366_v1 = vld [vmem:[#allocation66_spill] sm:$0xff]  ;;  %v9367_v58 = vld [vmem:[#allocation63_spill] sm:$0xff]  ;;  %v4035_v60 = vpop.permute.xlu1 %4034 }
 0x3bf   :  { %v4157_v12 = vsel %vm2997_vm1, %v4156_v53, %v4152_v56  ;;  %v8087_v31 = vsel %vm9365_vm4, %v4293_v24, %v4289_v55  ;;  %v4127_v61 = vrot.slane %v9366_v1, %v7462_v33  ;;  %v4196_v10 = vsel %vm2997_vm1, %v4195_v50, %v4191_v38  ;;  %v9370_v17 = vld [vmem:[#allocation22_spill] sm:$0xff]  ;;  %v9390_v38 = vld [vmem:[#allocation44_spill] sm:$0xff] }
 0x3c0   :  { %v4205_v41 = vrot.slane %v9367_v58, %v7462_v33  ;;  %v4230_v20 = vsel %vm2990_vm0, %v4229_v14, %v4225_v57  ;;  %v4200_v45 = vrot.slane %v9368_v39, %v9341_v4  ;;  %v4210_v53 = vrot.slane %v9369_v48, %v9349_v34  ;;  %v9389_v16 = vld [vmem:[#allocation18_spill] sm:$0xff] }
 0x3c1   :  { %v4235_v3 = vsel %vm2997_vm1, %v4234_v29, %v4230_v20  ;;  %v4244_v59 = vrot.slane %v7907_v40, %v7462_v33  ;;  %v4239_v44 = vrot.slane %v9370_v17, %v9341_v4  ;;  %v4307_v13 = vrot.slane %v9371_v25, %v7431_v23  ;;  %4543 = vperm.xlu1 %4987, %v9375_v28   ;;  %v9384_v29 = vld [vmem:[#allocation17_spill] sm:$0xff]  ;;  %v8142_v58 = vpop.permute.xlu0 %4444  ;;  %v9405_v28 = vld [vmem:[#allocation60_spill] sm:$0xff] }
 0x3c2   :  { %v9373_v50 = vrot.slane %v9372_v52, %v9341_v4  ;;  %vm9374_vm6 = vcmask 261312   ;;  %v4303_v57 = vrot.slane %v4035_v60, %v7428_v49  ;;  %v9377_v6 = vrot.slane %v9376_v0, %v9341_v4  ;;  %v4041_v14 = vpop.permute.xlu1 %4040  ;;  %v9395_v20 = vld [vmem:[#allocation49_spill] sm:$0xff]  ;;  %v9402_v52 = vld [vmem:[#allocation50_spill] sm:$0xff] }
 0x3c3   :  { %vm9378_vm2 = vmmov %vm9374_vm6  ;;  %vm9379_vm4 = vcmask 326912   ;;  %v4176_v7 = vrot.slane %v9380_v46, %v9358_v22  ;;  %v4215_v24 = vrot.slane %v9384_v29, %v9358_v22  ;;  %v4254_v56 = vrot.slane %v7936_v63, %v9358_v22  ;;  %v9394_v63 = vld [vmem:[#allocation162_spill] sm:$0xff] }
 0x3c4   :  { %v4162_v2 = vsel %vm9374_vm6, %v9373_v50, %v4157_v12  ;;  %v4123_v40 = vsel %vm9378_vm2, %v9377_v6, %v4118_v43  ;;  %vm9381_vm13 = vmmov %vm9378_vm2  ;;  %v4137_v43 = vrot.slane %v9386_v11, %v9358_v22  ;;  %v4312_v55 = vrot.slane %v4041_v14, %v7436_v15  ;;  %v9406_v6 = vld [vmem:[#allocation98_spill] sm:$0xff] }
 0x3c5   :  { %v4167_v18 = vsel %vm9379_vm4, %v4166_v19, %v4162_v2  ;;  %v4201_v42 = vsel %vm9381_vm13, %v4200_v45, %v4196_v10  ;;  %vm9382_vm3 = vmmov %vm9379_vm4  ;;  %v4132_v12 = vrot.slane %v9388_v62, %v9349_v34  ;;  %v4249_v19 = vrot.slane %v9389_v16, %v9349_v34 }
 0x3c6   :  { %v4128_v8 = vsel %vm9382_vm3, %v4127_v61, %v4123_v40  ;;  %vm9383_vm5 = vmmov %vm9382_vm3  ;;  %v9391_v1 = vrot.slane %v9390_v38, %v9349_v34  ;;  %v4308_v10 = vsel %vm2990_vm0, %v4307_v13, %v4303_v57  ;;  %v4181_v60 = vrot.slane %v9395_v20, %v9394_v63  ;;  %v4047_v13 = vpop.permute.xlu1 %4046 }
 0x3c7   :  { %v4206_v30 = vsel %vm9383_vm5, %v4205_v41, %v4201_v42  ;;  %vm9385_vm6 = vmmov %vm9378_vm2  ;;  %v9393_v41 = vld [vmem:[#allocation48_spill] sm:$0xff]  ;;  %vm9396_vm5 = vcmask 458112   ;;  %v4313_v48 = vsel %vm2997_vm1, %v4312_v55, %v4308_v10  ;;  %v4220_v50 = vrot.slane %v9402_v52, %v9394_v63  ;;  %v9410_v42 = vld [vmem:[#allocation110_spill] sm:$0xff] }
 0x3c8   :  { %v4240_v5 = vsel %vm9385_vm6, %v4239_v44, %v4235_v3  ;;  %vm9387_vm2 = vmmov %vm9382_vm3  ;;  %vm9392_vm3 = vcmask 392512   ;;  %4549 = vperm.xlu1 %4987, %v9393_v41   ;;  %v9398_v3 = vld [vmem:[#allocation112_spill] sm:$0xff]  ;;  %v4142_v0 = vrot.slane %v9405_v28, %v9394_v63  ;;  %v4259_v40 = vrot.slane %v9406_v6, %v9394_v63  ;;  %v9427_v6 = vld [vmem:[#allocation91_spill] sm:$0xff] }
 0x3c9   :  { %v4245_v32 = vsel %vm9387_vm2, %v4244_v59, %v4240_v5  ;;  %v4172_v61 = vsel %vm9392_vm3, %v9391_v1, %v4167_v18  ;;  %vm9397_vm13 = vmmov %vm9392_vm3  ;;  %v4317_v59 = vrot.slane %v9398_v3, %v9341_v4  ;;  %v9419_v1 = vld [vmem:[#allocation79_spill] sm:$0xff] }
 0x3ca   :  { %v4177_v39 = vsel %vm9396_vm5, %v4176_v7, %v4172_v61  ;;  %v4211_v45 = vsel %vm9397_vm13, %v4210_v53, %v4206_v30  ;;  %vm9399_vm4 = vmmov %vm9392_vm3  ;;  %v4322_v53 = vrot.slane %v4047_v13, %v7462_v33  ;;  %vm9407_vm13 = vcmask 523712   ;;  %v9409_v7 = vld [vmem:[#allocation12_spill] sm:$0xff]  ;;  %v9423_v3 = vld [vmem:[#allocation67_spill] sm:$0xff] }
 0x3cb   :  { %v4133_v17 = vsel %vm9399_vm4, %v4132_v12, %v4128_v8  ;;  %vm9400_vm6 = vmmov %vm9396_vm5  ;;  %v4182_v18 = vsel %vm9407_vm13, %v4181_v60, %v4177_v39  ;;  %vm9408_vm4 = vcmask 261312   ;;  %v4298_v8 = vrot.slane %v9410_v42, %v9394_v63  ;;  %v9417_v12 = vld [vmem:[#allocation23_spill] sm:$0xff]  ;;  %v9424_v13 = vld [vmem:[#allocation65_spill] sm:$0xff] }
 0x3cc   :  { %v4216_v44 = vsel %vm9400_vm6, %v4215_v24, %v4211_v45  ;;  %vm9401_vm2 = vmmov %vm9392_vm3  ;;  %v4318_v46 = vsel %vm9408_vm4, %v4317_v59, %v4313_v48  ;;  %4555 = vperm.xlu1 %4987, %v9409_v7   ;;  %v9413_v24 = vld [vmem:[#allocation113_spill] sm:$0xff]  ;;  %v4337_v16 = vrot.slane %v9417_v12, %v9394_v63  ;;  %vm9418_vm4 = vcmask 392512   ;;  %v9422_v48 = vld [vmem:[#allocation80_spill] sm:$0xff] }
 0x3cd   :  { %v4250_v25 = vsel %vm9401_vm2, %v4249_v19, %v4245_v32  ;;  %vm9403_vm3 = vmmov %vm9396_vm5  ;;  %vm9412_vm2 = vcmask 326912   ;;  %v4327_v5 = vrot.slane %v9413_v24, %v9349_v34  ;;  %v4053_v32 = vpop.permute.xlu1 %4052  ;;  %v4346_v59 = vrot.slane %v9423_v3, %v7431_v23  ;;  %v9436_v12 = vld [vmem:[#allocation81_spill] sm:$0xff]  ;;  %v9442_v3 = vld [vmem:[#allocation46_spill] sm:$0xff] }
 0x3ce   :  { %v4138_v2 = vsel %vm9403_vm3, %v4137_v43, %v4133_v17  ;;  %vm9404_vm5 = vmmov %vm9403_vm3  ;;  %v4323_v29 = vsel %vm9412_vm2, %v4322_v53, %v4318_v46  ;;  %v8175_v43 = vpop.permute.xlu0 %4450  ;;  %v4332_v62 = vrot.slane %v4053_v32, %v9358_v22 }
 0x3cf   :  { %v4255_v57 = vsel %vm9404_vm5, %v4254_v56, %v4250_v25  ;;  %vm9411_vm6 = vmmov %vm9407_vm13  ;;  %v4328_v38 = vsel %vm9418_vm4, %v4327_v5, %v4323_v29  ;;  %v9432_v5 = vld [vmem:[#allocation9_spill] sm:$0xff] }
 0x3d0   :  { %v4221_v30 = vsel %vm9411_vm6, %v4220_v50, %v4216_v44  ;;  %vm9414_vm3 = vmmov %vm9411_vm6  ;;  %4570 = vperm.xlu1 %4987, %v9419_v1   ;;  %vm9420_vm6 = vcmask 458112   ;;  %v9425_v50 = vld [vmem:[#allocation100_spill] sm:$0xff] }
 0x3d1   :  { %v4143_v14 = vsel %vm9414_vm3, %v4142_v0, %v4138_v2  ;;  %vm9415_vm5 = vmmov %vm9414_vm3  ;;  %v4333_v10 = vsel %vm9420_vm6, %v4332_v62, %v4328_v38  ;;  %v4356_v2 = vrot.slane %v9425_v50, %v9341_v4  ;;  %v9435_v62 = vld [vmem:[#allocation118_spill] sm:$0xff] }
 0x3d2   :  { %v4260_v11 = vsel %vm9415_vm5, %v4259_v40, %v4255_v57  ;;  %v4417_v56 = vsel %vm3307_vm7, %v4182_v18, %v4143_v14  ;;  %vm9416_vm13 = vmmov %vm9414_vm3  ;;  %v8191_v39 = vpop.permute.xlu0 %4456  ;;  %vm9428_vm5 = vcmask 326912   ;;  %v9429_v18 = vld [vmem:[#allocation101_spill] sm:$0xff] }
 0x3d3   :  { %v4299_v55 = vsel %vm9416_vm13, %v4298_v8, %v8087_v31  ;;  %v4418_v19 = vsel %vm3309_vm8, %v4221_v30, %v4417_v56  ;;  %vm9421_vm2 = vmmov %vm9414_vm3  ;;  %v4059_v31 = vpop.permute.xlu1 %4058  ;;  %vm9426_vm3 = vcmask 261312   ;;  %v4366_v46 = vrot.slane %v9429_v18, %v9349_v34  ;;  %v9430_v8 = vld [vmem:[#allocation119_spill] sm:$0xff] }
 0x3d4   :  { %v4419_v61 = vsel %vm3311_vm9, %v4260_v11, %v4418_v19  ;;  %v4338_v20 = vsel %vm9421_vm2, %v4337_v16, %v4333_v10  ;;  %v4342_v45 = vrot.slane %v4059_v31, %v7428_v49  ;;  %4576 = vperm.xlu1 %4987, %v9422_v48   ;;  %v4376_v30 = vrot.slane %v9430_v8, %v9394_v63  ;;  %vm9431_vm13 = vmmov %vm9418_vm4  ;;  %v9437_v10 = vld [vmem:[#allocation121_spill] sm:$0xff]  ;;  %v9440_v48 = vld [vmem:[#allocation120_spill] sm:$0xff] }
 0x3d5   :  { %v4420_v41 = vsel %vm3313_vm10, %v4299_v55, %v4419_v61  ;;  %vm9433_vm4 = vmmov %vm9420_vm6  ;;  %v4385_v16 = vrot.slane %v9436_v12, %v7431_v23  ;;  %v4639_v8 = vrot.slane %v8095_v37, %v7739_v9 }
 0x3d6   :  { %v4421_v60 = vsel %vm3315_vm11, %v4338_v20, %v4420_v41  ;;  %v4347_v25 = vsel %vm2990_vm0, %v4346_v59, %v4342_v45  ;;  %v8203_v57 = vpop.permute.xlu0 %4462  ;;  %vm9434_vm6 = vmmov %vm9421_vm2  ;;  %v9438_v20 = vld [vmem:[#allocation25_spill] sm:$0xff]  ;;  %v4405_v59 = vrot.slane %v9442_v3, %v9349_v34  ;;  %v4624_v34 = vrot.slane %v8047_v21, %v7601_v35 }
 0x3d7   :  { %v4065_v17 = vpop.permute.xlu1 %4064  ;;  %v4395_v31 = vrot.slane %v9438_v20, %v9341_v4  ;;  %vm9439_vm2 = vmmov %vm9426_vm3 }
 0x3d8   :  { %v4351_v44 = vrot.slane %v4065_v17, %v7436_v15  ;;  %4597 = vperm.xlu1 %4987, %v9424_v13  }
 0x3da   :  { %v4352_v52 = vsel %vm2997_vm1, %v4351_v44, %v4347_v25  ;;  %v8214_v29 = vpop.permute.xlu0 %4468  ;;  %v9443_v25 = vld [vmem:[#allocation108_spill] sm:$0xff] }
 0x3db   :  { %v4071_v53 = vpop.permute.xlu1 %4070  ;;  %v4357_v0 = vsel %vm9426_vm3, %v4356_v2, %v4352_v52  ;;  %vm9441_vm3 = vmmov %vm9428_vm5  ;;  %v4415_v4 = vrot.slane %v9443_v25, %v9394_v63  ;;  %v9449_v63 = vld [vmem:[#allocation82_spill] sm:$0xff] }
 0x3dc   :  { %v4361_v28 = vrot.slane %v4071_v53, %v7462_v33  ;;  %4600 = vperm.xlu1 %4987, %v9427_v6  }
 0x3de   :  { %v4362_v40 = vsel %vm9428_vm5, %v4361_v28, %v4357_v0  ;;  %v8225_v19 = vpop.permute.xlu0 %4474  ;;  %vm9447_vm5 = vmmov %vm9434_vm6 }
 0x3df   :  { %v4077_v7 = vpop.permute.xlu1 %4076  ;;  %v4367_v24 = vsel %vm9431_vm13, %v4366_v46, %v4362_v40 }
 0x3e0   :  { %v4371_v42 = vrot.slane %v4077_v7, %v9358_v22  ;;  %4582 = vperm.xlu1 %4987, %v9432_v5  }
 0x3e2   :  { %v4372_v14 = vsel %vm9433_vm4, %v4371_v42, %v4367_v24  ;;  %v8234_v45 = vpop.permute.xlu0 %4480 }
 0x3e3   :  { %v4377_v11 = vsel %vm9434_vm6, %v4376_v30, %v4372_v14  ;;  %v4083_v32 = vpop.permute.xlu1 %4082  ;;  %vm9451_vm6 = vcmask 851712  }
 0x3e4   :  { %v4422_v56 = vsel %vm3317_vm12, %v4377_v11, %v4421_v60  ;;  %v4381_v55 = vrot.slane %v4083_v32, %v7428_v49  ;;  %4564 = vperm.xlu1 %4987, %v9435_v62   ;;  %v4649_v11 = vrot.slane %v8142_v58, %v7768_v51 }
 0x3e6   :  { %v4386_v61 = vsel %vm2990_vm0, %v4385_v16, %v4381_v55  ;;  %vm9444_vm0 = vmmov %vm9431_vm13  ;;  %v8247_v50 = vpop.permute.xlu0 %4486  ;;  %vm9448_vm13 = vcmask 1047559  }
 0x3e7   :  { %v4089_v38 = vpop.permute.xlu1 %4088 }
 0x3e8   :  { %v4390_v1 = vrot.slane %v4089_v38, %v7436_v15  ;;  %4606 = vperm.xlu1 %4987, %v9437_v10   ;;  %v4659_v38 = vrot.slane %v8175_v43, %v7524_v36 }
 0x3ea   :  { %v4391_v41 = vsel %vm2997_vm1, %v4390_v1, %v4386_v61  ;;  %vm9446_vm1 = vmmov %vm9433_vm4  ;;  %v4493_v40 = vpop.permute.xlu0 %4492  ;;  %vm9450_vm4 = vcmask 786112   ;;  %v4668_v61 = vrot.slane %v8191_v39, %v7548_v54  ;;  %v4688_v39 = vrot.slane %v8214_v29, %v7768_v51 }
 0x3eb   :  { %v4095_v49 = vpop.permute.xlu1 %4094  ;;  %v4396_v23 = vsel %vm9439_vm2, %v4395_v31, %v4391_v41  ;;  %vm9452_vm2 = vcmask 917312   ;;  %v4707_v29 = vrot.slane %v8234_v45, %v7548_v54  ;;  %v4727_v45 = vrot.slane %v4493_v40, %v7768_v51 }
 0x3ec   :  { %v4400_v60 = vrot.slane %v4095_v49, %v7462_v33  ;;  %4588 = vperm.xlu1 %4987, %v9440_v48   ;;  %v9445_v33 = vld [vmem:[#allocation59_spill] sm:$0xff]  ;;  %v4678_v49 = vrot.slane %v8203_v57, %v7739_v9 }
 0x3ee   :  { %v4401_v15 = vsel %vm9441_vm3, %v4400_v60, %v4396_v23  ;;  %v8263_v30 = vpop.permute.xlu0 %4498  ;;  %vm9453_vm3 = vcmask 982912  }
 0x3ef   :  { %v4101_v17 = vpop.permute.xlu1 %4100  ;;  %v4406_v13 = vsel %vm9444_vm0, %v4405_v59, %v4401_v15  ;;  %vm9454_vm0 = vcmask 1048512  }
 0x3f0   :  { %v4410_v44 = vrot.slane %v4101_v17, %v9358_v22  ;;  %4591 = vperm.xlu1 %4987, %v9445_v33   ;;  %v4698_v33 = vrot.slane %v8225_v19, %v7524_v36 }
 0x3f2   :  { %v4411_v52 = vsel %vm9446_vm1, %v4410_v44, %v4406_v13  ;;  %v4505_v62 = vpop.permute.xlu0 %4504  ;;  %vm9455_vm1 = vmmov %vm9450_vm4 }
 0x3f3   :  { %v4416_v2 = vsel %vm9447_vm5, %v4415_v4, %v4411_v52  ;;  %v4427_v53 = vpop.permute.xlu1 %4426  ;;  %vm9456_vm5 = vmmov %vm9451_vm6 }
 0x3f4   :  { %v8251_v28 = vsel %vm9448_vm13, %v4416_v2, %v4422_v56  ;;  %v4620_v22 = vrot.slane %v4427_v53, %v7524_v36  ;;  %4615 = vperm.xlu1 %4987, %v9449_v63   ;;  %vm9457_vm13 = vmmov %vm9452_vm2 }
 0x3f6   :  { %v4625_v0 = vsel %vm3524_vm14, %v4624_v34, %v4620_v22  ;;  %v4511_v58 = vpop.permute.xlu0 %4510 }
 0x3f7   :  { %v4433_v6 = vpop.permute.xlu1 %4432 }
 0x3f8   :  { %v4629_v18 = vrot.slane %v4433_v6, %v7548_v54 }
 0x3fa   :  { %v4630_v46 = vsel %vm3531_vm15, %v4629_v18, %v4625_v0  ;;  %v4517_v48 = vpop.permute.xlu0 %4516  ;;  %v4717_v0 = vrot.slane %v8247_v50, %v7739_v9 }
 0x3fb   :  { %v4436_v7 = vpop.permute.xlu1 %4435 }
 0x3fc   :  { %v4634_v42 = vrot.slane %v4436_v7, %v7556_v47 }
 0x3fe   :  { %v4635_v21 = vsel %vm9450_vm4, %v4634_v42, %v4630_v46  ;;  %vm9458_vm4 = vmmov %vm9453_vm3  ;;  %v8292_v25 = vpop.permute.xlu0 %4522 }
 0x3ff   :  { %v4442_v24 = vpop.permute.xlu1 %4441  ;;  %v4640_v5 = vsel %vm9451_vm6, %v4639_v8, %v4635_v21  ;;  %vm9459_vm6 = vmmov %vm9454_vm0 }
 0x400   :  { %v4644_v14 = vrot.slane %v4442_v24, %v7571_v27 }
 0x402   :  { %v4645_v32 = vsel %vm9452_vm2, %v4644_v14, %v4640_v5  ;;  %v8303_v22 = vpop.permute.xlu0 %4528  ;;  %vm9461_vm2 = vmmov %vm9456_vm5 }
 0x403   :  { %v4448_v56 = vpop.permute.xlu1 %4447  ;;  %v4650_v55 = vsel %vm9453_vm3, %v4649_v11, %v4645_v32  ;;  %vm9462_vm3 = vmmov %vm9457_vm13  ;;  %v4737_v11 = vrot.slane %v8263_v30, %v7524_v36 }
 0x404   :  { %v4654_v37 = vrot.slane %v4448_v56, %v7592_v26  ;;  %v4746_v56 = vrot.slane %v4505_v62, %v7548_v54  ;;  %v4766_v62 = vrot.slane %v4517_v48, %v7768_v51 }
 0x406   :  { %v4655_v12 = vsel %vm9454_vm0, %v4654_v37, %v4650_v55  ;;  %v8312_v7 = vpop.permute.xlu0 %4534  ;;  %vm9463_vm0 = vmmov %vm9458_vm4 }
 0x407   :  { %v4454_v16 = vpop.permute.xlu1 %4453 }
 0x408   :  { %v4663_v1 = vrot.slane %v4454_v16, %v7601_v35 }
 0x40a   :  { %v4664_v10 = vsel %vm3524_vm14, %v4663_v1, %v4659_v38  ;;  %v8321_v32 = vpop.permute.xlu0 %4540 }
 0x40b   :  { %v4460_v41 = vpop.permute.xlu1 %4459  ;;  %v4669_v20 = vsel %vm3531_vm15, %v4668_v61, %v4664_v10  ;;  %v4756_v61 = vrot.slane %v4511_v58, %v7739_v9 }
 0x40c   :  { %v4673_v31 = vrot.slane %v4460_v41, %v7556_v47 }
 0x40e   :  { %v4674_v60 = vsel %vm9455_vm1, %v4673_v31, %v4669_v20  ;;  %v4547_v38 = vpop.permute.xlu0 %4546 }
 0x40f   :  { %v4466_v23 = vpop.permute.xlu1 %4465  ;;  %v4679_v43 = vsel %vm9456_vm5, %v4678_v49, %v4674_v60 }
 0x410   :  { %v4683_v15 = vrot.slane %v4466_v23, %v7571_v27 }
 0x412   :  { %v4684_v3 = vsel %vm9457_vm13, %v4683_v15, %v4679_v43  ;;  %vm9467_vm13 = vmmov %vm9462_vm3  ;;  %v4553_v49 = vpop.permute.xlu0 %4552 }
 0x413   :  { %v4472_v59 = vpop.permute.xlu1 %4471  ;;  %v4689_v17 = vsel %vm9458_vm4, %v4688_v39, %v4684_v3  ;;  %vm9468_vm4 = vmmov %vm9463_vm0 }
 0x414   :  { %v4693_v44 = vrot.slane %v4472_v59, %v7592_v26 }
 0x416   :  { %v4694_v57 = vsel %vm9459_vm6, %v4693_v44, %v4689_v17  ;;  %v4559_v39 = vpop.permute.xlu0 %4558 }
 0x417   :  { %v4929_v4 = vsel %vm3307_vm7, %v4694_v57, %v4655_v12  ;;  %v4478_v13 = vpop.permute.xlu1 %4477  ;;  %vm9460_vm7 = vmmov %vm9455_vm1 }
 0x418   :  { %v4702_v52 = vrot.slane %v4478_v13, %v7601_v35  ;;  %vm9464_vm1 = vmmov %vm9459_vm6 }
 0x419   :  { %vm9465_vm5 = vmmov %vm9460_vm7 }
 0x41a   :  { %v4703_v2 = vsel %vm3524_vm14, %v4702_v52, %v4698_v33  ;;  %vm9469_vm6 = vmmov %vm9464_vm1  ;;  %v4574_v17 = vpop.permute.xlu0 %4573 }
 0x41b   :  { %v4484_v53 = vpop.permute.xlu1 %4483  ;;  %v4708_v34 = vsel %vm3531_vm15, %v4707_v29, %v4703_v2 }
 0x41c   :  { %v4712_v63 = vrot.slane %v4484_v53, %v7556_v47 }
 0x41e   :  { %v4713_v6 = vsel %vm9460_vm7, %v4712_v63, %v4708_v34  ;;  %v4595_v57 = vpop.permute.xlu0 %4594  ;;  %vm9471_vm7 = vmmov %vm9465_vm5 }
 0x41f   :  { %v4490_v19 = vpop.permute.xlu1 %4489  ;;  %v4718_v18 = vsel %vm9461_vm2, %v4717_v0, %v4713_v6 }
 0x420   :  { %v4722_v46 = vrot.slane %v4490_v19, %v7571_v27 }
 0x422   :  { %v4723_v42 = vsel %vm9462_vm3, %v4722_v46, %v4718_v18  ;;  %v4580_v13 = vpop.permute.xlu0 %4579  ;;  %v4815_v18 = vrot.slane %v4547_v38, %v7524_v36  ;;  %v4776_v46 = vrot.slane %v8292_v25, %v7524_v36  ;;  %v4893_v38 = vrot.slane %v4595_v57, %v7524_v36  ;;  %vm9472_vm3 = vmmov %vm9461_vm2 }
 0x423   :  { %v4496_v8 = vpop.permute.xlu1 %4495  ;;  %v4728_v21 = vsel %vm9463_vm0, %v4727_v45, %v4723_v42  ;;  %vm9475_vm0 = vmmov %vm9461_vm2 }
 0x424   :  { %v4732_v24 = vrot.slane %v4496_v8, %v7592_v26 }
 0x426   :  { %v4733_v50 = vsel %vm9464_vm1, %v4732_v24, %v4728_v21  ;;  %v4562_v52 = vpop.permute.xlu0 %4561  ;;  %v4824_v24 = vrot.slane %v4553_v49, %v7548_v54  ;;  %vm9476_vm1 = vmmov %vm9467_vm13 }
 0x427   :  { %v4930_v5 = vsel %vm3309_vm8, %v4733_v50, %v4929_v4  ;;  %v4502_v14 = vpop.permute.xlu1 %4501  ;;  %vm9466_vm8 = vmmov %vm9461_vm2 }
 0x428   :  { %v4741_v40 = vrot.slane %v4502_v14, %v7601_v35 }
 0x42a   :  { %v4742_v55 = vsel %vm3524_vm14, %v4741_v40, %v4737_v11  ;;  %v4604_v53 = vpop.permute.xlu0 %4603  ;;  %v4785_v11 = vrot.slane %v8303_v22, %v7548_v54 }
 0x42b   :  { %v4508_v37 = vpop.permute.xlu1 %4507  ;;  %v4747_v12 = vsel %vm3531_vm15, %v4746_v56, %v4742_v55  ;;  %v4858_v56 = vrot.slane %v4574_v17, %v7601_v35 }
 0x42c   :  { %v4751_v16 = vrot.slane %v4508_v37, %v7556_v47 }
 0x42e   :  { %v4752_v1 = vsel %vm9465_vm5, %v4751_v16, %v4747_v12  ;;  %v4586_v63 = vpop.permute.xlu0 %4585  ;;  %v4795_v16 = vrot.slane %v8312_v7, %v7739_v9 }
 0x42f   :  { %v4514_v10 = vpop.permute.xlu1 %4513  ;;  %v4757_v41 = vsel %vm9466_vm8, %v4756_v61, %v4752_v1  ;;  %v4834_v61 = vrot.slane %v4559_v39, %v7739_v9  ;;  %vm9477_vm8 = vmmov %vm9468_vm4 }
 0x430   :  { %v4761_v30 = vrot.slane %v4514_v10, %v7571_v27 }
 0x432   :  { %v4762_v20 = vsel %vm9467_vm13, %v4761_v30, %v4757_v41  ;;  %v4568_v42 = vpop.permute.xlu0 %4567 }
 0x433   :  { %v4520_v31 = vpop.permute.xlu1 %4519  ;;  %v4767_v23 = vsel %vm9468_vm4, %v4766_v62, %v4762_v20 }
 0x434   :  { %v4771_v60 = vrot.slane %v4520_v31, %v7592_v26 }
 0x436   :  { %v4772_v43 = vsel %vm9469_vm6, %v4771_v60, %v4767_v23  ;;  %v4610_v41 = vpop.permute.xlu0 %4609 }
 0x437   :  { %v8338_v15 = vsel %vm3311_vm9, %v4772_v43, %v4930_v5  ;;  %v4526_v58 = vpop.permute.xlu1 %4525  ;;  %vm9470_vm9 = vmmov %vm9465_vm5  ;;  %v4839_v43 = vrot.slane %v4562_v52, %v7571_v27 }
 0x438   :  { %v4780_v19 = vrot.slane %v4526_v58, %v7601_v35  ;;  %v4907_v58 = vrot.slane %v4604_v53, %v7556_v47 }
 0x43a   :  { %v4781_v50 = vsel %vm3524_vm14, %v4780_v19, %v4776_v46 }
 0x43b   :  { %v4532_v3 = vpop.permute.xlu1 %4531  ;;  %v4786_v1 = vsel %vm3531_vm15, %v4785_v11, %v4781_v50 }
 0x43c   :  { %v4790_v5 = vrot.slane %v4532_v3, %v7556_v47  ;;  %v4805_v3 = vrot.slane %v8321_v32, %v7768_v51 }
 0x43e   :  { %v4791_v10 = vsel %vm9471_vm7, %v4790_v5, %v4786_v1  ;;  %vm9480_vm7 = vmmov %vm9469_vm6 }
 0x43f   :  { %v4538_v59 = vpop.permute.xlu1 %4537  ;;  %v4796_v39 = vsel %vm9472_vm3, %v4795_v16, %v4791_v10  ;;  %vm9482_vm3 = vmmov %vm9468_vm4 }
 0x443   :  { %v8340_v44 = vpop.permute.xlu1 %4543 }
 0x444   :  { %v4810_v17 = vrot.slane %v8340_v44, %v7592_v26  ;;  %v4917_v44 = vrot.slane %v4610_v41, %v7571_v27 }
 0x447   :  { %v4550_v48 = vpop.permute.xlu1 %4549 }
 0x448   :  { %v4819_v6 = vrot.slane %v4550_v48, %v7601_v35 }
 0x44a   :  { %v4820_v8 = vsel %vm3524_vm14, %v4819_v6, %v4815_v18 }
 0x44b   :  { %v4556_v4 = vpop.permute.xlu1 %4555  ;;  %v4825_v55 = vsel %vm3531_vm15, %v4824_v24, %v4820_v8 }
 0x44c   :  { %v4829_v21 = vrot.slane %v4556_v4, %v7556_v47 }
 0x44e   :  { %v4830_v22 = vsel %vm9470_vm9, %v4829_v21, %v4825_v55  ;;  %vm9479_vm9 = vmmov %vm9476_vm1 }
 0x44f   :  { %v4571_v33 = vpop.permute.xlu1 %4570  ;;  %v4835_v62 = vsel %vm9461_vm2, %v4834_v61, %v4830_v22  ;;  %vm9481_vm2 = vmmov %vm9476_vm1 }
 0x450   :  { %v4854_v14 = vrot.slane %v4571_v33, %v7524_v36 }
 0x452   :  { %v4859_v30 = vsel %vm3524_vm14, %v4858_v56, %v4854_v14 }
 0x453   :  { %v4577_v29 = vpop.permute.xlu1 %4576 }
 0x454   :  { %v4863_v40 = vrot.slane %v4577_v29, %v7548_v54  ;;  %v4849_v29 = vrot.slane %v4568_v42, %v7592_v26 }
 0x456   :  { %v4864_v20 = vsel %vm3531_vm15, %v4863_v40, %v4859_v30 }
 0x457   :  { %v4598_v2 = vpop.permute.xlu1 %4597 }
 0x458   :  { %v4897_v25 = vrot.slane %v4598_v2, %v7601_v35  ;;  %v4800_v35 = vrot.slane %v4538_v59, %v7571_v27  ;;  %v4613_v2 = vpop.permute.xlu0 %4612 }
 0x459   :  { %v4922_v46 = vrot.slane %v4613_v2, %v7768_v51 }
 0x45a   :  { %v4898_v7 = vsel %vm3524_vm14, %v4897_v25, %v4893_v38  ;;  %vm9473_vm14 = vmmov %vm9467_vm13 }
 0x45b   :  { %v4601_v34 = vpop.permute.xlu1 %4600  ;;  %v4801_v59 = vsel %vm9473_vm14, %v4800_v35, %v4796_v39  ;;  %vm9478_vm13 = vmmov %vm9475_vm0 }
 0x45c   :  { %v4902_v37 = vrot.slane %v4601_v34, %v7548_v54  ;;  %v4868_v54 = vrot.slane %v4580_v13, %v7556_v47  ;;  %v4878_v13 = vrot.slane %v4586_v63, %v7571_v27  ;;  %v4806_v53 = vsel %vm9468_vm4, %v4805_v3, %v4801_v59  ;;  %vm9483_vm14 = vmmov %vm9469_vm6 }
 0x45e   :  { %v4903_v31 = vsel %vm3531_vm15, %v4902_v37, %v4898_v7  ;;  %vm9474_vm15 = vmmov %vm9465_vm5 }
 0x45f   :  { %v4583_v0 = vpop.permute.xlu1 %4582  ;;  %v4869_v57 = vsel %vm9474_vm15, %v4868_v54, %v4864_v20  ;;  %v4908_v4 = vsel %vm9465_vm5, %v4907_v58, %v4903_v31  ;;  %vm9484_vm15 = vmmov %vm9482_vm3  ;;  %vm9487_vm5 = vcmask 523264  }
 0x460   :  { %v4873_v36 = vrot.slane %v4583_v0, %v7739_v9  ;;  %v4811_v0 = vsel %vm9469_vm6, %v4810_v17, %v4806_v53 }
 0x461   :  { %v4932_v42 = vsel %vm3313_vm10, %v4811_v0, %v8338_v15 }
 0x462   :  { %v4874_v48 = vsel %vm9475_vm0, %v4873_v36, %v4869_v57  ;;  %vm9485_vm0 = vmmov %vm9469_vm6 }
 0x463   :  { %v4565_v45 = vpop.permute.xlu1 %4564  ;;  %v4879_v6 = vsel %vm9479_vm9, %v4878_v13, %v4874_v48 }
 0x464   :  { %v4844_v49 = vrot.slane %v4565_v45, %v7768_v51 }
 0x467   :  { %v4607_v12 = vpop.permute.xlu1 %4606 }
 0x468   :  { %v4912_v60 = vrot.slane %v4607_v12, %v7739_v9  ;;  %v4840_v9 = vsel %vm9476_vm1, %v4839_v43, %v4835_v62  ;;  %vm9486_vm1 = vcmask 1047559  }
 0x469   :  { %v4845_v33 = vsel %vm9477_vm8, %v4844_v49, %v4840_v9 }
 0x46a   :  { %v4913_v32 = vsel %vm9478_vm13, %v4912_v60, %v4908_v4  ;;  %v4850_v63 = vsel %vm9480_vm7, %v4849_v29, %v4845_v33 }
 0x46b   :  { %v4589_v23 = vpop.permute.xlu1 %4588  ;;  %v4918_v19 = vsel %vm9481_vm2, %v4917_v44, %v4913_v32  ;;  %v4933_v21 = vsel %vm3315_vm11, %v4850_v63, %v4932_v42 }
 0x46c   :  { %v4883_v47 = vrot.slane %v4589_v23, %v7768_v51  ;;  %v4923_v24 = vsel %vm9484_vm15, %v4922_v46, %v4918_v19 }
 0x46e   :  { %v4884_v18 = vsel %vm9482_vm3, %v4883_v47, %v4879_v6 }
 0x46f   :  { %v4592_v52 = vpop.permute.xlu1 %4591 }
 0x470   :  { %v4888_v34 = vrot.slane %v4592_v52, %v7592_v26 }
 0x472   :  { %v4889_v45 = vsel %vm9483_vm14, %v4888_v34, %v4884_v18 }
 0x473   :  { %v4616_v27 = vpop.permute.xlu1 %4615  ;;  %v4934_v50 = vsel %vm3317_vm12, %v4889_v45, %v4933_v21 }
 0x474   :  { %v4927_v8 = vrot.slane %v4616_v27, %v7592_v26 }
 0x476   :  { %v4928_v5 = vsel %vm9485_vm0, %v4927_v8, %v4923_v24 }
 0x477   :  { %v4935_v51 = vsel %vm9486_vm1, %v4928_v5, %v4934_v50 }
 0x478   :  { %v4939_v14 = vsel %vm9487_vm5, %v8251_v28, %v4935_v51 }
 0x479   :  { %4941 = vst [vmem:[#allocation5 + $0x8] sm:$0xff] %v4939_v14 }
 0x47a   :  { %5021 = shalt.err (!%p5018_p12)
}
 0x47b   :  { %s5022_s4 = scalar_lea.hbm %s8427_s1, 256 }
 0x47c   :  { %p5023_p13 = scmp.ne.s32.totalorder %s8427_s1, %s5022_s4  ;;  %p5026_p0 = scmp.lt.u32.totalorder %s5022_s4, %s8427_s1 }
 0x47e   :  { %p5028_p1 = pnand %p5026_p0, %p5023_p13 }
 0x480   :  { %5031 = shalt.err (!%p5028_p1)
}
 0x481   :  { %4951 = dma.vmem_to_hbm [thread:$0]  %s4949_s29, 256, %s8427_s1, [#allocation4]  }
 0x482   :  { %5034 = dma.done.wait [#allocation4], 256  }
 0x483   :  { %5035 = vsyncadd [#allocation4], 4294967040 }
 0x484   :  { %4955 = vsyncpa [#allocation3], 1 }
 0x485   :  { %4956 = vsyncpa [#allocation4], 1 }

</bundles_post_ra>
